<compile_context>
chip_gen: v7x
topology: tpu7x:2x2x1
jax: 0.10.0
libtpu: 0.0.40
codegen_flags: <defaults>
</compile_context>

<pallas_src>
import functools
from concurrent.futures import ThreadPoolExecutor

import numpy as np
import jax
import jax.numpy as jnp
from jax.experimental import pallas as pl
from jax.experimental.pallas import tpu as pltpu

_EPS = 1e-7          # torchvision eps in distance_box_iou_loss
_LOG_CLAMP = -100.0  # torch binary_cross_entropy log clamp
_B8 = 8              # padded contraction half-depth for the fused BCE matmul


def _log_sigmoid(x):
    """Numerically stable log(sigmoid(x)) = -softplus(-x)."""
    return jnp.minimum(x, 0.0) - jnp.log(1.0 + jnp.exp(-jnp.abs(x)))


def _round_up(x, m):
    return ((x + m - 1) // m) * m


# -----------------------------------------------------------------------------
# Kernel 1: pairwise cost matrix, tiled (B, tn, tm) blocks.
# -----------------------------------------------------------------------------
def cost_matrix_kernel(lpcat_ref, tcat_ref, bp_ref, bt_ref, cost_ref, *, inv_b):
    # lpcat_ref : (tn, 16)  [clamped log(sigmoid) | clamped log(1-sigmoid)] of the
    #                       logits, transposed; columns >= B (in each half) are zero.
    # tcat_ref  : (16, tm)  [t ; 1 - t] target labels; rows >= B (each half) zero.
    # bp_ref    : (4B, tn)  pred boxes, coordinate-major cxcywh.
    # bt_ref    : (4B, tm)  target boxes, coordinate-major cxcywh.
    # cost_ref  : (B, tn, tm)
    B = cost_ref.shape[0]

    # ---- BCE cost (batch mean, broadcast over B): ONE MXU matmul ----
    # bce_mean[i,j] = -(1/B) * sum_b [ t[b,j]*lp[b,i] + (1-t[b,j])*l1p[b,i] ]
    bce_mean = -jnp.dot(lpcat_ref[...], tcat_ref[...],
                        preferred_element_type=jnp.float32) * inv_b       # (tn, tm)

    bp = bp_ref[...]
    bt = bt_ref[...]
    cxp, cyp, wp, hp = bp[0:B], bp[B:2 * B], bp[2 * B:3 * B], bp[3 * B:4 * B]  # (B, tn)
    cxt, cyt, wt, ht = bt[0:B], bt[B:2 * B], bt[2 * B:3 * B], bt[3 * B:4 * B]  # (B, tm)

    # preds broadcast along axis 1 (tn), targets along axis 2 (tm)
    x1p = (cxp - 0.5 * wp)[:, :, None]; x2p = (cxp + 0.5 * wp)[:, :, None]
    y1p = (cyp - 0.5 * hp)[:, :, None]; y2p = (cyp + 0.5 * hp)[:, :, None]
    x1t = (cxt - 0.5 * wt)[:, None, :]; x2t = (cxt + 0.5 * wt)[:, None, :]
    y1t = (cyt - 0.5 * ht)[:, None, :]; y2t = (cyt + 0.5 * ht)[:, None, :]

    # ---- distance_box_iou_loss (reduction='none') per (b, i, j) ----
    iw = jnp.minimum(x2p, x2t) - jnp.maximum(x1p, x1t)
    ih = jnp.minimum(y2p, y2t) - jnp.maximum(y1p, y1t)
    inter = jnp.maximum(iw, 0.0) * jnp.maximum(ih, 0.0)   # identical to masked select
    union = (wp * hp)[:, :, None] + (wt * ht)[:, None, :] - inter
    # approx reciprocal (EUP slot): this matrix only feeds the argmin-style matcher.
    iou = inter * pl.reciprocal(union + _EPS, approx=True)

    ew = jnp.maximum(x2p, x2t) - jnp.minimum(x1p, x1t)    # enclosing box
    eh = jnp.maximum(y2p, y2t) - jnp.minimum(y1p, y1t)
    diag2 = ew * ew + eh * eh + _EPS
    dcx = cxp[:, :, None] - cxt[:, None, :]               # centers == cx/cy inputs
    dcy = cyp[:, :, None] - cyt[:, None, :]
    diou = (1.0 - iou
            + (dcx * dcx + dcy * dcy) * pl.reciprocal(diag2, approx=True))   # (B,tn,tm)

    # ---- L1 cost: mean over batch and the 4 coords, broadcast over B ----
    l1 = (jnp.abs(dcx) + jnp.abs(dcy)
          + jnp.abs(wp[:, :, None] - wt[:, None, :])
          + jnp.abs(hp[:, :, None] - ht[:, None, :]))
    l1_mean = jnp.sum(l1, axis=0) * (0.25 * inv_b)        # (tn, tm)

    cost_ref[...] = diou + (bce_mean + l1_mean)[None, :, :]


def _pick_cost_tiles(N, M, B):
    """Tile / VMEM-limit selection for the cost-matrix kernel.

    Larger tiles amortise the ~0.35us per-grid-step overhead and avoid re-DMAing
    the target-side operands; the lane axis (tm) is grown preferentially for long
    unmasked store bursts.  The scoped-VMEM budget is capped at 48 MiB so the tile
    also fits v7x's 64 MiB physical VMEM, and we keep >=2 steps on the parallel N
    axis when possible so both v7x TensorCores get fed (free on v5e/v6e).
    """
    n128 = _round_up(N, 128)
    m128 = _round_up(M, 128)

    def pick(base, cands):
        for c in cands:
            if base % c == 0:
                return c
        return 128

    tm = pick(m128, (512, 256, 128))
    tn = pick(n128, (256, 128))
    if n128 // tn < 2 <= n128 // 128:   # keep >=2 grid steps along N when possible
        tn = 128

    budget = 48 * 1024 * 1024
    def est(tn_, tm_):  # double-buffered output + ~10 live (B,tn,tm) f32 temps
        return (2 + 10) * B * tn_ * tm_ * 4
    while est(tn, tm) > budget and tm > 128:
        tm //= 2
    while est(tn, tm) > budget and tn > 128:
        tn //= 2
    vmem = min(max(32 * 1024 * 1024, 2 * est(tn, tm)), budget)
    return tn, tm, vmem


def compute_cost_matrix(logits, labels_target, bp_packed, bt_packed):
    """logits (B,N), labels_target (B,M), boxes packed (4B,N)/(4B,M) -> (B,N,M)."""
    B, N = logits.shape
    M = labels_target.shape[1]
    tn, tm, vmem_limit = _pick_cost_tiles(N, M, B)
    N_pad = _round_up(N, tn)
    M_pad = _round_up(M, tm)

    # Fused-BCE operands: a single (tn,16)x(16,tm) matmul per tile.
    lp = jnp.maximum(_log_sigmoid(logits), _LOG_CLAMP)     # log(sigmoid(x))
    l1p = jnp.maximum(_log_sigmoid(-logits), _LOG_CLAMP)   # log(1 - sigmoid(x))
    lp_cat = jnp.zeros((N_pad, 2 * _B8), jnp.float32)
    lp_cat = lp_cat.at[:N, :B].set(lp.T).at[:N, _B8:_B8 + B].set(l1p.T)
    t_cat = jnp.zeros((2 * _B8, M_pad), jnp.float32)
    t_cat = (t_cat.at[:B, :M].set(labels_target)
                  .at[_B8:_B8 + B, :M].set(1.0 - labels_target))

    bp_p = jnp.pad(bp_packed, ((0, 0), (0, N_pad - N)))
    bt_p = jnp.pad(bt_packed, ((0, 0), (0, M_pad - M)))

    grid = (N_pad // tn, M_pad // tm)
    kernel = functools.partial(cost_matrix_kernel, inv_b=1.0 / B)
    cost = pl.pallas_call(
        kernel,
        out_shape=jax.ShapeDtypeStruct((B, N_pad, M_pad), jnp.float32),
        grid_spec=pltpu.PrefetchScalarGridSpec(
            num_scalar_prefetch=0,
            grid=grid,
            in_specs=[
                pl.BlockSpec((tn, 2 * _B8), lambda i, j: (i, 0)),    # [lp | l1p]^T
                pl.BlockSpec((2 * _B8, tm), lambda i, j: (0, j)),    # [t ; 1-t]
                pl.BlockSpec((4 * B, tn), lambda i, j: (0, i)),      # pred boxes
                pl.BlockSpec((4 * B, tm), lambda i, j: (0, j)),      # target boxes
            ],
            out_specs=pl.BlockSpec((B, tn, tm), lambda i, j: (0, i, j)),
        ),
        compiler_params=pltpu.CompilerParams(
            dimension_semantics=("parallel", "parallel"),
            vmem_limit_bytes=vmem_limit,
        ),
    )(lp_cat, t_cat, bp_p, bt_p)
    return cost[:, :N, :M]


# -----------------------------------------------------------------------------
# Kernel 2: per matched-pair loss terms + masked reductions, one packed output.
# Output rows (each (1, K_pad), summed over batch): 0=diou_sum, 1=iou_sum,
# 2=bce_sum, 3=l1_sum, 4=positive count, 5..7=zeros.  Exact f32 divides here.
# -----------------------------------------------------------------------------
def matched_loss_kernel(logit_ref, t_ref, bp_ref, bt_ref, out_ref, *, k_valid):
    B, Kp = t_ref.shape
    x = logit_ref[...]
    t = t_ref[...]
    valid = jax.lax.broadcasted_iota(jnp.int32, (B, Kp), 1) < k_valid

    lp = jnp.maximum(_log_sigmoid(x), _LOG_CLAMP)
    l1p = jnp.maximum(_log_sigmoid(-x), _LOG_CLAMP)
    bce = -(t * lp + (1.0 - t) * l1p)

    bp = bp_ref[...]
    bt = bt_ref[...]
    cxp, cyp, wp, hp = bp[0:B], bp[B:2 * B], bp[2 * B:3 * B], bp[3 * B:4 * B]
    cxt, cyt, wt, ht = bt[0:B], bt[B:2 * B], bt[2 * B:3 * B], bt[3 * B:4 * B]

    x1p = cxp - 0.5 * wp; x2p = cxp + 0.5 * wp
    y1p = cyp - 0.5 * hp; y2p = cyp + 0.5 * hp
    x1t = cxt - 0.5 * wt; x2t = cxt + 0.5 * wt
    y1t = cyt - 0.5 * ht; y2t = cyt + 0.5 * ht

    iw = jnp.minimum(x2p, x2t) - jnp.maximum(x1p, x1t)
    ih = jnp.minimum(y2p, y2t) - jnp.maximum(y1p, y1t)
    inter = jnp.maximum(iw, 0.0) * jnp.maximum(ih, 0.0)
    union = wp * hp + wt * ht - inter

    iou = inter / union            # diagonal of ops.box_iou (no eps, like torch)

    iou_d = inter / (union + _EPS)  # distance_box_iou_loss (eps = 1e-7)
    ew = jnp.maximum(x2p, x2t) - jnp.minimum(x1p, x1t)
    eh = jnp.maximum(y2p, y2t) - jnp.minimum(y1p, y1t)
    diag2 = ew * ew + eh * eh + _EPS
    dcx = cxp - cxt
    dcy = cyp - cyt
    diou = 1.0 - iou_d + (dcx * dcx + dcy * dcy) / diag2

    # sum over the 4 coordinates of |pred - target| (mean /(count*4) outside)
    l1 = jnp.abs(dcx) + jnp.abs(dcy) + jnp.abs(wp - wt) + jnp.abs(hp - ht)

    pos = valid & (t == 1.0)
    out_ref[0:1, :] = jnp.sum(jnp.where(pos, diou, 0.0), axis=0, keepdims=True)
    out_ref[1:2, :] = jnp.sum(jnp.where(pos, iou, 0.0), axis=0, keepdims=True)
    out_ref[2:3, :] = jnp.sum(jnp.where(valid, bce, 0.0), axis=0, keepdims=True)
    out_ref[3:4, :] = jnp.sum(jnp.where(pos, l1, 0.0), axis=0, keepdims=True)
    out_ref[4:5, :] = jnp.sum(pos.astype(jnp.float32), axis=0, keepdims=True)
    out_ref[5:8, :] = jnp.zeros((3, Kp), jnp.float32)


def compute_matched_terms(logits_m, lt_m, bp_m, bt_m, k_valid):
    _, K_pad = logits_m.shape
    vmem = pl.BlockSpec(memory_space=pltpu.MemorySpace.VMEM)
    kernel = functools.partial(matched_loss_kernel, k_valid=k_valid)
    return pl.pallas_call(
        kernel,
        out_shape=jax.ShapeDtypeStruct((8, K_pad), jnp.float32),
        in_specs=[vmem] * 4,
        out_specs=vmem,
    )(logits_m, lt_m, bp_m, bt_m)


# -----------------------------------------------------------------------------
# Host-side Hungarian matching (O(n^3) Jonker-Volgenant, square matrices).
# -----------------------------------------------------------------------------
def _linear_sum_assignment_square(cost_np):
    """Exact minimum-cost assignment for a square cost matrix (like scipy)."""
    cost = np.asarray(cost_np, dtype=np.float64)
    n, m = cost.shape
    assert n == m, "matcher assumes a square cost matrix"
    # TODO(synk): extend to rectangular cost matrices if N != M is ever needed.
    INF = np.inf
    u = np.zeros(n + 1)
    v = np.zeros(m + 1)
    p = np.zeros(m + 1, dtype=np.int64)     # p[j] = row matched to column j (1-based)
    way = np.zeros(m + 1, dtype=np.int64)
    for i in range(1, n + 1):
        p[0] = i
        j0 = 0
        minv = np.full(m + 1, INF)
        used = np.zeros(m + 1, dtype=bool)
        while True:
            used[j0] = True
            i0 = p[j0]
            cur = cost[i0 - 1, :] - u[i0] - v[1:]
            free = ~used[1:]
            better = free & (cur < minv[1:])
            minv[1:][better] = cur[better]
            way[1:][better] = j0
            masked = np.where(free, minv[1:], INF)
            j1 = int(np.argmin(masked)) + 1
            delta = masked[j1 - 1]
            u[p[used]] += delta
            v[used] -= delta
            minv[1:][free] -= delta
            j0 = j1
            if p[j0] == 0:
                break
        while True:
            j1 = way[j0]
            p[j0] = p[j1]
            j0 = j1
            if j0 == 0:
                break
    col_for_row = np.zeros(n, dtype=np.int64)
    for j in range(1, m + 1):
        col_for_row[p[j] - 1] = j - 1
    return np.arange(n, dtype=np.int64), col_for_row


# -----------------------------------------------------------------------------
# Full forward pass (equivalent of Loss_fn.forward).  Returns (total_loss, iou).
# -----------------------------------------------------------------------------
def loss_fn(labels_pred, bbox_pred, labels_target, bbox_target):
    B, N = labels_pred.shape[:2]
    M = labels_target.shape[1]

    logits = labels_pred.reshape(B, N).astype(jnp.float32)          # squeeze(2)
    lt = labels_target.astype(jnp.float32)
    # coordinate-major packing: row c*B + b holds coordinate c of batch b
    bp_packed = jnp.transpose(bbox_pred.astype(jnp.float32), (2, 0, 1)).reshape(4 * B, N)
    bt_packed = jnp.transpose(bbox_target.astype(jnp.float32), (2, 0, 1)).reshape(4 * B, M)

    # --- cost matrix (Pallas kernel 1) ---
    cost = compute_cost_matrix(logits, lt, bp_packed, bt_packed)     # (B, N, M)

    # --- Hungarian assignment per batch (host, like scipy in the torch code) ---
    # TODO(synk): device-side auction/JV assignment to avoid this host sync.
    cost_np = np.asarray(jax.device_get(cost))
    with ThreadPoolExecutor(max_workers=min(B, 8)) as ex:
        results = list(ex.map(_linear_sum_assignment_square,
                              [cost_np[b] for b in range(B)]))
    rows = np.stack([r for r, _ in results], axis=0)
    cols = np.stack([c for _, c in results], axis=0)
    row_idx = jnp.asarray(rows, dtype=jnp.int32)                     # (B, K)
    col_idx = jnp.asarray(cols, dtype=jnp.int32)                     # (B, K)

    # --- gather matched pairs (packed layout) and pad K to a full 128-lane tile ---
    K = N
    K_pad = _round_up(K, 128)
    kp = K_pad - K
    logits_m = jnp.pad(jnp.take_along_axis(logits, row_idx, axis=1), ((0, 0), (0, kp)))
    lt_m = jnp.pad(jnp.take_along_axis(lt, col_idx, axis=1), ((0, 0), (0, kp)))
    bp_m = jnp.pad(jnp.take_along_axis(bp_packed, jnp.tile(row_idx, (4, 1)), axis=1),
                   ((0, 0), (0, kp)))
    bt_m = jnp.pad(jnp.take_along_axis(bt_packed, jnp.tile(col_idx, (4, 1)), axis=1),
                   ((0, 0), (0, kp)))

    # --- per matched-pair loss terms + in-kernel masked reductions (kernel 2) ---
    packed = compute_matched_terms(logits_m, lt_m, bp_m, bt_m, K)    # (8, K_pad)
    sums = jnp.sum(packed[:5], axis=1)                               # (5,)
    diou_sum, iou_sum, bce_sum, l1_sum, count = (
        sums[0], sums[1], sums[2], sums[3], sums[4])

    diou_loss = diou_sum / count
    iou_val = iou_sum / count
    label_loss = bce_sum / (B * K)                                   # BCE over all (B, K)
    bbox_loss = l1_sum / (count * 4.0)                               # L1 mean over (P, 4)
    total_loss = diou_loss + label_loss + bbox_loss
    return total_loss, iou_val


if __name__ == "__main__":
    key = jax.random.PRNGKey(0)
    B, N, M = 2, 8, 8
    ks = jax.random.split(key, 6)

    labels_pred = jax.random.normal(ks[0], (B, N, 1), dtype=jnp.float32)
    bbox_pred = jnp.concatenate(
        [jax.random.uniform(ks[1], (B, N, 2), minval=0.2, maxval=0.8),
         jax.random.uniform(ks[2], (B, N, 2), minval=0.1, maxval=0.4)], axis=-1)
    labels_target = (jax.random.uniform(ks[3], (B, M)) > 0.4).astype(jnp.float32)
    labels_target = labels_target.at[:, 0].set(1.0)   # guarantee positives
    bbox_target = jnp.concatenate(
        [jax.random.uniform(ks[4], (B, M, 2), minval=0.2, maxval=0.8),
         jax.random.uniform(ks[5], (B, M, 2), minval=0.1, maxval=0.4)], axis=-1)

    total_loss, iou_val = loss_fn(labels_pred, bbox_pred, labels_target, bbox_target)
    total_loss, iou_val = jax.block_until_ready((total_loss, iou_val))

    assert np.isfinite(float(total_loss)) and np.isfinite(float(iou_val))
    print("KERNEL_OK")
</pallas_src>

<mosaic_0001>
module attributes {stable_mosaic.version = 11 : i64} {
  func.func @cost_matrix_kernel(%arg0: i32, %arg1: i32, %arg2: memref<128x16xf32, #tpu.memory_space<vmem>>, %arg3: memref<16x128xf32, #tpu.memory_space<vmem>>, %arg4: memref<8x128xf32, #tpu.memory_space<vmem>>, %arg5: memref<8x128xf32, #tpu.memory_space<vmem>>, %arg6: memref<2x128x128xf32, #tpu.memory_space<vmem>>) attributes {dimension_semantics = [#tpu.dimension_semantics<parallel>, #tpu.dimension_semantics<parallel>], iteration_bounds = array<i64: 1, 1>, scalar_prefetch = 0 : i64, scratch_operands = 0 : i64, tpu.core_type = #tpu.core_type<tc>, window_params = [{transform_indices = @transform_0, window_bounds = array<i64: 128, 16>}, {transform_indices = @transform_1, window_bounds = array<i64: 16, 128>}, {transform_indices = @transform_2, window_bounds = array<i64: 8, 128>}, {transform_indices = @transform_3, window_bounds = array<i64: 8, 128>}, {transform_indices = @transform_4, window_bounds = array<i64: 2, 128, 128>}]} {
    %c0 = arith.constant 0 : index
    %c0_0 = arith.constant 0 : index
    %0 = vector.load %arg2[%c0, %c0_0] : memref<128x16xf32, #tpu.memory_space<vmem>>, vector<128x16xf32>
    %c0_1 = arith.constant 0 : index
    %c0_2 = arith.constant 0 : index
    %1 = vector.load %arg3[%c0_1, %c0_2] : memref<16x128xf32, #tpu.memory_space<vmem>>, vector<16x128xf32>
    %cst = arith.constant dense<0.000000e+00> : vector<128x128xf32>
    %2 = tpu.matmul %0, %1, %cst {dimension_numbers = #tpu.dot_dimension_numbers<[1], [0], [0], [1], [0, 0, 1, 1], [], []>} : vector<128x16xf32>, vector<16x128xf32>, vector<128x128xf32> -> vector<128x128xf32>
    %cst_3 = arith.constant 0.000000e+00 : f32
    %3 = vector.broadcast %cst_3 : f32 to vector<128x128xf32>
    %4 = arith.subf %3, %2 : vector<128x128xf32>
    %cst_4 = arith.constant 5.000000e-01 : f32
    %5 = vector.broadcast %cst_4 : f32 to vector<128x128xf32>
    %6 = arith.mulf %4, %5 : vector<128x128xf32>
    %c0_5 = arith.constant 0 : index
    %c0_6 = arith.constant 0 : index
    %7 = vector.load %arg4[%c0_5, %c0_6] : memref<8x128xf32, #tpu.memory_space<vmem>>, vector<8x128xf32>
    %c0_7 = arith.constant 0 : index
    %c0_8 = arith.constant 0 : index
    %8 = vector.load %arg5[%c0_7, %c0_8] : memref<8x128xf32, #tpu.memory_space<vmem>>, vector<8x128xf32>
    %9 = vector.extract_strided_slice %7 {offsets = [0, 0], sizes = [2, 128], strides = [1, 1]} : vector<8x128xf32> to vector<2x128xf32>
    %10 = vector.extract_strided_slice %7 {offsets = [2, 0], sizes = [2, 128], strides = [1, 1]} : vector<8x128xf32> to vector<2x128xf32>
    %11 = vector.extract_strided_slice %7 {offsets = [4, 0], sizes = [2, 128], strides = [1, 1]} : vector<8x128xf32> to vector<2x128xf32>
    %12 = vector.extract_strided_slice %7 {offsets = [6, 0], sizes = [2, 128], strides = [1, 1]} : vector<8x128xf32> to vector<2x128xf32>
    %13 = vector.extract_strided_slice %8 {offsets = [0, 0], sizes = [2, 128], strides = [1, 1]} : vector<8x128xf32> to vector<2x128xf32>
    %14 = vector.extract_strided_slice %8 {offsets = [2, 0], sizes = [2, 128], strides = [1, 1]} : vector<8x128xf32> to vector<2x128xf32>
    %15 = vector.extract_strided_slice %8 {offsets = [4, 0], sizes = [2, 128], strides = [1, 1]} : vector<8x128xf32> to vector<2x128xf32>
    %16 = vector.extract_strided_slice %8 {offsets = [6, 0], sizes = [2, 128], strides = [1, 1]} : vector<8x128xf32> to vector<2x128xf32>
    %cst_9 = arith.constant 5.000000e-01 : f32
    %17 = vector.broadcast %cst_9 : f32 to vector<2x128xf32>
    %18 = arith.mulf %17, %11 : vector<2x128xf32>
    %19 = arith.subf %9, %18 : vector<2x128xf32>
    %20 = vector.shape_cast %19 : vector<2x128xf32> to vector<2x128x1xf32>
    %cst_10 = arith.constant 5.000000e-01 : f32
    %21 = vector.broadcast %cst_10 : f32 to vector<2x128xf32>
    %22 = arith.mulf %21, %11 : vector<2x128xf32>
    %23 = arith.addf %9, %22 : vector<2x128xf32>
    %24 = vector.shape_cast %23 : vector<2x128xf32> to vector<2x128x1xf32>
    %cst_11 = arith.constant 5.000000e-01 : f32
    %25 = vector.broadcast %cst_11 : f32 to vector<2x128xf32>
    %26 = arith.mulf %25, %12 : vector<2x128xf32>
    %27 = arith.subf %10, %26 : vector<2x128xf32>
    %28 = vector.shape_cast %27 : vector<2x128xf32> to vector<2x128x1xf32>
    %cst_12 = arith.constant 5.000000e-01 : f32
    %29 = vector.broadcast %cst_12 : f32 to vector<2x128xf32>
    %30 = arith.mulf %29, %12 : vector<2x128xf32>
    %31 = arith.addf %10, %30 : vector<2x128xf32>
    %32 = vector.shape_cast %31 : vector<2x128xf32> to vector<2x128x1xf32>
    %cst_13 = arith.constant 5.000000e-01 : f32
    %33 = vector.broadcast %cst_13 : f32 to vector<2x128xf32>
    %34 = arith.mulf %33, %15 : vector<2x128xf32>
    %35 = arith.subf %13, %34 : vector<2x128xf32>
    %36 = vector.shape_cast %35 : vector<2x128xf32> to vector<2x1x128xf32>
    %cst_14 = arith.constant 5.000000e-01 : f32
    %37 = vector.broadcast %cst_14 : f32 to vector<2x128xf32>
    %38 = arith.mulf %37, %15 : vector<2x128xf32>
    %39 = arith.addf %13, %38 : vector<2x128xf32>
    %40 = vector.shape_cast %39 : vector<2x128xf32> to vector<2x1x128xf32>
    %cst_15 = arith.constant 5.000000e-01 : f32
    %41 = vector.broadcast %cst_15 : f32 to vector<2x128xf32>
    %42 = arith.mulf %41, %16 : vector<2x128xf32>
    %43 = arith.subf %14, %42 : vector<2x128xf32>
    %44 = vector.shape_cast %43 : vector<2x128xf32> to vector<2x1x128xf32>
    %cst_16 = arith.constant 5.000000e-01 : f32
    %45 = vector.broadcast %cst_16 : f32 to vector<2x128xf32>
    %46 = arith.mulf %45, %16 : vector<2x128xf32>
    %47 = arith.addf %14, %46 : vector<2x128xf32>
    %48 = vector.shape_cast %47 : vector<2x128xf32> to vector<2x1x128xf32>
    %49 = vector.broadcast %24 : vector<2x128x1xf32> to vector<2x128x128xf32>
    %50 = vector.broadcast %40 : vector<2x1x128xf32> to vector<2x128x128xf32>
    %51 = arith.minimumf %49, %50 : vector<2x128x128xf32>
    %52 = vector.broadcast %20 : vector<2x128x1xf32> to vector<2x128x128xf32>
    %53 = vector.broadcast %36 : vector<2x1x128xf32> to vector<2x128x128xf32>
    %54 = arith.maximumf %52, %53 : vector<2x128x128xf32>
    %55 = arith.subf %51, %54 : vector<2x128x128xf32>
    %56 = vector.broadcast %32 : vector<2x128x1xf32> to vector<2x128x128xf32>
    %57 = vector.broadcast %48 : vector<2x1x128xf32> to vector<2x128x128xf32>
    %58 = arith.minimumf %56, %57 : vector<2x128x128xf32>
    %59 = vector.broadcast %28 : vector<2x128x1xf32> to vector<2x128x128xf32>
    %60 = vector.broadcast %44 : vector<2x1x128xf32> to vector<2x128x128xf32>
    %61 = arith.maximumf %59, %60 : vector<2x128x128xf32>
    %62 = arith.subf %58, %61 : vector<2x128x128xf32>
    %cst_17 = arith.constant 0.000000e+00 : f32
    %63 = vector.broadcast %cst_17 : f32 to vector<2x128x128xf32>
    %64 = arith.maximumf %55, %63 : vector<2x128x128xf32>
    %cst_18 = arith.constant 0.000000e+00 : f32
    %65 = vector.broadcast %cst_18 : f32 to vector<2x128x128xf32>
    %66 = arith.maximumf %62, %65 : vector<2x128x128xf32>
    %67 = arith.mulf %64, %66 : vector<2x128x128xf32>
    %68 = arith.mulf %11, %12 : vector<2x128xf32>
    %69 = vector.shape_cast %68 : vector<2x128xf32> to vector<2x128x1xf32>
    %70 = arith.mulf %15, %16 : vector<2x128xf32>
    %71 = vector.shape_cast %70 : vector<2x128xf32> to vector<2x1x128xf32>
    %72 = vector.broadcast %69 : vector<2x128x1xf32> to vector<2x128x128xf32>
    %73 = vector.broadcast %71 : vector<2x1x128xf32> to vector<2x128x128xf32>
    %74 = arith.addf %72, %73 : vector<2x128x128xf32>
    %75 = arith.subf %74, %67 : vector<2x128x128xf32>
    %cst_19 = arith.constant 1.000000e-07 : f32
    %76 = vector.broadcast %cst_19 : f32 to vector<2x128x128xf32>
    %77 = arith.addf %75, %76 : vector<2x128x128xf32>
    %78 = tpu.reciprocal %77 {approx = true} : vector<2x128x128xf32> -> vector<2x128x128xf32>
    %79 = arith.mulf %67, %78 : vector<2x128x128xf32>
    %80 = vector.broadcast %24 : vector<2x128x1xf32> to vector<2x128x128xf32>
    %81 = vector.broadcast %40 : vector<2x1x128xf32> to vector<2x128x128xf32>
    %82 = arith.maximumf %80, %81 : vector<2x128x128xf32>
    %83 = vector.broadcast %20 : vector<2x128x1xf32> to vector<2x128x128xf32>
    %84 = vector.broadcast %36 : vector<2x1x128xf32> to vector<2x128x128xf32>
    %85 = arith.minimumf %83, %84 : vector<2x128x128xf32>
    %86 = arith.subf %82, %85 : vector<2x128x128xf32>
    %87 = vector.broadcast %32 : vector<2x128x1xf32> to vector<2x128x128xf32>
    %88 = vector.broadcast %48 : vector<2x1x128xf32> to vector<2x128x128xf32>
    %89 = arith.maximumf %87, %88 : vector<2x128x128xf32>
    %90 = vector.broadcast %28 : vector<2x128x1xf32> to vector<2x128x128xf32>
    %91 = vector.broadcast %44 : vector<2x1x128xf32> to vector<2x128x128xf32>
    %92 = arith.minimumf %90, %91 : vector<2x128x128xf32>
    %93 = arith.subf %89, %92 : vector<2x128x128xf32>
    %94 = arith.mulf %86, %86 : vector<2x128x128xf32>
    %95 = arith.mulf %93, %93 : vector<2x128x128xf32>
    %96 = arith.addf %94, %95 : vector<2x128x128xf32>
    %cst_20 = arith.constant 1.000000e-07 : f32
    %97 = vector.broadcast %cst_20 : f32 to vector<2x128x128xf32>
    %98 = arith.addf %96, %97 : vector<2x128x128xf32>
    %99 = vector.shape_cast %9 : vector<2x128xf32> to vector<2x128x1xf32>
    %100 = vector.shape_cast %13 : vector<2x128xf32> to vector<2x1x128xf32>
    %101 = vector.broadcast %99 : vector<2x128x1xf32> to vector<2x128x128xf32>
    %102 = vector.broadcast %100 : vector<2x1x128xf32> to vector<2x128x128xf32>
    %103 = arith.subf %101, %102 : vector<2x128x128xf32>
    %104 = vector.shape_cast %10 : vector<2x128xf32> to vector<2x128x1xf32>
    %105 = vector.shape_cast %14 : vector<2x128xf32> to vector<2x1x128xf32>
    %106 = vector.broadcast %104 : vector<2x128x1xf32> to vector<2x128x128xf32>
    %107 = vector.broadcast %105 : vector<2x1x128xf32> to vector<2x128x128xf32>
    %108 = arith.subf %106, %107 : vector<2x128x128xf32>
    %cst_21 = arith.constant 1.000000e+00 : f32
    %109 = vector.broadcast %cst_21 : f32 to vector<2x128x128xf32>
    %110 = arith.subf %109, %79 : vector<2x128x128xf32>
    %111 = arith.mulf %103, %103 : vector<2x128x128xf32>
    %112 = arith.mulf %108, %108 : vector<2x128x128xf32>
    %113 = arith.addf %111, %112 : vector<2x128x128xf32>
    %114 = tpu.reciprocal %98 {approx = true} : vector<2x128x128xf32> -> vector<2x128x128xf32>
    %115 = arith.mulf %113, %114 : vector<2x128x128xf32>
    %116 = arith.addf %110, %115 : vector<2x128x128xf32>
    %117 = math.absf %103 : vector<2x128x128xf32>
    %118 = math.absf %108 : vector<2x128x128xf32>
    %119 = arith.addf %117, %118 : vector<2x128x128xf32>
    %120 = vector.shape_cast %11 : vector<2x128xf32> to vector<2x128x1xf32>
    %121 = vector.shape_cast %15 : vector<2x128xf32> to vector<2x1x128xf32>
    %122 = vector.broadcast %120 : vector<2x128x1xf32> to vector<2x128x128xf32>
    %123 = vector.broadcast %121 : vector<2x1x128xf32> to vector<2x128x128xf32>
    %124 = arith.subf %122, %123 : vector<2x128x128xf32>
    %125 = math.absf %124 : vector<2x128x128xf32>
    %126 = arith.addf %119, %125 : vector<2x128x128xf32>
    %127 = vector.shape_cast %12 : vector<2x128xf32> to vector<2x128x1xf32>
    %128 = vector.shape_cast %16 : vector<2x128xf32> to vector<2x1x128xf32>
    %129 = vector.broadcast %127 : vector<2x128x1xf32> to vector<2x128x128xf32>
    %130 = vector.broadcast %128 : vector<2x1x128xf32> to vector<2x128x128xf32>
    %131 = arith.subf %129, %130 : vector<2x128x128xf32>
    %132 = math.absf %131 : vector<2x128x128xf32>
    %133 = arith.addf %126, %132 : vector<2x128x128xf32>
    %cst_22 = arith.constant dense<0.000000e+00> : vector<128x128xf32>
    %134 = vector.multi_reduction <add>, %133, %cst_22 [0] : vector<2x128x128xf32> to vector<128x128xf32>
    %cst_23 = arith.constant 1.250000e-01 : f32
    %135 = vector.broadcast %cst_23 : f32 to vector<128x128xf32>
    %136 = arith.mulf %134, %135 : vector<128x128xf32>
    %137 = arith.addf %6, %136 : vector<128x128xf32>
    %138 = vector.shape_cast %137 : vector<128x128xf32> to vector<1x128x128xf32>
    %139 = vector.broadcast %138 : vector<1x128x128xf32> to vector<2x128x128xf32>
    %140 = arith.addf %116, %139 : vector<2x128x128xf32>
    %c0_24 = arith.constant 0 : index
    %c0_25 = arith.constant 0 : index
    %c0_26 = arith.constant 0 : index
    %141 = vector.load %arg6[%c0_24, %c0_25, %c0_26] : memref<2x128x128xf32, #tpu.memory_space<vmem>>, vector<2x128x128xf32>
    tpu.vector_store %arg6[%c0_24, %c0_25, %c0_26], %140 {strides = array<i32>} : memref<2x128x128xf32, #tpu.memory_space<vmem>>, vector<2x128x128xf32>,
    return
  }
  func.func @transform_0(%arg0: i32, %arg1: i32) -> (i32, i32) {
    %c0_i32 = arith.constant 0 : i32
    %c0_i32_0 = arith.constant 0 : i32
    return %arg0, %c0_i32 : i32, i32
  }
  func.func @transform_1(%arg0: i32, %arg1: i32) -> (i32, i32) {
    %c0_i32 = arith.constant 0 : i32
    %c0_i32_0 = arith.constant 0 : i32
    return %c0_i32, %arg1 : i32, i32
  }
  func.func @transform_2(%arg0: i32, %arg1: i32) -> (i32, i32) {
    %c0_i32 = arith.constant 0 : i32
    %c0_i32_0 = arith.constant 0 : i32
    return %c0_i32, %arg0 : i32, i32
  }
  func.func @transform_3(%arg0: i32, %arg1: i32) -> (i32, i32) {
    %c0_i32 = arith.constant 0 : i32
    %c0_i32_0 = arith.constant 0 : i32
    return %c0_i32, %arg1 : i32, i32
  }
  func.func @transform_4(%arg0: i32, %arg1: i32) -> (i32, i32, i32) {
    %c0_i32 = arith.constant 0 : i32
    %c0_i32_0 = arith.constant 0 : i32
    return %c0_i32, %arg0, %arg1 : i32, i32, i32
  }
}

</mosaic_0001>

<bundles_post_ra>
// kernel: tpu_custom_call.1
= control target key start
LH: loop header
LB: loop body
LE: loop exit
PB: predicated region body
PF: predicated region fallthrough
CT: control target
= control target key end

     0   :  { %v269_v1 = vlaneseq  ;;  %s7091_s0 = inlined_call_operand.vmem [shape: f32[128,16], index: 0, kind: input, shape index: {}]   ;;  %s7092_s1 = inlined_call_operand.vmem [shape: f32[16,128], index: 1, kind: input, shape index: {}]   ;;  %s7093_s2 = inlined_call_operand.vmem [shape: f32[8,128], index: 2, kind: input, shape index: {}]   ;;  %s7094_s3 = inlined_call_operand.vmem [shape: f32[8,128], index: 3, kind: input, shape index: {}]   ;;  %s7095_s4 = inlined_call_operand.hbm [shape: f32[2,128,128], index: 4, kind: output, shape index: {}]  }
   0x1   :  { %v3435_v0 = vld [vmem:[%s7093_s2] sm:$0xff] }
   0x2   :  { %9 = vsyncpa [#allocation3], 0  ;;  %v264_v2 = vmul.f32 0.5, %v3435_v0  ;;  %v3438_v3 = vshrl.u32 %v269_v1, 7  ;;  %vm36_vm0 = vcmask 130048  }
   0x4   :  { %7285 = vst [vmem:[#allocation5_spill] sm:$0xff] %v3438_v3  ;;  %v266_v4 = vrot.slane %v264_v2, 4  ;;  %v3441_v5 = vsub.s32 0, %v3438_v3  ;;  %v3449_v8 = vsub.s32 1, %v3438_v3  ;;  %v3469_v17 = vsub.s32 2, %v3438_v3 }
   0x5   :  { %v3506_v35 = vsub.s32 3, %v3438_v3 }
   0x6   :  { %7286 = vst [vmem:[#allocation6_spill] sm:$0xff] %v3441_v5  ;;  %v3444_v6 = vsub.f32 %v3435_v0, %v266_v4  ;;  %v3454_v10 = vadd.f32 %v266_v4, %v3435_v0  ;;  %7287 = vst [vmem:[#allocation7_spill] sm:$0xff] %v3469_v17 }
   0x7   :  { %7288 = vst [vmem:[#allocation8_spill] sm:$0xff] %v3506_v35 }
   0x8   :  { %v272_v7 = vrot.slane %v3444_v6, %v3441_v5  ;;  %v339_v9 = vrot.slane %v3444_v6, %v3449_v8  ;;  %v407_v11 = vrot.slane %v3454_v10, %v3441_v5  ;;  %v474_v12 = vrot.slane %v3454_v10, %v3449_v8 }
   0x9   :  { %v541_v20 = vrot.slane %v3444_v6, %v3469_v17  ;;  %v608_v38 = vrot.slane %v3444_v6, %v3506_v35  ;;  %v675_v55 = vrot.slane %v3454_v10, %v3469_v17 }
   0xa   :  { %282 = vbcast.lane.b32.xlu1 %v272_v7, 272  ;;  %274 = vbcast.lane.b32.xlu0 %v272_v7, 256 }
   0xe   :  { %286 = vbcast.lane.b32.xlu1 %v272_v7, 280  ;;  %278 = vbcast.lane.b32.xlu0 %v272_v7, 264 }
  0x12   :  { %294 = vbcast.lane.b32.xlu1 %v272_v7, 296  ;;  %290 = vbcast.lane.b32.xlu0 %v272_v7, 288 }
  0x16   :  { %302 = vbcast.lane.b32.xlu1 %v272_v7, 312  ;;  %298 = vbcast.lane.b32.xlu0 %v272_v7, 304 }
  0x1a   :  { %310 = vbcast.lane.b32.xlu1 %v272_v7, 328  ;;  %306 = vbcast.lane.b32.xlu0 %v272_v7, 320 }
  0x1e   :  { %318 = vbcast.lane.b32.xlu1 %v272_v7, 344  ;;  %314 = vbcast.lane.b32.xlu0 %v272_v7, 336 }
  0x22   :  { %326 = vbcast.lane.b32.xlu1 %v272_v7, 360  ;;  %322 = vbcast.lane.b32.xlu0 %v272_v7, 352 }
  0x26   :  { %334 = vbcast.lane.b32.xlu1 %v272_v7, 376  ;;  %330 = vbcast.lane.b32.xlu0 %v272_v7, 368 }
  0x2a   :  { %345 = vbcast.lane.b32.xlu1 %v339_v9, 264  ;;  %341 = vbcast.lane.b32.xlu0 %v339_v9, 256 }
  0x2e   :  { %353 = vbcast.lane.b32.xlu1 %v339_v9, 280  ;;  %349 = vbcast.lane.b32.xlu0 %v339_v9, 272 }
  0x32   :  { %361 = vbcast.lane.b32.xlu1 %v339_v9, 296  ;;  %357 = vbcast.lane.b32.xlu0 %v339_v9, 288 }
  0x36   :  { %369 = vbcast.lane.b32.xlu1 %v339_v9, 312  ;;  %365 = vbcast.lane.b32.xlu0 %v339_v9, 304 }
  0x3a   :  { %377 = vbcast.lane.b32.xlu1 %v339_v9, 328  ;;  %373 = vbcast.lane.b32.xlu0 %v339_v9, 320 }
  0x3e   :  { %385 = vbcast.lane.b32.xlu1 %v339_v9, 344  ;;  %381 = vbcast.lane.b32.xlu0 %v339_v9, 336 }
  0x42   :  { %393 = vbcast.lane.b32.xlu1 %v339_v9, 360  ;;  %389 = vbcast.lane.b32.xlu0 %v339_v9, 352 }
  0x46   :  { %401 = vbcast.lane.b32.xlu1 %v339_v9, 376  ;;  %397 = vbcast.lane.b32.xlu0 %v339_v9, 368 }
  0x4a   :  { %413 = vbcast.lane.b32.xlu1 %v407_v11, 264  ;;  %409 = vbcast.lane.b32.xlu0 %v407_v11, 256 }
  0x4e   :  { %421 = vbcast.lane.b32.xlu1 %v407_v11, 280  ;;  %417 = vbcast.lane.b32.xlu0 %v407_v11, 272 }
  0x52   :  { %429 = vbcast.lane.b32.xlu1 %v407_v11, 296  ;;  %425 = vbcast.lane.b32.xlu0 %v407_v11, 288 }
  0x56   :  { %437 = vbcast.lane.b32.xlu1 %v407_v11, 312  ;;  %433 = vbcast.lane.b32.xlu0 %v407_v11, 304 }
  0x5a   :  { %445 = vbcast.lane.b32.xlu1 %v407_v11, 328  ;;  %441 = vbcast.lane.b32.xlu0 %v407_v11, 320 }
  0x5e   :  { %453 = vbcast.lane.b32.xlu1 %v407_v11, 344  ;;  %449 = vbcast.lane.b32.xlu0 %v407_v11, 336 }
  0x62   :  { %461 = vbcast.lane.b32.xlu1 %v407_v11, 360  ;;  %457 = vbcast.lane.b32.xlu0 %v407_v11, 352 }
  0x66   :  { %469 = vbcast.lane.b32.xlu1 %v407_v11, 376  ;;  %465 = vbcast.lane.b32.xlu0 %v407_v11, 368 }
  0x6a   :  { %480 = vbcast.lane.b32.xlu1 %v474_v12, 264  ;;  %476 = vbcast.lane.b32.xlu0 %v474_v12, 256 }
  0x6e   :  { %488 = vbcast.lane.b32.xlu1 %v474_v12, 280  ;;  %484 = vbcast.lane.b32.xlu0 %v474_v12, 272 }
  0x72   :  { %496 = vbcast.lane.b32.xlu1 %v474_v12, 296  ;;  %492 = vbcast.lane.b32.xlu0 %v474_v12, 288 }
  0x76   :  { %504 = vbcast.lane.b32.xlu1 %v474_v12, 312  ;;  %500 = vbcast.lane.b32.xlu0 %v474_v12, 304 }
  0x7a   :  { %512 = vbcast.lane.b32.xlu1 %v474_v12, 328  ;;  %508 = vbcast.lane.b32.xlu0 %v474_v12, 320 }
  0x7c   :  { %v3460_v13 = vpop.permute.xlu1 %282  ;;  %v3462_v14 = vpop.permute.xlu0 %274 }
  0x7e   :  { %520 = vbcast.lane.b32.xlu1 %v474_v12, 344  ;;  %516 = vbcast.lane.b32.xlu0 %v474_v12, 336 }
  0x80   :  { %v3464_v15 = vpop.permute.xlu1 %286  ;;  %v3466_v16 = vpop.permute.xlu0 %278 }
  0x82   :  { %528 = vbcast.lane.b32.xlu1 %v474_v12, 360  ;;  %524 = vbcast.lane.b32.xlu0 %v474_v12, 352 }
  0x84   :  { %v3471_v18 = vpop.permute.xlu1 %294  ;;  %v3473_v19 = vpop.permute.xlu0 %290 }
  0x86   :  { %536 = vbcast.lane.b32.xlu1 %v474_v12, 376  ;;  %532 = vbcast.lane.b32.xlu0 %v474_v12, 368 }
  0x88   :  { %v3477_v21 = vpop.permute.xlu1 %302  ;;  %v3479_v22 = vpop.permute.xlu0 %298 }
  0x8a   :  { %547 = vbcast.lane.b32.xlu1 %v541_v20, 264  ;;  %543 = vbcast.lane.b32.xlu0 %v541_v20, 256 }
  0x8c   :  { %v3481_v23 = vpop.permute.xlu1 %310  ;;  %v3483_v24 = vpop.permute.xlu0 %306 }
  0x8e   :  { %555 = vbcast.lane.b32.xlu1 %v541_v20, 280  ;;  %551 = vbcast.lane.b32.xlu0 %v541_v20, 272 }
  0x90   :  { %v3485_v25 = vpop.permute.xlu1 %318  ;;  %v3487_v26 = vpop.permute.xlu0 %314 }
  0x92   :  { %563 = vbcast.lane.b32.xlu1 %v541_v20, 296  ;;  %559 = vbcast.lane.b32.xlu0 %v541_v20, 288 }
  0x94   :  { %v3489_v27 = vpop.permute.xlu1 %326  ;;  %v3491_v28 = vpop.permute.xlu0 %322 }
  0x96   :  { %571 = vbcast.lane.b32.xlu1 %v541_v20, 312  ;;  %567 = vbcast.lane.b32.xlu0 %v541_v20, 304 }
  0x98   :  { %v3493_v29 = vpop.permute.xlu1 %334  ;;  %v3495_v30 = vpop.permute.xlu0 %330 }
  0x9a   :  { %579 = vbcast.lane.b32.xlu1 %v541_v20, 328  ;;  %575 = vbcast.lane.b32.xlu0 %v541_v20, 320 }
  0x9c   :  { %v3497_v31 = vpop.permute.xlu1 %345  ;;  %v3499_v32 = vpop.permute.xlu0 %341 }
  0x9e   :  { %587 = vbcast.lane.b32.xlu1 %v541_v20, 344  ;;  %583 = vbcast.lane.b32.xlu0 %v541_v20, 336 }
  0xa0   :  { %v3501_v33 = vpop.permute.xlu1 %353  ;;  %v3503_v34 = vpop.permute.xlu0 %349 }
  0xa2   :  { %595 = vbcast.lane.b32.xlu1 %v541_v20, 360  ;;  %591 = vbcast.lane.b32.xlu0 %v541_v20, 352 }
  0xa4   :  { %v3508_v36 = vpop.permute.xlu1 %361  ;;  %v3510_v37 = vpop.permute.xlu0 %357 }
  0xa6   :  { %603 = vbcast.lane.b32.xlu1 %v541_v20, 376  ;;  %599 = vbcast.lane.b32.xlu0 %v541_v20, 368  ;;  %v742_v20 = vrot.slane %v3454_v10, %v3506_v35 }
  0xa8   :  { %v3514_v39 = vpop.permute.xlu1 %369  ;;  %v3516_v40 = vpop.permute.xlu0 %365 }
  0xaa   :  { %614 = vbcast.lane.b32.xlu1 %v608_v38, 264  ;;  %610 = vbcast.lane.b32.xlu0 %v608_v38, 256 }
  0xac   :  { %v3518_v41 = vpop.permute.xlu1 %377  ;;  %v3520_v42 = vpop.permute.xlu0 %373 }
  0xae   :  { %622 = vbcast.lane.b32.xlu1 %v608_v38, 280  ;;  %618 = vbcast.lane.b32.xlu0 %v608_v38, 272 }
  0xb0   :  { %v3522_v43 = vpop.permute.xlu1 %385  ;;  %v3524_v44 = vpop.permute.xlu0 %381 }
  0xb2   :  { %630 = vbcast.lane.b32.xlu1 %v608_v38, 296  ;;  %626 = vbcast.lane.b32.xlu0 %v608_v38, 288 }
  0xb4   :  { %v3526_v45 = vpop.permute.xlu1 %393  ;;  %v3528_v46 = vpop.permute.xlu0 %389 }
  0xb5   :  { %7289 = vst [vmem:[#allocation9_spill] sm:$0xff] %v3526_v45 }
  0xb6   :  { %638 = vbcast.lane.b32.xlu1 %v608_v38, 312  ;;  %634 = vbcast.lane.b32.xlu0 %v608_v38, 304 }
  0xb8   :  { %v3530_v47 = vpop.permute.xlu1 %401  ;;  %v3532_v48 = vpop.permute.xlu0 %397 }
  0xba   :  { %646 = vbcast.lane.b32.xlu1 %v608_v38, 328  ;;  %642 = vbcast.lane.b32.xlu0 %v608_v38, 320 }
  0xbc   :  { %v3534_v49 = vpop.permute.xlu1 %413  ;;  %v3536_v50 = vpop.permute.xlu0 %409 }
  0xbe   :  { %654 = vbcast.lane.b32.xlu1 %v608_v38, 344  ;;  %650 = vbcast.lane.b32.xlu0 %v608_v38, 336 }
  0xc0   :  { %v3538_v51 = vpop.permute.xlu1 %421  ;;  %v3540_v52 = vpop.permute.xlu0 %417 }
  0xc2   :  { %662 = vbcast.lane.b32.xlu1 %v608_v38, 360  ;;  %658 = vbcast.lane.b32.xlu0 %v608_v38, 352 }
  0xc4   :  { %v3542_v53 = vpop.permute.xlu1 %429  ;;  %v3544_v54 = vpop.permute.xlu0 %425 }
  0xc6   :  { %670 = vbcast.lane.b32.xlu1 %v608_v38, 376  ;;  %666 = vbcast.lane.b32.xlu0 %v608_v38, 368 }
  0xc8   :  { %v3548_v56 = vpop.permute.xlu1 %437  ;;  %v3550_v57 = vpop.permute.xlu0 %433 }
  0xca   :  { %681 = vbcast.lane.b32.xlu1 %v675_v55, 264  ;;  %677 = vbcast.lane.b32.xlu0 %v675_v55, 256 }
  0xcc   :  { %v3552_v58 = vpop.permute.xlu1 %445  ;;  %v3554_v59 = vpop.permute.xlu0 %441 }
  0xce   :  { %689 = vbcast.lane.b32.xlu1 %v675_v55, 280  ;;  %685 = vbcast.lane.b32.xlu0 %v675_v55, 272 }
  0xd0   :  { %v3556_v60 = vpop.permute.xlu1 %453  ;;  %v3558_v61 = vpop.permute.xlu0 %449 }
  0xd2   :  { %697 = vbcast.lane.b32.xlu1 %v675_v55, 296  ;;  %693 = vbcast.lane.b32.xlu0 %v675_v55, 288 }
  0xd4   :  { %v3560_v62 = vpop.permute.xlu1 %461  ;;  %v3562_v63 = vpop.permute.xlu0 %457 }
  0xd6   :  { %705 = vbcast.lane.b32.xlu1 %v675_v55, 312  ;;  %701 = vbcast.lane.b32.xlu0 %v675_v55, 304 }
  0xd8   :  { %v3564_v1 = vpop.permute.xlu1 %469  ;;  %v3566_v2 = vpop.permute.xlu0 %465 }
  0xd9   :  { %7290 = vst [vmem:[#allocation10_spill] sm:$0xff] %v3564_v1  ;;  %7291 = vst [vmem:[#allocation11_spill] sm:$0xff] %v3566_v2 }
  0xda   :  { %713 = vbcast.lane.b32.xlu1 %v675_v55, 328  ;;  %709 = vbcast.lane.b32.xlu0 %v675_v55, 320 }
  0xdc   :  { %v3568_v4 = vpop.permute.xlu1 %480  ;;  %v3570_v6 = vpop.permute.xlu0 %476 }
  0xdd   :  { %7292 = vst [vmem:[#allocation12_spill] sm:$0xff] %v3568_v4  ;;  %7293 = vst [vmem:[#allocation13_spill] sm:$0xff] %v3570_v6 }
  0xde   :  { %721 = vbcast.lane.b32.xlu1 %v675_v55, 344  ;;  %717 = vbcast.lane.b32.xlu0 %v675_v55, 336 }
  0xe0   :  { %v3572_v7 = vpop.permute.xlu1 %488  ;;  %v3574_v9 = vpop.permute.xlu0 %484 }
  0xe1   :  { %7294 = vst [vmem:[#allocation14_spill] sm:$0xff] %v3572_v7  ;;  %7295 = vst [vmem:[#allocation15_spill] sm:$0xff] %v3574_v9 }
  0xe2   :  { %729 = vbcast.lane.b32.xlu1 %v675_v55, 360  ;;  %725 = vbcast.lane.b32.xlu0 %v675_v55, 352 }
  0xe4   :  { %v3576_v11 = vpop.permute.xlu1 %496  ;;  %v3578_v12 = vpop.permute.xlu0 %492 }
  0xe5   :  { %7296 = vst [vmem:[#allocation16_spill] sm:$0xff] %v3576_v11  ;;  %7297 = vst [vmem:[#allocation17_spill] sm:$0xff] %v3578_v12 }
  0xe6   :  { %737 = vbcast.lane.b32.xlu1 %v675_v55, 376  ;;  %733 = vbcast.lane.b32.xlu0 %v675_v55, 368 }
  0xe8   :  { %v3582_v38 = vpop.permute.xlu1 %504  ;;  %v3584_v17 = vpop.permute.xlu0 %500 }
  0xe9   :  { %7298 = vst [vmem:[#allocation18_spill] sm:$0xff] %v3582_v38  ;;  %7299 = vst [vmem:[#allocation19_spill] sm:$0xff] %v3584_v17 }
  0xea   :  { %748 = vbcast.lane.b32.xlu1 %v742_v20, 264  ;;  %744 = vbcast.lane.b32.xlu0 %v742_v20, 256 }
  0xec   :  { %v3586_v7 = vpop.permute.xlu1 %512  ;;  %v3588_v9 = vpop.permute.xlu0 %508 }
  0xed   :  { %7300 = vst [vmem:[#allocation20_spill] sm:$0xff] %v3586_v7  ;;  %7301 = vst [vmem:[#allocation21_spill] sm:$0xff] %v3588_v9 }
  0xee   :  { %756 = vbcast.lane.b32.xlu1 %v742_v20, 280  ;;  %752 = vbcast.lane.b32.xlu0 %v742_v20, 272 }
  0xf0   :  { %v3590_v11 = vpop.permute.xlu1 %520  ;;  %v3592_v12 = vpop.permute.xlu0 %516 }
  0xf1   :  { %7302 = vst [vmem:[#allocation22_spill] sm:$0xff] %v3590_v11  ;;  %7303 = vst [vmem:[#allocation23_spill] sm:$0xff] %v3592_v12  ;;  %v1191_v12 = vrot.slane %v3435_v0, 2 }
  0xf2   :  { %764 = vbcast.lane.b32.xlu1 %v742_v20, 296  ;;  %760 = vbcast.lane.b32.xlu0 %v742_v20, 288 }
  0xf4   :  { %v3594_v10 = vpop.permute.xlu1 %528  ;;  %v3596_v55 = vpop.permute.xlu0 %524 }
  0xf5   :  { %7304 = vst [vmem:[#allocation24_spill] sm:$0xff] %v3594_v10  ;;  %7305 = vst [vmem:[#allocation25_spill] sm:$0xff] %v3596_v55  ;;  %v1193_v55 = vmul.f32 %v1191_v12, %v3435_v0 }
  0xf6   :  { %772 = vbcast.lane.b32.xlu1 %v742_v20, 312  ;;  %768 = vbcast.lane.b32.xlu0 %v742_v20, 304 }
  0xf8   :  { %v3598_v35 = vpop.permute.xlu1 %536  ;;  %v3600_v17 = vpop.permute.xlu0 %532 }
  0xf9   :  { %7306 = vst [vmem:[#allocation26_spill] sm:$0xff] %v3598_v35  ;;  %7307 = vst [vmem:[#allocation27_spill] sm:$0xff] %v3600_v17  ;;  %v7118_v35 = vsub.s32 4, %v3438_v3 }
  0xfa   :  { %780 = vbcast.lane.b32.xlu1 %v742_v20, 328  ;;  %776 = vbcast.lane.b32.xlu0 %v742_v20, 320 }
  0xfc   :  { %v3602_v9 = vpop.permute.xlu1 %547  ;;  %v3604_v7 = vpop.permute.xlu0 %543 }
  0xfd   :  { %7308 = vst [vmem:[#allocation28_spill] sm:$0xff] %v3602_v9  ;;  %7309 = vst [vmem:[#allocation29_spill] sm:$0xff] %v3604_v7  ;;  %v1197_v7 = vrot.slane %v1193_v55, %v7118_v35 }
  0xfe   :  { %788 = vbcast.lane.b32.xlu1 %v742_v20, 344  ;;  %784 = vbcast.lane.b32.xlu0 %v742_v20, 336 }
 0x100   :  { %v3607_v11 = vpop.permute.xlu1 %555  ;;  %v3609_v10 = vpop.permute.xlu0 %551 }
 0x101   :  { %7310 = vst [vmem:[#allocation30_spill] sm:$0xff] %v3607_v11  ;;  %7311 = vst [vmem:[#allocation31_spill] sm:$0xff] %v3609_v10 }
 0x102   :  { %796 = vbcast.lane.b32.xlu1 %v742_v20, 360  ;;  %792 = vbcast.lane.b32.xlu0 %v742_v20, 352 }
 0x104   :  { %v3613_v17 = vpop.permute.xlu1 %563  ;;  %v3615_v38 = vpop.permute.xlu0 %559 }
 0x105   :  { %7312 = vst [vmem:[#allocation32_spill] sm:$0xff] %v3613_v17  ;;  %7313 = vst [vmem:[#allocation33_spill] sm:$0xff] %v3615_v38 }
 0x106   :  { %804 = vbcast.lane.b32.xlu1 %v742_v20, 376  ;;  %800 = vbcast.lane.b32.xlu0 %v742_v20, 368 }
 0x108   :  { %v3619_v9 = vpop.permute.xlu1 %571  ;;  %v3621_v11 = vpop.permute.xlu0 %567 }
 0x109   :  { %7314 = vst [vmem:[#allocation34_spill] sm:$0xff] %v3619_v9  ;;  %7315 = vst [vmem:[#allocation35_spill] sm:$0xff] %v3621_v11 }
 0x10a   :  { %1203 = vbcast.lane.b32.xlu1 %v1197_v7, 264  ;;  %1199 = vbcast.lane.b32.xlu0 %v1197_v7, 256 }
 0x10c   :  { %v3623_v10 = vpop.permute.xlu1 %579  ;;  %v3625_v12 = vpop.permute.xlu0 %575 }
 0x10d   :  { %7316 = vst [vmem:[#allocation36_spill] sm:$0xff] %v3623_v10  ;;  %7317 = vst [vmem:[#allocation37_spill] sm:$0xff] %v3625_v12 }
 0x10e   :  { %1211 = vbcast.lane.b32.xlu1 %v1197_v7, 280  ;;  %1207 = vbcast.lane.b32.xlu0 %v1197_v7, 272 }
 0x110   :  { %v3627_v17 = vpop.permute.xlu1 %587  ;;  %v3629_v38 = vpop.permute.xlu0 %583 }
 0x111   :  { %7318 = vst [vmem:[#allocation38_spill] sm:$0xff] %v3627_v17  ;;  %7319 = vst [vmem:[#allocation39_spill] sm:$0xff] %v3629_v38 }
 0x112   :  { %1219 = vbcast.lane.b32.xlu1 %v1197_v7, 296  ;;  %1215 = vbcast.lane.b32.xlu0 %v1197_v7, 288 }
 0x114   :  { %v3631_v35 = vpop.permute.xlu1 %595  ;;  %v3633_v20 = vpop.permute.xlu0 %591 }
 0x115   :  { %7320 = vst [vmem:[#allocation40_spill] sm:$0xff] %v3631_v35  ;;  %7321 = vst [vmem:[#allocation41_spill] sm:$0xff] %v3633_v20  ;;  %v7135_v20 = vsub.s32 5, %v3438_v3 }
 0x116   :  { %1227 = vbcast.lane.b32.xlu1 %v1197_v7, 312  ;;  %1223 = vbcast.lane.b32.xlu0 %v1197_v7, 304 }
 0x118   :  { %v3635_v11 = vpop.permute.xlu1 %603  ;;  %v3637_v9 = vpop.permute.xlu0 %599 }
 0x119   :  { %7322 = vst [vmem:[#allocation42_spill] sm:$0xff] %v3635_v11  ;;  %7323 = vst [vmem:[#allocation43_spill] sm:$0xff] %v3637_v9 }
 0x11a   :  { %1235 = vbcast.lane.b32.xlu1 %v1197_v7, 328  ;;  %1231 = vbcast.lane.b32.xlu0 %v1197_v7, 320 }
 0x11c   :  { %v3639_v12 = vpop.permute.xlu1 %614  ;;  %v3641_v10 = vpop.permute.xlu0 %610 }
 0x11d   :  { %7324 = vst [vmem:[#allocation44_spill] sm:$0xff] %v3639_v12  ;;  %7325 = vst [vmem:[#allocation45_spill] sm:$0xff] %v3641_v10  ;;  %v1264_v12 = vrot.slane %v1193_v55, %v7135_v20 }
 0x11e   :  { %1243 = vbcast.lane.b32.xlu1 %v1197_v7, 344  ;;  %1239 = vbcast.lane.b32.xlu0 %v1197_v7, 336 }
 0x120   :  { %v3643_v38 = vpop.permute.xlu1 %622  ;;  %v3645_v17 = vpop.permute.xlu0 %618 }
 0x121   :  { %7326 = vst [vmem:[#allocation46_spill] sm:$0xff] %v3643_v38  ;;  %7327 = vst [vmem:[#allocation47_spill] sm:$0xff] %v3645_v17 }
 0x122   :  { %1251 = vbcast.lane.b32.xlu1 %v1197_v7, 360  ;;  %1247 = vbcast.lane.b32.xlu0 %v1197_v7, 352 }
 0x124   :  { %v3648_v35 = vpop.permute.xlu1 %630  ;;  %v3650_v11 = vpop.permute.xlu0 %626 }
 0x125   :  { %7328 = vst [vmem:[#allocation48_spill] sm:$0xff] %v3648_v35  ;;  %7329 = vst [vmem:[#allocation49_spill] sm:$0xff] %v3650_v11 }
 0x126   :  { %1259 = vbcast.lane.b32.xlu1 %v1197_v7, 376  ;;  %1255 = vbcast.lane.b32.xlu0 %v1197_v7, 368  ;;  %v3671_v7 = vld [vmem:[%s7094_s3] sm:$0xff] }
 0x127   :  { %7337 = vst [vmem:[#allocation57_spill] sm:$0xff] %v3671_v7 }
 0x128   :  { %v3654_v10 = vpop.permute.xlu1 %638  ;;  %v3656_v9 = vpop.permute.xlu0 %634 }
 0x129   :  { %7330 = vst [vmem:[#allocation50_spill] sm:$0xff] %v3654_v10  ;;  %7331 = vst [vmem:[#allocation51_spill] sm:$0xff] %v3656_v9 }
 0x12a   :  { %1270 = vbcast.lane.b32.xlu1 %v1264_v12, 264  ;;  %1266 = vbcast.lane.b32.xlu0 %v1264_v12, 256 }
 0x12c   :  { %v3658_v17 = vpop.permute.xlu1 %646  ;;  %v3660_v38 = vpop.permute.xlu0 %642 }
 0x12d   :  { %7332 = vst [vmem:[#allocation52_spill] sm:$0xff] %v3658_v17  ;;  %7333 = vst [vmem:[#allocation53_spill] sm:$0xff] %v3660_v38  ;;  %v806_v38 = vmul.f32 0.5, %v3671_v7  ;;  %v3403_v17 = vmov 1966171168  }
 0x12e   :  { %1278 = vbcast.lane.b32.xlu1 %v1264_v12, 280  ;;  %1274 = vbcast.lane.b32.xlu0 %v1264_v12, 272  ;;  %v813_v9 = vunpack.c.l.s4 %v3403_v17 }
 0x130   :  { %v3662_v35 = vpop.permute.xlu1 %654  ;;  %v3664_v11 = vpop.permute.xlu0 %650  ;;  %v814_v10 = vunpack.c.0.s8 %v813_v9 }
 0x131   :  { %7334 = vst [vmem:[#allocation54_spill] sm:$0xff] %v3662_v35  ;;  %7335 = vst [vmem:[#allocation55_spill] sm:$0xff] %v3664_v11 }
 0x132   :  { %1286 = vbcast.lane.b32.xlu1 %v1264_v12, 296  ;;  %1282 = vbcast.lane.b32.xlu0 %v1264_v12, 288  ;;  %v3686_v2 = vsub.s32 %v814_v10, %v3438_v3  ;;  %v3701_v10 = vrot.slane %v3435_v0, %v3441_v5 }
 0x134   :  { %v3666_v55 = vpop.permute.xlu1 %662  ;;  %v3673_v20 = vpop.permute.xlu0 %658  ;;  %7343 = vst [vmem:[#allocation63_spill] sm:$0xff] %v3686_v2 }
 0x135   :  { %7336 = vst [vmem:[#allocation56_spill] sm:$0xff] %v3666_v55  ;;  %7338 = vst [vmem:[#allocation58_spill] sm:$0xff] %v3673_v20  ;;  %v808_v55 = vrot.slane %v806_v38, 4 }
 0x136   :  { %1294 = vbcast.lane.b32.xlu1 %v1264_v12, 312  ;;  %1290 = vbcast.lane.b32.xlu0 %v1264_v12, 304 }
 0x137   :  { %v810_v20 = vsub.f32 %v3671_v7, %v808_v55 }
 0x138   :  { %v3676_v35 = vpop.permute.xlu1 %670  ;;  %v3678_v11 = vpop.permute.xlu0 %666 }
 0x139   :  { %7339 = vst [vmem:[#allocation59_spill] sm:$0xff] %v3676_v35  ;;  %7340 = vst [vmem:[#allocation60_spill] sm:$0xff] %v3678_v11  ;;  %v834_v35 = vadd.f32 %v808_v55, %v3671_v7  ;;  %v818_v9 = vrot.slane %v810_v20, %v3686_v2 }
 0x13a   :  { %1302 = vbcast.lane.b32.xlu1 %v1264_v12, 328  ;;  %1298 = vbcast.lane.b32.xlu0 %v1264_v12, 320 }
 0x13b   :  { %v819_v3 = vcombine.high %v818_v9, %v818_v9  ;;  %v826_v55 = vrot.slane %v818_v9, %v3686_v2 }
 0x13c   :  { %v3680_v6 = vpop.permute.xlu1 %681  ;;  %v3682_v4 = vpop.permute.xlu0 %677 }
 0x13d   :  { %7341 = vst [vmem:[#allocation61_spill] sm:$0xff] %v3680_v6  ;;  %7342 = vst [vmem:[#allocation62_spill] sm:$0xff] %v3682_v4  ;;  %v842_v4 = vrot.slane %v834_v35, %v3686_v2  ;;  %v833_v35 = vrot.slane %v819_v3, %v3686_v2 }
 0x13e   :  { %1310 = vbcast.lane.b32.xlu1 %v1264_v12, 344  ;;  %1306 = vbcast.lane.b32.xlu0 %v1264_v12, 336 }
 0x13f   :  { %v3711_v20 = vrot.slane %v842_v4, %v3686_v2  ;;  %v3726_v3 = vrot.slane %v833_v35, %v3441_v5 }
 0x140   :  { %v3688_v17 = vpop.permute.xlu1 %689  ;;  %v3691_v11 = vpop.permute.xlu0 %685 }
 0x141   :  { %7344 = vst [vmem:[#allocation64_spill] sm:$0xff] %v3688_v17  ;;  %7345 = vst [vmem:[#allocation65_spill] sm:$0xff] %v3691_v11  ;;  %v843_v17 = vcombine.high %v842_v4, %v842_v4  ;;  %v3730_v4 = vrot.slane %v3711_v20, %v3441_v5 }
 0x142   :  { %1318 = vbcast.lane.b32.xlu1 %v1264_v12, 360  ;;  %1314 = vbcast.lane.b32.xlu0 %v1264_v12, 352 }
 0x144   :  { %v3694_v38 = vpop.permute.xlu1 %697  ;;  %v3697_v6 = vpop.permute.xlu0 %693 }
 0x145   :  { %7346 = vst [vmem:[#allocation66_spill] sm:$0xff] %v3694_v38  ;;  %7347 = vst [vmem:[#allocation67_spill] sm:$0xff] %v3697_v6  ;;  %v3714_v6 = vrot.slane %v843_v17, %v3686_v2  ;;  %v858_v38 = vcombine.high %v826_v55, %v826_v55  ;;  %v860_v2 = vcombine.high %v3711_v20, %v3711_v20 }
 0x146   :  { %1326 = vbcast.lane.b32.xlu1 %v1264_v12, 376  ;;  %1322 = vbcast.lane.b32.xlu0 %v1264_v12, 368  ;;  %v3718_v12 = vrot.slane %v826_v55, %v3441_v5 }
 0x147   :  { %7350 = vst [vmem:[#allocation70_spill] sm:$0xff] %v3714_v6  ;;  %v3734_v17 = vrot.slane %v3714_v6, %v3441_v5  ;;  %v3737_v55 = vrot.slane %v858_v38, %v3441_v5 }
 0x148   :  { %v3704_v11 = vpop.permute.xlu1 %705  ;;  %v3706_v7 = vpop.permute.xlu0 %701 }
 0x149   :  { %7348 = vst [vmem:[#allocation68_spill] sm:$0xff] %v3704_v11  ;;  %7349 = vst [vmem:[#allocation69_spill] sm:$0xff] %v3706_v7  ;;  %v1526_v7 = vmax.f32 %v3536_v50, %v3730_v4 }
 0x14a   :  { %1855 = vbcast.lane.b32.xlu1 %v3701_v10, 264  ;;  %1851 = vbcast.lane.b32.xlu0 %v3701_v10, 256  ;;  %7353 = vst [vmem:[#allocation73_spill] sm:$0xff] %v3734_v17  ;;  %7354 = vst [vmem:[#allocation74_spill] sm:$0xff] %v3737_v55 }
 0x14c   :  { %v3720_v9 = vpop.permute.xlu1 %713  ;;  %v3722_v11 = vpop.permute.xlu0 %709 }
 0x14d   :  { %7351 = vst [vmem:[#allocation71_spill] sm:$0xff] %v3720_v9  ;;  %7352 = vst [vmem:[#allocation72_spill] sm:$0xff] %v3722_v11  ;;  %v873_v9 = vmin.f32 %v3534_v49, %v3730_v4  ;;  %v3934_v11 = vrot.slane %v860_v2, %v3441_v5  ;;  %v7373_v2 = vmax.f32 %v3464_v15, %v3718_v12 }
 0x14e   :  { %1863 = vbcast.lane.b32.xlu1 %v3701_v10, 280  ;;  %1859 = vbcast.lane.b32.xlu0 %v3701_v10, 272 }
 0x150   :  { %v3748_v1 = vpop.permute.xlu1 %721  ;;  %v3758_v6 = vpop.permute.xlu0 %717 }
 0x151   :  { %7355 = vst [vmem:[#allocation75_spill] sm:$0xff] %v3748_v1  ;;  %7356 = vst [vmem:[#allocation76_spill] sm:$0xff] %v3758_v6  ;;  %v859_v6 = vcombine.high %v833_v35, %v833_v35  ;;  %v1527_v35 = vmax.f32 %v3534_v49, %v3730_v4  ;;  %v7364_v49 = vmax.f32 %v3466_v16, %v3718_v12 }
 0x152   :  { %1871 = vbcast.lane.b32.xlu1 %v3701_v10, 296  ;;  %1867 = vbcast.lane.b32.xlu0 %v3701_v10, 288 }
 0x153   :  { %v3821_v55 = vrot.slane %v859_v6, %v3441_v5  ;;  %v7367_v6 = vmin.f32 %v3466_v16, %v3718_v12  ;;  %v1529_v16 = vmax.f32 %v3538_v51, %v3730_v4 }
 0x154   :  { %v3784_v1 = vpop.permute.xlu1 %729  ;;  %v3794_v17 = vpop.permute.xlu0 %725 }
 0x155   :  { %7357 = vst [vmem:[#allocation77_spill] sm:$0xff] %v3784_v1  ;;  %7358 = vst [vmem:[#allocation78_spill] sm:$0xff] %v3794_v17 }
 0x156   :  { %1879 = vbcast.lane.b32.xlu1 %v3701_v10, 312  ;;  %1875 = vbcast.lane.b32.xlu0 %v3701_v10, 304  ;;  %7359 = vst [vmem:[#allocation79_spill] sm:$0xff] %v3821_v55  ;;  %v1591_v55 = vsub.f32 %v1527_v35, %v7367_v6  ;;  %v7370_v6 = vmin.f32 %v3462_v14, %v3718_v12 }
 0x158   :  { %v3823_v38 = vpop.permute.xlu1 %737  ;;  %v3833_v17 = vpop.permute.xlu0 %733  ;;  %v1590_v20 = vsub.f32 %v1526_v7, %v7370_v6  ;;  %v3947_v6 = vmul.f32 %v1591_v55, %v1591_v55 }
 0x159   :  { %7360 = vst [vmem:[#allocation80_spill] sm:$0xff] %v3823_v38  ;;  %7361 = vst [vmem:[#allocation81_spill] sm:$0xff] %v3833_v17  ;;  %v872_v38 = vmin.f32 %v3536_v50, %v3730_v4  ;;  %v7369_v50 = vmax.f32 %v3462_v14, %v3718_v12  ;;  %v876_v14 = vmin.f32 %v3544_v54, %v3730_v4 }
 0x15a   :  { %1887 = vbcast.lane.b32.xlu1 %v3701_v10, 328  ;;  %1883 = vbcast.lane.b32.xlu0 %v3701_v10, 320  ;;  %7372 = vst [vmem:[#allocation88_spill] sm:$0xff] %v3947_v6  ;;  %v1533_v6 = vmax.f32 %v3548_v56, %v3730_v4 }
 0x15c   :  { %v3861_v17 = vpop.permute.xlu1 %748  ;;  %v3871_v1 = vpop.permute.xlu0 %744 }
 0x15d   :  { %7362 = vst [vmem:[#allocation82_spill] sm:$0xff] %v3861_v17  ;;  %7363 = vst [vmem:[#allocation83_spill] sm:$0xff] %v3871_v1  ;;  %v3887_v1 = vsub.f32 %v873_v9, %v7364_v49  ;;  %v875_v17 = vmin.f32 %v3538_v51, %v3730_v4  ;;  %v874_v9 = vmin.f32 %v3540_v52, %v3730_v4 }
 0x15e   :  { %1895 = vbcast.lane.b32.xlu1 %v3701_v10, 344  ;;  %1891 = vbcast.lane.b32.xlu0 %v3701_v10, 336  ;;  %v877_v51 = vmin.f32 %v3542_v53, %v3730_v4 }
 0x15f   :  { %7365 = vst [vmem:[#allocation84_spill] sm:$0xff] %v3887_v1  ;;  %v3952_v35 = vsub.f32 %v875_v17, %v7373_v2  ;;  %v3969_v17 = vrot.slane %v3435_v0, %v3449_v8  ;;  %v7377_v2 = vmax.f32 %v3460_v13, %v3718_v12  ;;  %v7380_v8 = vmax.f32 %v3471_v18, %v3718_v12 }
 0x160   :  { %v3902_v49 = vpop.permute.xlu1 %756  ;;  %v3913_v45 = vpop.permute.xlu0 %752 }
 0x161   :  { %7366 = vst [vmem:[#allocation85_spill] sm:$0xff] %v3902_v49  ;;  %7368 = vst [vmem:[#allocation86_spill] sm:$0xff] %v3913_v45  ;;  %v3922_v49 = vsub.f32 %v872_v38, %v7369_v50  ;;  %v1528_v38 = vmax.f32 %v3540_v52, %v3730_v4  ;;  %v1531_v50 = vmax.f32 %v3542_v53, %v3730_v4 }
 0x162   :  { %1903 = vbcast.lane.b32.xlu1 %v3701_v10, 360  ;;  %1899 = vbcast.lane.b32.xlu0 %v3701_v10, 352  ;;  %7374 = vst [vmem:[#allocation89_spill] sm:$0xff] %v3952_v35  ;;  %v1530_v52 = vmax.f32 %v3544_v54, %v3730_v4  ;;  %v879_v45 = vmin.f32 %v3548_v56, %v3730_v4 }
 0x163   :  { %v3971_v54 = vmul.f32 %v1590_v20, %v1590_v20  ;;  %v7379_v56 = vmin.f32 %v3460_v13, %v3718_v12  ;;  %v3989_v20 = vsub.f32 %v877_v51, %v7380_v8  ;;  %v7386_v13 = vmin.f32 %v3473_v19, %v3718_v12 }
 0x164   :  { %v3945_v7 = vpop.permute.xlu1 %764  ;;  %v3958_v1 = vpop.permute.xlu0 %760  ;;  %v7387_v51 = vmax.f32 %v3477_v21, %v3718_v12  ;;  %v7390_v8 = vmin.f32 %v3477_v21, %v3718_v12 }
 0x165   :  { %7371 = vst [vmem:[#allocation87_spill] sm:$0xff] %v3945_v7  ;;  %7375 = vst [vmem:[#allocation90_spill] sm:$0xff] %v3958_v1  ;;  %v7376_v7 = vmin.f32 %v3464_v15, %v3718_v12  ;;  %v3976_v1 = vsub.f32 %v874_v9, %v7377_v2  ;;  %v878_v15 = vmin.f32 %v3550_v57, %v3730_v4 }
 0x166   :  { %1911 = vbcast.lane.b32.xlu1 %v3701_v10, 376  ;;  %1907 = vbcast.lane.b32.xlu0 %v3701_v10, 368  ;;  %v1592_v0 = vsub.f32 %v1528_v38, %v7379_v56  ;;  %7381 = vst [vmem:[#allocation92_spill] sm:$0xff] %v3989_v20  ;;  %v7382_v9 = vmin.f32 %v3471_v18, %v3718_v12 }
 0x167   :  { %v1593_v55 = vsub.f32 %v1529_v16, %v7376_v7  ;;  %7378 = vst [vmem:[#allocation91_spill] sm:$0xff] %v3976_v1  ;;  %v1532_v16 = vmax.f32 %v3550_v57, %v3730_v4  ;;  %v7383_v2 = vmax.f32 %v3473_v19, %v3718_v12  ;;  %v1594_v38 = vsub.f32 %v1530_v52, %v7386_v13 }
 0x168   :  { %v1595_v7 = vsub.f32 %v1531_v50, %v7382_v9  ;;  %v3999_v57 = vpop.permute.xlu1 %772  ;;  %v4008_v56 = vsub.f32 %v879_v45, %v7387_v51  ;;  %v881_v18 = vmin.f32 %v3552_v58, %v3730_v4  ;;  %v4012_v50 = vpop.permute.xlu0 %768  ;;  %v1597_v9 = vsub.f32 %v1533_v6, %v7390_v8 }
 0x169   :  { %v3997_v53 = vsub.f32 %v876_v14, %v7383_v2  ;;  %7385 = vst [vmem:[#allocation94_spill] sm:$0xff] %v3999_v57  ;;  %7389 = vst [vmem:[#allocation96_spill] sm:$0xff] %v4012_v50  ;;  %v4014_v14 = vmul.f32 %v1593_v55, %v1593_v55  ;;  %v1535_v19 = vmax.f32 %v3552_v58, %v3730_v4 }
 0x16a   :  { %7388 = vst [vmem:[#allocation95_spill] sm:$0xff] %v4008_v56  ;;  %v880_v52 = vmin.f32 %v3554_v59, %v3730_v4  ;;  %1922 = vbcast.lane.b32.xlu1 %v3969_v17, 264  ;;  %v7391_v2 = vmax.f32 %v3479_v22, %v3718_v12  ;;  %v7393_v55 = vmin.f32 %v3479_v22, %v3718_v12 }
 0x16b   :  { %7384 = vst [vmem:[#allocation93_spill] sm:$0xff] %v3997_v53  ;;  %v1534_v6 = vmax.f32 %v3554_v59, %v3730_v4  ;;  %1918 = vbcast.lane.b32.xlu0 %v3969_v17, 256  ;;  %v4036_v58 = vmul.f32 %v1592_v0, %v1592_v0  ;;  %v4039_v8 = vmul.f32 %v1595_v7, %v1595_v7 }
 0x16c   :  { %v4028_v13 = vsub.f32 %v878_v15, %v7391_v2  ;;  %v1596_v21 = vsub.f32 %v1532_v16, %v7393_v55  ;;  %v4042_v10 = vpop.permute.xlu1 %780  ;;  %v4044_v15 = vmul.f32 %v1594_v38, %v1594_v38  ;;  %v7395_v16 = vmax.f32 %v3481_v23, %v3718_v12  ;;  %v4054_v2 = vpop.permute.xlu0 %776 }
 0x16d   :  { %7394 = vst [vmem:[#allocation98_spill] sm:$0xff] %v4042_v10  ;;  %v883_v0 = vmin.f32 %v3556_v60, %v3730_v4  ;;  %7397 = vst [vmem:[#allocation100_spill] sm:$0xff] %v4054_v2  ;;  %v4056_v7 = vmul.f32 %v1597_v9, %v1597_v9  ;;  %v7398_v55 = vmin.f32 %v3481_v23, %v3718_v12 }
 0x16e   :  { %7392 = vst [vmem:[#allocation97_spill] sm:$0xff] %v4028_v13  ;;  %v4050_v59 = vsub.f32 %v881_v18, %v7395_v16  ;;  %v7399_v38 = vmax.f32 %v3483_v24, %v3718_v12  ;;  %v1537_v18 = vmax.f32 %v3556_v60, %v3730_v4  ;;  %1930 = vbcast.lane.b32.xlu1 %v3969_v17, 280 }
 0x16f   :  { %v1599_v45 = vsub.f32 %v1535_v19, %v7398_v55  ;;  %v4070_v51 = vmul.f32 %v1596_v21, %v1596_v21  ;;  %v7401_v9 = vmin.f32 %v3483_v24, %v3718_v12  ;;  %v882_v23 = vmin.f32 %v3558_v61, %v3730_v4  ;;  %1926 = vbcast.lane.b32.xlu0 %v3969_v17, 272 }
 0x170   :  { %7396 = vst [vmem:[#allocation99_spill] sm:$0xff] %v4050_v59  ;;  %v4064_v22 = vsub.f32 %v880_v52, %v7399_v38  ;;  %v1536_v19 = vmax.f32 %v3558_v61, %v3730_v4  ;;  %v885_v60 = vmin.f32 %v3560_v62, %v3730_v4  ;;  %v1539_v52 = vmax.f32 %v3560_v62, %v3730_v4  ;;  %v4086_v55 = vpop.permute.xlu1 %788  ;;  %v4098_v13 = vpop.permute.xlu0 %784 }
 0x171   :  { %v1598_v56 = vsub.f32 %v1534_v6, %v7401_v9  ;;  %v884_v21 = vmin.f32 %v3562_v63, %v3730_v4  ;;  %7402 = vst [vmem:[#allocation102_spill] sm:$0xff] %v4086_v55  ;;  %v7403_v6 = vmax.f32 %v3485_v25, %v3718_v12  ;;  %v1538_v61 = vmax.f32 %v3562_v63, %v3730_v4  ;;  %v7405_v9 = vld [vmem:[#allocation10_spill] sm:$0xff] }
 0x172   :  { %7400 = vst [vmem:[#allocation101_spill] sm:$0xff] %v4064_v22  ;;  %v887_v16 = vmin.f32 %v7405_v9, %v3730_v4  ;;  %7406 = vst [vmem:[#allocation10_spill] sm:$0xff] %v4098_v13  ;;  %v4100_v62 = vmul.f32 %v1599_v45, %v1599_v45  ;;  %v7407_v24 = vmin.f32 %v3485_v25, %v3718_v12  ;;  %1938 = vbcast.lane.b32.xlu1 %v3969_v17, 296  ;;  %v7410_v45 = vld [vmem:[#allocation11_spill] sm:$0xff] }
 0x173   :  { %v4092_v38 = vsub.f32 %v883_v0, %v7403_v6  ;;  %v1541_v0 = vmax.f32 %v7405_v9, %v3730_v4  ;;  %v4109_v6 = vmul.f32 %v1598_v56, %v1598_v56  ;;  %v7408_v63 = vmax.f32 %v3487_v26, %v3718_v12  ;;  %1934 = vbcast.lane.b32.xlu0 %v3969_v17, 288 }
 0x174   :  { %v1601_v59 = vsub.f32 %v1537_v18, %v7407_v24  ;;  %v886_v1 = vmin.f32 %v7410_v45, %v3730_v4  ;;  %v1540_v53 = vmax.f32 %v7410_v45, %v3730_v4  ;;  %v7411_v25 = vmin.f32 %v3487_v26, %v3718_v12  ;;  %v4137_v4 = vpop.permute.xlu1 %796 }
 0x175   :  { %7404 = vst [vmem:[#allocation103_spill] sm:$0xff] %v4092_v38  ;;  %v4114_v20 = vsub.f32 %v882_v23, %v7408_v63  ;;  %v7412_v56 = vmax.f32 %v3489_v27, %v3718_v12  ;;  %v7414_v23 = vmin.f32 %v3489_v27, %v3718_v12  ;;  %v7415_v63 = vmax.f32 %v3491_v28, %v3718_v12  ;;  %v7421_v27 = vld [vmem:[#allocation73_spill] sm:$0xff] }
 0x176   :  { %v1600_v18 = vsub.f32 %v1536_v19, %v7411_v25  ;;  %7417 = vst [vmem:[#allocation106_spill] sm:$0xff] %v4137_v4  ;;  %v7418_v26 = vmin.f32 %v3491_v28, %v3718_v12  ;;  %1946 = vbcast.lane.b32.xlu1 %v3969_v17, 312  ;;  %v7491_v13 = vmax.f32 %v3522_v43, %v3726_v3 }
 0x177   :  { %7409 = vst [vmem:[#allocation104_spill] sm:$0xff] %v4114_v20  ;;  %v4127_v24 = vsub.f32 %v885_v60, %v7412_v56  ;;  %v1603_v9 = vsub.f32 %v1539_v52, %v7414_v23  ;;  %v4135_v22 = vsub.f32 %v884_v21, %v7415_v63  ;;  %v7419_v60 = vmax.f32 %v3493_v29, %v3718_v12  ;;  %v7422_v52 = vld [vmem:[#allocation12_spill] sm:$0xff]  ;;  %v4150_v23 = vpop.permute.xlu0 %792 }
 0x178   :  { %v1602_v19 = vsub.f32 %v1538_v61, %v7418_v26  ;;  %v889_v56 = vmin.f32 %v7422_v52, %v7421_v27  ;;  %7423 = vst [vmem:[#allocation73_spill] sm:$0xff] %v4150_v23  ;;  %v4152_v21 = vmul.f32 %v1601_v59, %v1601_v59  ;;  %v7424_v63 = vmin.f32 %v3493_v29, %v3718_v12  ;;  %v7425_v61 = vld [vmem:[#allocation13_spill] sm:$0xff]  ;;  %v4180_v20 = vpop.permute.xlu1 %804 }
 0x179   :  { %7413 = vst [vmem:[#allocation11_spill] sm:$0xff] %v4127_v24  ;;  %7416 = vst [vmem:[#allocation105_spill] sm:$0xff] %v4135_v22  ;;  %v4146_v25 = vsub.f32 %v887_v16, %v7419_v60  ;;  %v1543_v28 = vmax.f32 %v7422_v52, %v7421_v27  ;;  %v888_v26 = vmin.f32 %v7425_v61, %v7421_v27  ;;  %1942 = vbcast.lane.b32.xlu0 %v3969_v17, 304 }
 0x17a   :  { %v1605_v45 = vsub.f32 %v1541_v0, %v7424_v63  ;;  %v7426_v60 = vmax.f32 %v3495_v30, %v3718_v12  ;;  %v7428_v59 = vmin.f32 %v3495_v30, %v3718_v12  ;;  %v1542_v0 = vmax.f32 %v7425_v61, %v7421_v27  ;;  %7429 = vst [vmem:[#allocation13_spill] sm:$0xff] %v4180_v20  ;;  %v7447_v20 = vld [vmem:[#allocation18_spill] sm:$0xff] }
 0x17b   :  { %7420 = vst [vmem:[#allocation107_spill] sm:$0xff] %v4146_v25  ;;  %v4174_v52 = vmul.f32 %v1600_v18, %v1600_v18  ;;  %v4177_v35 = vmul.f32 %v1603_v9, %v1603_v9  ;;  %v7430_v12 = vmax.f32 %v3497_v31, %v3726_v3  ;;  %v7432_v18 = vld [vmem:[#allocation14_spill] sm:$0xff]  ;;  %1954 = vbcast.lane.b32.xlu1 %v3969_v17, 328 }
 0x17c   :  { %v4166_v38 = vsub.f32 %v886_v1, %v7426_v60  ;;  %v1604_v29 = vsub.f32 %v1540_v53, %v7428_v59  ;;  %v4182_v1 = vmul.f32 %v1602_v19, %v1602_v19  ;;  %v891_v61 = vmin.f32 %v7432_v18, %v7421_v27  ;;  %v4192_v60 = vpop.permute.xlu0 %800 }
 0x17d   :  { %v4188_v53 = vsub.f32 %v889_v56, %v7430_v12  ;;  %7433 = vst [vmem:[#allocation14_spill] sm:$0xff] %v4192_v60  ;;  %v4194_v9 = vmul.f32 %v1605_v45, %v1605_v45  ;;  %v7434_v59 = vmin.f32 %v3497_v31, %v3726_v3  ;;  %v7435_v19 = vmax.f32 %v3499_v32, %v3726_v3  ;;  %v7438_v31 = vld [vmem:[#allocation15_spill] sm:$0xff] }
 0x17e   :  { %7427 = vst [vmem:[#allocation12_spill] sm:$0xff] %v4166_v38  ;;  %v1545_v56 = vmax.f32 %v7432_v18, %v7421_v27  ;;  %v4208_v63 = vmul.f32 %v1604_v29, %v1604_v29  ;;  %v7437_v45 = vmin.f32 %v3499_v32, %v3726_v3  ;;  %1950 = vbcast.lane.b32.xlu0 %v3969_v17, 320  ;;  %v7439_v18 = vld [vmem:[#allocation16_spill] sm:$0xff]  ;;  %v7440_v29 = vld [vmem:[#allocation70_spill] sm:$0xff]  ;;  %v4224_v38 = vpop.permute.xlu1 %1203 }
 0x17f   :  { %7431 = vst [vmem:[#allocation108_spill] sm:$0xff] %v4188_v53  ;;  %v1607_v16 = vsub.f32 %v1543_v28, %v7434_v59  ;;  %v4202_v30 = vsub.f32 %v888_v26, %v7435_v19  ;;  %v890_v28 = vmin.f32 %v7438_v31, %v7421_v27  ;;  %v1544_v26 = vmax.f32 %v7438_v31, %v7421_v27  ;;  %v7444_v31 = vld [vmem:[#allocation17_spill] sm:$0xff] }
 0x180   :  { %v1606_v25 = vsub.f32 %v1542_v0, %v7437_v45  ;;  %v893_v59 = vmin.f32 %v7439_v18, %v7421_v27  ;;  %v1547_v19 = vmax.f32 %v7439_v18, %v7421_v27  ;;  %v861_v12 = vcombine.high %v7440_v29, %v7440_v29  ;;  %7441 = vst [vmem:[#allocation15_spill] sm:$0xff] %v4224_v38  ;;  %v4236_v60 = vpop.permute.xlu0 %1199 }
 0x181   :  { %7436 = vst [vmem:[#allocation109_spill] sm:$0xff] %v4202_v30  ;;  %v7442_v0 = vmax.f32 %v3501_v33, %v3726_v3  ;;  %v892_v22 = vmin.f32 %v7444_v31, %v7421_v27  ;;  %v1546_v24 = vmax.f32 %v7444_v31, %v7421_v27  ;;  %7445 = vst [vmem:[#allocation70_spill] sm:$0xff] %v4236_v60  ;;  %1962 = vbcast.lane.b32.xlu1 %v3969_v17, 344  ;;  %v7450_v31 = vld [vmem:[#allocation19_spill] sm:$0xff] }
 0x182   :  { %v4238_v18 = vmul.f32 %v1607_v16, %v1607_v16  ;;  %v7446_v32 = vmin.f32 %v3501_v33, %v3726_v3  ;;  %v1549_v16 = vmax.f32 %v7447_v20, %v7421_v27  ;;  %v894_v29 = vmin.f32 %v7450_v31, %v7421_v27  ;;  %1958 = vbcast.lane.b32.xlu0 %v3969_v17, 336  ;;  %v4272_v38 = vpop.permute.xlu1 %1211 }
 0x183   :  { %v4230_v45 = vsub.f32 %v891_v61, %v7442_v0  ;;  %v895_v61 = vmin.f32 %v7447_v20, %v7421_v27  ;;  %v7448_v0 = vmax.f32 %v3503_v34, %v3726_v3  ;;  %v1548_v33 = vmax.f32 %v7450_v31, %v7421_v27  ;;  %7456 = vst [vmem:[#allocation110_spill] sm:$0xff] %v4272_v38 }
 0x184   :  { %v1609_v53 = vsub.f32 %v1545_v56, %v7446_v32  ;;  %v4259_v56 = vmul.f32 %v1606_v25, %v1606_v25  ;;  %v7452_v32 = vmin.f32 %v3503_v34, %v3726_v3  ;;  %v7455_v20 = vmin.f32 %v3508_v36, %v3726_v3 }
 0x185   :  { %7443 = vst [vmem:[#allocation16_spill] sm:$0xff] %v4230_v45  ;;  %v4250_v23 = vsub.f32 %v890_v28, %v7448_v0  ;;  %v7453_v28 = vmax.f32 %v3508_v36, %v3726_v3  ;;  %v7457_v25 = vmax.f32 %v3510_v37, %v3726_v3  ;;  %v7459_v34 = vmin.f32 %v3510_v37, %v3726_v3 }
 0x186   :  { %7451 = vst [vmem:[#allocation18_spill] sm:$0xff] %v4259_v56  ;;  %v1608_v30 = vsub.f32 %v1544_v26, %v7452_v32  ;;  %v1611_v60 = vsub.f32 %v1547_v19, %v7455_v20  ;;  %v4286_v32 = vpop.permute.xlu0 %1207  ;;  %v4288_v36 = vmul.f32 %v1609_v53, %v1609_v53  ;;  %v7462_v19 = vmax.f32 %v3514_v39, %v3726_v3  ;;  %v7464_v20 = vld [vmem:[#allocation20_spill] sm:$0xff] }
 0x187   :  { %7449 = vst [vmem:[#allocation17_spill] sm:$0xff] %v4250_v23  ;;  %v4267_v0 = vsub.f32 %v893_v59, %v7453_v28  ;;  %v4278_v4 = vsub.f32 %v892_v22, %v7457_v25  ;;  %v1610_v26 = vsub.f32 %v1546_v24, %v7459_v34  ;;  %v4284_v59 = vrot.slane %v861_v12, %v3441_v5  ;;  %v7465_v25 = vld [vmem:[#allocation57_spill] sm:$0xff] }
 0x188   :  { %7460 = vst [vmem:[#allocation112_spill] sm:$0xff] %v4286_v32  ;;  %7461 = vst [vmem:[#allocation113_spill] sm:$0xff] %v4288_v36  ;;  %v4293_v28 = vsub.f32 %v895_v61, %v7462_v19  ;;  %v897_v22 = vmin.f32 %v7464_v20, %v7421_v27  ;;  %v1329_v31 = vrot.slane %v7465_v25, 2  ;;  %1970 = vbcast.lane.b32.xlu1 %v3969_v17, 360  ;;  %1966 = vbcast.lane.b32.xlu0 %v3969_v17, 352 }
 0x189   :  { %7454 = vst [vmem:[#allocation19_spill] sm:$0xff] %v4267_v0  ;;  %7458 = vst [vmem:[#allocation111_spill] sm:$0xff] %v4278_v4  ;;  %v7466_v24 = vmin.f32 %v3514_v39, %v3726_v3  ;;  %v7467_v53 = vmax.f32 %v3516_v40, %v3726_v3  ;;  %v7469_v61 = vmin.f32 %v3516_v40, %v3726_v3  ;;  %v7474_v40 = vld [vmem:[#allocation21_spill] sm:$0xff] }
 0x18a   :  { %7463 = vst [vmem:[#allocation114_spill] sm:$0xff] %v4293_v28  ;;  %v4312_v45 = vmul.f32 %v1608_v30, %v1608_v30  ;;  %v4315_v37 = vmul.f32 %v1611_v60, %v1611_v60  ;;  %v1551_v39 = vmax.f32 %v7464_v20, %v7421_v27  ;;  %v1550_v30 = vmax.f32 %v7474_v40, %v7421_v27 }
 0x18b   :  { %v1613_v12 = vsub.f32 %v1549_v16, %v7466_v24  ;;  %v4306_v34 = vsub.f32 %v894_v29, %v7467_v53  ;;  %v1612_v19 = vsub.f32 %v1548_v33, %v7469_v61  ;;  %v4319_v16 = vpop.permute.xlu1 %1219  ;;  %v4322_v24 = vmul.f32 %v1610_v26, %v1610_v26  ;;  %v4328_v53 = vpop.permute.xlu0 %1215  ;;  %v4341_v26 = vld [vmem:[%s7093_s2] sm:$0xff]  ;;  %v7478_v29 = vld [vmem:[#allocation7_spill] sm:$0xff] }
 0x18c   :  { %7470 = vst [vmem:[#allocation57_spill] sm:$0xff] %v4312_v45  ;;  %7471 = vst [vmem:[#allocation115_spill] sm:$0xff] %v4315_v37  ;;  %v896_v33 = vmin.f32 %v7474_v40, %v7421_v27  ;;  %v7476_v61 = vmax.f32 %v3518_v41, %v3726_v3  ;;  %v1331_v32 = vmul.f32 %v1329_v31, %v7465_v25  ;;  %1978 = vbcast.lane.b32.xlu1 %v3969_v17, 376 }
 0x18d   :  { %7468 = vst [vmem:[#allocation20_spill] sm:$0xff] %v4306_v34  ;;  %7472 = vst [vmem:[#allocation116_spill] sm:$0xff] %v4319_v16  ;;  %v4345_v40 = vrot.slane %v4341_v26, %v7478_v29  ;;  %v4347_v4 = vmul.f32 %v1613_v12, %v1613_v12  ;;  %v4350_v28 = vmul.f32 %v1612_v19, %v1612_v19  ;;  %1974 = vbcast.lane.b32.xlu0 %v3969_v17, 368  ;;  %v7483_v29 = vld [vmem:[#allocation23_spill] sm:$0xff]  ;;  %v7485_v34 = vld [vmem:[#allocation24_spill] sm:$0xff] }
 0x18e   :  { %7473 = vst [vmem:[#allocation117_spill] sm:$0xff] %v4322_v24  ;;  %7475 = vst [vmem:[#allocation21_spill] sm:$0xff] %v4328_v53  ;;  %v4334_v20 = vsub.f32 %v897_v22, %v7476_v61  ;;  %v7481_v22 = vld [vmem:[#allocation22_spill] sm:$0xff]  ;;  %v7482_v25 = vmin.f32 %v3518_v41, %v3726_v3  ;;  %v898_v12 = vmin.f32 %v7483_v29, %v7421_v27  ;;  %v7486_v41 = vld [vmem:[#allocation25_spill] sm:$0xff] }
 0x18f   :  { %7479 = vst [vmem:[#allocation7_spill] sm:$0xff] %v4347_v4  ;;  %7480 = vst [vmem:[#allocation119_spill] sm:$0xff] %v4350_v28  ;;  %v899_v31 = vmin.f32 %v7481_v22, %v7421_v27  ;;  %v1553_v0 = vmax.f32 %v7481_v22, %v7421_v27  ;;  %v1552_v60 = vmax.f32 %v7483_v29, %v7421_v27  ;;  %v4364_v19 = vpop.permute.xlu1 %1227  ;;  %v7500_v4 = vld [vmem:[#allocation9_spill] sm:$0xff] }
 0x190   :  { %7477 = vst [vmem:[#allocation118_spill] sm:$0xff] %v4334_v20  ;;  %v1615_v61 = vsub.f32 %v1551_v39, %v7482_v25  ;;  %7484 = vst [vmem:[#allocation22_spill] sm:$0xff] %v4364_v19  ;;  %v901_v23 = vmin.f32 %v7485_v34, %v7421_v27  ;;  %v1555_v17 = vmax.f32 %v7485_v34, %v7421_v27  ;;  %v4374_v25 = vpop.permute.xlu0 %1223  ;;  %2053 = vbcast.lane.b32.xlu1 %v4345_v40, 264 }
 0x191   :  { %v900_v39 = vmin.f32 %v7486_v41, %v7421_v27  ;;  %v1554_v22 = vmax.f32 %v7486_v41, %v7421_v27  ;;  %7487 = vst [vmem:[#allocation23_spill] sm:$0xff] %v4374_v25  ;;  %v7488_v29 = vmax.f32 %v3520_v42, %v3726_v3  ;;  %v7490_v16 = vmin.f32 %v3520_v42, %v3726_v3  ;;  %v7493_v25 = vld [vmem:[#allocation26_spill] sm:$0xff] }
 0x192   :  { %v1333_v34 = vcombine.high %v1331_v32, %v1331_v32  ;;  %v4389_v41 = vsub.f32 %v899_v31, %v7491_v13  ;;  %v903_v53 = vmin.f32 %v7493_v25, %v7421_v27  ;;  %v1557_v20 = vmax.f32 %v7493_v25, %v7421_v27  ;;  %2049 = vbcast.lane.b32.xlu0 %v4345_v40, 256 }
 0x193   :  { %v4380_v19 = vsub.f32 %v896_v33, %v7488_v29  ;;  %v1614_v38 = vsub.f32 %v1550_v30, %v7490_v16  ;;  %v7494_v33 = vld [vmem:[#allocation27_spill] sm:$0xff]  ;;  %v7495_v42 = vmin.f32 %v3522_v43, %v3726_v3  ;;  %v7496_v16 = vmax.f32 %v3524_v44, %v3726_v3  ;;  %v4411_v28 = vpop.permute.xlu1 %1235 }
 0x194   :  { %7492 = vst [vmem:[#allocation25_spill] sm:$0xff] %v4389_v41  ;;  %v902_v29 = vmin.f32 %v7494_v33, %v7421_v27  ;;  %v7498_v30 = vmin.f32 %v3524_v44, %v3726_v3  ;;  %v1556_v25 = vmax.f32 %v7494_v33, %v7421_v27  ;;  %7499 = vst [vmem:[#allocation27_spill] sm:$0xff] %v4411_v28  ;;  %2061 = vbcast.lane.b32.xlu1 %v4345_v40, 280  ;;  %v7537_v41 = vld [vmem:[#allocation36_spill] sm:$0xff] }
 0x195   :  { %7489 = vst [vmem:[#allocation24_spill] sm:$0xff] %v4380_v19  ;;  %v1617_v32 = vsub.f32 %v1553_v0, %v7495_v42  ;;  %v4404_v13 = vsub.f32 %v898_v12, %v7496_v16  ;;  %v7501_v55 = vmax.f32 %v7500_v4, %v3726_v3  ;;  %v7503_v43 = vmin.f32 %v7500_v4, %v3726_v3  ;;  %v7510_v16 = vld [vmem:[#allocation63_spill] sm:$0xff] }
 0x196   :  { %v1616_v31 = vsub.f32 %v1552_v60, %v7498_v30  ;;  %v7504_v12 = vmax.f32 %v3528_v46, %v3726_v3  ;;  %v7506_v44 = vmin.f32 %v3528_v46, %v3726_v3  ;;  %v4429_v60 = vpop.permute.xlu0 %1231  ;;  %v4431_v33 = vmul.f32 %v1615_v61, %v1615_v61  ;;  %2057 = vbcast.lane.b32.xlu0 %v4345_v40, 272 }
 0x197   :  { %7497 = vst [vmem:[#allocation26_spill] sm:$0xff] %v4404_v13  ;;  %v4416_v24 = vsub.f32 %v901_v23, %v7501_v55  ;;  %v1619_v0 = vsub.f32 %v1555_v17, %v7503_v43  ;;  %7507 = vst [vmem:[#allocation121_spill] sm:$0xff] %v4429_v60  ;;  %v4434_v23 = vmul.f32 %v1614_v38, %v1614_v38  ;;  %v7524_v43 = vld [vmem:[#allocation28_spill] sm:$0xff]  ;;  %v7528_v55 = vld [vmem:[#allocation30_spill] sm:$0xff] }
 0x198   :  { %v4424_v42 = vsub.f32 %v900_v39, %v7504_v12  ;;  %v1618_v27 = vsub.f32 %v1554_v22, %v7506_v44  ;;  %7508 = vst [vmem:[#allocation122_spill] sm:$0xff] %v4431_v33  ;;  %v4437_v4 = vrot.slane %v1333_v34, %v7510_v16  ;;  %v7511_v39 = vmax.f32 %v3530_v47, %v3726_v3  ;;  %v7529_v17 = vld [vmem:[#allocation31_spill] sm:$0xff] }
 0x199   :  { %7502 = vst [vmem:[#allocation9_spill] sm:$0xff] %v4416_v24  ;;  %7509 = vst [vmem:[#allocation123_spill] sm:$0xff] %v4434_v23  ;;  %v7513_v61 = vmin.f32 %v3530_v47, %v3726_v3  ;;  %v7514_v38 = vmax.f32 %v3532_v48, %v3726_v3  ;;  %v4455_v34 = vmul.f32 %v1617_v32, %v1617_v32  ;;  %2069 = vbcast.lane.b32.xlu1 %v4345_v40, 296  ;;  %v7554_v23 = vld [vmem:[#allocation62_spill] sm:$0xff] }
 0x19a   :  { %7505 = vst [vmem:[#allocation120_spill] sm:$0xff] %v4424_v42  ;;  %v4444_v46 = vsub.f32 %v903_v53, %v7511_v39  ;;  %v4458_v12 = vmul.f32 %v1616_v31, %v1616_v31  ;;  %v7518_v53 = vmin.f32 %v3532_v48, %v3726_v3  ;;  %v4463_v39 = vpop.permute.xlu1 %1243  ;;  %v4471_v32 = vpop.permute.xlu0 %1239  ;;  %v7525_v48 = vld [vmem:[#allocation29_spill] sm:$0xff]  ;;  %2065 = vbcast.lane.b32.xlu0 %v4345_v40, 288  ;;  %v7541_v31 = vld [vmem:[#allocation39_spill] sm:$0xff]  ;;  %v7594_v3 = vmax.f32 %v3922_v49, 0.0 }
 0x19b   :  { %v1621_v22 = vsub.f32 %v1557_v20, %v7513_v61  ;;  %v4452_v30 = vsub.f32 %v902_v29, %v7514_v38  ;;  %7516 = vst [vmem:[#allocation126_spill] sm:$0xff] %v4455_v34  ;;  %7519 = vst [vmem:[#allocation128_spill] sm:$0xff] %v4463_v39  ;;  %v4466_v20 = vmul.f32 %v1619_v0, %v1619_v0  ;;  %v7523_v38 = vld [vmem:[#allocation74_spill] sm:$0xff]  ;;  %v7531_v29 = vld [vmem:[#allocation32_spill] sm:$0xff] }
 0x19c   :  { %7512 = vst [vmem:[#allocation124_spill] sm:$0xff] %v4444_v46  ;;  %7517 = vst [vmem:[#allocation127_spill] sm:$0xff] %v4458_v12  ;;  %v1620_v44 = vsub.f32 %v1556_v25, %v7518_v53  ;;  %v4469_v61 = vmul.f32 %v1618_v27, %v1618_v27  ;;  %v1348_v25 = vrot.slane %v4437_v4, %v7510_v16  ;;  %v7532_v46 = vld [vmem:[#allocation33_spill] sm:$0xff]  ;;  %v7534_v0 = vld [vmem:[#allocation34_spill] sm:$0xff] }
 0x19d   :  { %7515 = vst [vmem:[#allocation125_spill] sm:$0xff] %v4452_v30  ;;  %7520 = vst [vmem:[#allocation129_spill] sm:$0xff] %v4466_v20  ;;  %v4483_v27 = vmul.f32 %v1621_v22, %v1621_v22  ;;  %2077 = vbcast.lane.b32.xlu1 %v4345_v40, 312  ;;  %v7536_v30 = vld [vmem:[#allocation35_spill] sm:$0xff]  ;;  %v7538_v53 = vld [vmem:[#allocation37_spill] sm:$0xff]  ;;  %v1341_v24 = vcombine.high %v4437_v4, %v4437_v4  ;;  %v988_v2 = vmin.f32 %v7554_v23, %v3934_v11 }
 0x19e   :  { %7521 = vst [vmem:[#allocation130_spill] sm:$0xff] %v4469_v61  ;;  %7522 = vst [vmem:[#allocation131_spill] sm:$0xff] %v4471_v32  ;;  %v4489_v47 = vmul.f32 %v1620_v44, %v1620_v44  ;;  %v4497_v22 = vpop.permute.xlu1 %1251  ;;  %v4507_v42 = vpop.permute.xlu0 %1247  ;;  %v4516_v13 = vrot.slane %v1348_v25, %v3441_v5  ;;  %2073 = vbcast.lane.b32.xlu0 %v4345_v40, 304  ;;  %v7544_v44 = vld [vmem:[#allocation41_spill] sm:$0xff]  ;;  %v7546_v25 = vld [vmem:[#allocation43_spill] sm:$0xff]  ;;  %v1622_v61 = vmax.f32 %v7554_v23, %v3934_v11 }
 0x19f   :  { %7526 = vst [vmem:[#allocation74_spill] sm:$0xff] %v4483_v27  ;;  %7530 = vst [vmem:[#allocation29_spill] sm:$0xff] %v4497_v22  ;;  %v7548_v27 = vld [vmem:[#allocation44_spill] sm:$0xff]  ;;  %v7549_v32 = vld [vmem:[#allocation45_spill] sm:$0xff]  ;;  %v7564_v36 = vmin.f32 %v7525_v48, %v7523_v38  ;;  %v7569_v23 = vmax.f32 %v7524_v43, %v7523_v38  ;;  %v7571_v50 = vmax.f32 %v7525_v48, %v7523_v38 }
 0x1a0   :  { %7527 = vst [vmem:[#allocation28_spill] sm:$0xff] %v4489_v47  ;;  %7533 = vst [vmem:[#allocation30_spill] sm:$0xff] %v4507_v42  ;;  %v7539_v42 = vld [vmem:[#allocation38_spill] sm:$0xff]  ;;  %v7542_v47 = vld [vmem:[#allocation40_spill] sm:$0xff] }
 0x1a1   :  { %7535 = vst [vmem:[#allocation31_spill] sm:$0xff] %v4516_v13  ;;  %2085 = vbcast.lane.b32.xlu1 %v4345_v40, 328  ;;  %v7550_v20 = vld [vmem:[#allocation46_spill] sm:$0xff]  ;;  %v7551_v12 = vld [vmem:[#allocation61_spill] sm:$0xff]  ;;  %v7560_v13 = vmin.f32 %v7524_v43, %v7523_v38  ;;  %v1686_v56 = vsub.f32 %v1622_v61, %v7564_v36  ;;  %v1062_v36 = vsub.f32 %v988_v2, %v7571_v50  ;;  %v7597_v49 = vld [vmem:[#allocation71_spill] sm:$0xff] }
 0x1a2   :  { %v4536_v22 = vpop.permute.xlu1 %1259  ;;  %v4546_v39 = vpop.permute.xlu0 %1255  ;;  %2081 = vbcast.lane.b32.xlu0 %v4345_v40, 320  ;;  %v1623_v19 = vmax.f32 %v7551_v12, %v3934_v11  ;;  %v7572_v61 = vmin.f32 %v7528_v55, %v7523_v38  ;;  %v7580_v50 = vmin.f32 %v7529_v17, %v7523_v38  ;;  %v7584_v43 = vmax.f32 %v7528_v55, %v7523_v38  ;;  %v7589_v55 = vld [vmem:[#allocation68_spill] sm:$0xff] }
 0x1a3   :  { %7540 = vst [vmem:[#allocation32_spill] sm:$0xff] %v4536_v22  ;;  %7543 = vst [vmem:[#allocation33_spill] sm:$0xff] %v4546_v39  ;;  %v7545_v22 = vld [vmem:[#allocation42_spill] sm:$0xff]  ;;  %v7547_v39 = vld [vmem:[#allocation79_spill] sm:$0xff] }
 0x1a4   :  { %v1687_v10 = vsub.f32 %v1623_v19, %v7560_v13  ;;  %v1355_v19 = vrot.slane %v1341_v24, %v7510_v16 }
 0x1a5   :  { %2093 = vbcast.lane.b32.xlu1 %v4345_v40, 344 }
 0x1a6   :  { %v4574_v34 = vpop.permute.xlu1 %1270  ;;  %v4584_v33 = vpop.permute.xlu0 %1266  ;;  %2089 = vbcast.lane.b32.xlu0 %v4345_v40, 336  ;;  %v4659_v4 = vrot.slane %v1355_v19, %v3441_v5 }
 0x1a7   :  { %7552 = vst [vmem:[#allocation34_spill] sm:$0xff] %v4574_v34  ;;  %7555 = vst [vmem:[#allocation35_spill] sm:$0xff] %v4584_v33  ;;  %v989_v34 = vmin.f32 %v7551_v12, %v3934_v11  ;;  %v7561_v33 = vld [vmem:[#allocation64_spill] sm:$0xff]  ;;  %v1751_v12 = vmul.f32 %v1687_v10, %v1687_v10 }
 0x1a8   :  { %v1625_v45 = vmax.f32 %v7561_v33, %v3934_v11  ;;  %v991_v57 = vmin.f32 %v7561_v33, %v3934_v11  ;;  %7575 = vst [vmem:[#allocation39_spill] sm:$0xff] %v4659_v4  ;;  %v7590_v33 = vld [vmem:[#allocation69_spill] sm:$0xff] }
 0x1a9   :  { %2101 = vbcast.lane.b32.xlu1 %v4345_v40, 360  ;;  %v1063_v16 = vsub.f32 %v989_v34, %v7569_v23  ;;  %v1750_v23 = vmul.f32 %v1686_v56, %v1686_v56  ;;  %v7578_v56 = vld [vmem:[#allocation8_spill] sm:$0xff] }
 0x1aa   :  { %v4613_v37 = vpop.permute.xlu1 %1278  ;;  %v4623_v13 = vpop.permute.xlu0 %1274  ;;  %2097 = vbcast.lane.b32.xlu0 %v4345_v40, 352  ;;  %v1689_v60 = vsub.f32 %v1625_v45, %v7572_v61  ;;  %v4672_v61 = vrot.slane %v4341_v26, %v7578_v56  ;;  %v7582_v56 = vld [vmem:[#allocation66_spill] sm:$0xff] }
 0x1ab   :  { %7562 = vst [vmem:[#allocation36_spill] sm:$0xff] %v4613_v37  ;;  %7565 = vst [vmem:[#allocation37_spill] sm:$0xff] %v4623_v13  ;;  %v7570_v37 = vld [vmem:[#allocation65_spill] sm:$0xff]  ;;  %v1127_v5 = vmax.f32 %v1063_v16, 0.0  ;;  %v1627_v34 = vmax.f32 %v7582_v56, %v3934_v11  ;;  %v1782_v16 = vadd.f32 %v1750_v23, %v3971_v54  ;;  %v993_v54 = vmin.f32 %v7582_v56, %v3934_v11 }
 0x1ac   :  { %v1624_v13 = vmax.f32 %v7570_v37, %v3934_v11  ;;  %v990_v48 = vmin.f32 %v7570_v37, %v3934_v11  ;;  %v7581_v37 = vld [vmem:[#allocation88_spill] sm:$0xff]  ;;  %v1753_v4 = vmul.f32 %v1689_v60, %v1689_v60 }
 0x1ad   :  { %2109 = vbcast.lane.b32.xlu1 %v4345_v40, 376 }
 0x1ae   :  { %v4652_v28 = vpop.permute.xlu1 %1286  ;;  %v4661_v10 = vpop.permute.xlu0 %1282  ;;  %v1688_v45 = vsub.f32 %v1624_v13, %v7580_v50  ;;  %2105 = vbcast.lane.b32.xlu0 %v4345_v40, 368  ;;  %v4693_v13 = vsub.f32 %v991_v57, %v7584_v43  ;;  %v7585_v40 = vld [vmem:[#allocation67_spill] sm:$0xff]  ;;  %v1629_v57 = vmax.f32 %v7589_v55, %v3934_v11  ;;  %v1628_v50 = vmax.f32 %v7590_v33, %v3934_v11 }
 0x1af   :  { %7573 = vst [vmem:[#allocation38_spill] sm:$0xff] %v4652_v28  ;;  %7576 = vst [vmem:[#allocation40_spill] sm:$0xff] %v4661_v10  ;;  %v1783_v10 = vadd.f32 %v1751_v12, %v7581_v37  ;;  %v1126_v28 = vmax.f32 %v1062_v36, 0.0  ;;  %v1626_v12 = vmax.f32 %v7585_v40, %v3934_v11  ;;  %v7588_v37 = vmax.f32 %v7529_v17, %v7523_v38 }
 0x1b0   :  { %v1752_v23 = vmul.f32 %v1688_v45, %v1688_v45  ;;  %v1785_v56 = vadd.f32 %v1753_v4, %v4014_v14  ;;  %v7596_v4 = vmin.f32 %v7532_v46, %v7523_v38  ;;  %v7599_v14 = vmin.f32 %v7534_v0, %v7523_v38 }
 0x1b1   :  { %2120 = vbcast.lane.b32.xlu1 %v4672_v61, 264  ;;  %v4726_v43 = vmul.f32 %v1126_v28, %v7594_v3  ;;  %v1631_v28 = vmax.f32 %v7597_v49, %v3934_v11 }
 0x1b2   :  { %v4685_v24 = vpop.permute.xlu1 %1294  ;;  %v4697_v36 = vpop.permute.xlu0 %1290  ;;  %2116 = vbcast.lane.b32.xlu0 %v4672_v61, 256  ;;  %v1693_v60 = vsub.f32 %v1629_v57, %v7599_v14  ;;  %v994_v57 = vmin.f32 %v7590_v33, %v3934_v11 }
 0x1b3   :  { %7583 = vst [vmem:[#allocation41_spill] sm:$0xff] %v4685_v24  ;;  %7586 = vst [vmem:[#allocation42_spill] sm:$0xff] %v4697_v36  ;;  %v4704_v24 = vsub.f32 %v990_v48, %v7588_v37  ;;  %v7591_v36 = vld [vmem:[#allocation84_spill] sm:$0xff]  ;;  %v1815_v48 = vadd.f32 1e-07, %v1783_v10  ;;  %v7593_v37 = vmin.f32 %v7531_v29, %v7523_v38  ;;  %v35_v10 = vld [vmem:[%s7092_s1 + $0x8] sm:$0xff] }
 0x1b4   :  { %v7592_v19 = vmax.f32 %v7591_v36, 0.0  ;;  %v7600_v36 = vmin.f32 %v7536_v30, %v7523_v38 }
 0x1b5   :  { %v1691_v2 = vsub.f32 %v1627_v34, %v7593_v37  ;;  %v1690_v34 = vsub.f32 %v1626_v12, %v7596_v4  ;;  %v7598_v37 = vmax.f32 %v7531_v29, %v7523_v38  ;;  %2128 = vbcast.lane.b32.xlu1 %v4672_v61, 280  ;;  %v1784_v12 = vadd.f32 %v1752_v23, %v4036_v58  ;;  %v18_v58 = vld [vmem:[%s7091_s0] sm:$0xff] }
 0x1b6   :  { %v4717_v17 = vmul.f32 %v1127_v5, %v7592_v19  ;;  %v4728_v45 = vpop.permute.xlu1 %1302  ;;  %v34_v5 = vld [vmem:[%s7092_s1] sm:$0xff]  ;;  %v1814_v19 = vadd.f32 1e-07, %v1782_v16  ;;  %v4742_v3 = vpop.permute.xlu0 %1298  ;;  %v992_v16 = vmin.f32 %v7585_v40, %v3934_v11  ;;  %v995_v4 = vmin.f32 %v7589_v55, %v3934_v11  ;;  %2124 = vbcast.lane.b32.xlu0 %v4672_v61, 272  ;;  %3213 = vmatprep.mubr.msk.f32.mxu0 %vm36_vm0, %v18_v58  ;;  %v27_v58 = vld [vmem:[%s7091_s0 + $0x48] sm:$0xff] }
 0x1b7   :  { %7595 = vst [vmem:[#allocation43_spill] sm:$0xff] %v4728_v45  ;;  %v4748_v45 = vsub.f32 %v993_v54, %v7598_v37  ;;  %v1692_v29 = vsub.f32 %v1628_v50, %v7600_v36  ;;  %v3237_v54 = vpack.c.bf16 %v35_v10, %v34_v5  ;;  %3248 = vrcp.f32 %v1815_v48  ;;  %v7603_v36 = vld [vmem:[#allocation72_spill] sm:$0xff] }
 0x1b8   :  { %v1817_v40 = vadd.f32 1e-07, %v1785_v56  ;;  %v1755_v37 = vmul.f32 %v1691_v2, %v1691_v2  ;;  %v1754_v55 = vmul.f32 %v1690_v34, %v1690_v34  ;;  %v7602_v23 = vmin.f32 %v7537_v41, %v7523_v38  ;;  %v26_v2 = vld [vmem:[%s7091_s0 + $0x40] sm:$0xff] }
 0x1b9   :  { %v1630_v5 = vmax.f32 %v7603_v36, %v3934_v11  ;;  %3238 = vmatprep.subr.bf16.mxu0 %v3237_v54  ;;  %3241 = vmatprep.subr.bf16.mxu1 %v3237_v54  ;;  %3250 = vrcp.f32 %v1814_v19  ;;  %v7605_v56 = vmax.f32 %v7532_v46, %v7523_v38  ;;  %v1757_v34 = vmul.f32 %v1693_v60, %v1693_v60  ;;  %v20_v60 = vld [vmem:[%s7091_s0 + $0x10] sm:$0xff] }
 0x1ba   :  { %v4765_v14 = vpop.permute.xlu1 %1310  ;;  %v1695_v50 = vsub.f32 %v1631_v28, %v7602_v23  ;;  %v4775_v48 = vpop.permute.xlu0 %1306  ;;  %2136 = vbcast.lane.b32.xlu1 %v4672_v61, 296  ;;  %3240 = vmatpush3.bf16.msra.mxu0 %v3237_v54  ;;  %v19_v28 = vld [vmem:[%s7091_s0 + $0x8] sm:$0xff]  ;;  %v1816_v23 = vadd.f32 1e-07, %v1784_v12  ;;  %v1756_v33 = vmul.f32 %v1692_v29, %v1692_v29  ;;  %3252 = vrcp.f32 %v1817_v40 }
 0x1bb   :  { %7601 = vst [vmem:[#allocation79_spill] sm:$0xff] %v4765_v14  ;;  %7604 = vst [vmem:[#allocation44_spill] sm:$0xff] %v4775_v48  ;;  %v4784_v10 = vsub.f32 %v992_v16, %v7605_v56  ;;  %v7606_v48 = vmax.f32 %v7534_v0, %v7523_v38  ;;  %v7607_v14 = vld [vmem:[#allocation75_spill] sm:$0xff]  ;;  %2132 = vbcast.lane.b32.xlu0 %v4672_v61, 288  ;;  %v1787_v16 = vadd.f32 %v1755_v37, %v4039_v8 }
 0x1bc   :  { %v1633_v46 = vmax.f32 %v7607_v14, %v3934_v11  ;;  %v7608_v0 = vmax.f32 %v7536_v30, %v7523_v38  ;;  %3242 = vmatpush3.bf16.msra.mxu1 %v3237_v54  ;;  %3225 = vmatprep.mubr.msk.f32.mxu1 %vm36_vm0, %v26_v2  ;;  %v1786_v40 = vadd.f32 %v1754_v55, %v4044_v15  ;;  %v28_v54 = vld [vmem:[%s7091_s0 + $0x50] sm:$0xff]  ;;  %3254 = vrcp.f32 %v1816_v23 }
 0x1bd   :  { %v4793_v19 = vsub.f32 %v995_v4, %v7606_v48  ;;  %v997_v4 = vmin.f32 %v7597_v49, %v3934_v11  ;;  %v1759_v8 = vmul.f32 %v1695_v50, %v1695_v50  ;;  %v996_v30 = vmin.f32 %v7603_v36, %v3934_v11  ;;  %3214 = vmatmul.mubr.msk.f32.vlgmr.msra.gmra.mrb[0].mxu0 %vm36_vm0, %v19_v28  ;;  %v7612_v50 = vld [vmem:[#allocation76_spill] sm:$0xff]  ;;  %v22_v28 = vld [vmem:[%s7091_s0 + $0x20] sm:$0xff] }
 0x1be   :  { %v4806_v12 = vsub.f32 %v994_v57, %v7608_v0  ;;  %v4810_v29 = vpop.permute.xlu1 %1318  ;;  %v7610_v37 = vmin.f32 %v7538_v53, %v7523_v38  ;;  %v4822_v49 = vpop.permute.xlu0 %1314  ;;  %v1789_v15 = vadd.f32 %v1757_v34, %v4056_v7  ;;  %v999_v55 = vmin.f32 %v7607_v14, %v3934_v11  ;;  %2144 = vbcast.lane.b32.xlu1 %v4672_v61, 312  ;;  %v7614_v14 = vld [vmem:[#allocation77_spill] sm:$0xff] }
 0x1bf   :  { %7609 = vst [vmem:[#allocation45_spill] sm:$0xff] %v4810_v29  ;;  %7611 = vst [vmem:[#allocation46_spill] sm:$0xff] %v4822_v49  ;;  %v1632_v36 = vmax.f32 %v7612_v50, %v3934_v11  ;;  %3216 = vmatprep.mubr.msk.f32.mxu0 %vm36_vm0, %v20_v60  ;;  %v1788_v2 = vadd.f32 %v1756_v33, %v4070_v51  ;;  %v7613_v7 = vmin.f32 %v7539_v42, %v7523_v38 }
 0x1c0   :  { %v1694_v57 = vsub.f32 %v1630_v5, %v7610_v37  ;;  %v21_v5 = vld [vmem:[%s7091_s0 + $0x18] sm:$0xff]  ;;  %v1635_v34 = vmax.f32 %v7614_v14, %v3934_v11  ;;  %2140 = vbcast.lane.b32.xlu0 %v4672_v61, 304  ;;  %3226 = vmatmul.mubr.msk.f32.vlgmr.msra.gmra.mrb[0].mxu1 %vm36_vm0, %v27_v58  ;;  %v1819_v60 = vadd.f32 1e-07, %v1787_v16  ;;  %v7615_v33 = vmax.f32 %v7537_v41, %v7523_v38 }
 0x1c1   :  { %v1697_v56 = vsub.f32 %v1633_v46, %v7613_v7  ;;  %3228 = vmatprep.mubr.msk.f32.mxu1 %vm36_vm0, %v28_v54  ;;  %v29_v37 = vld [vmem:[%s7091_s0 + $0x58] sm:$0xff]  ;;  %v1818_v7 = vadd.f32 1e-07, %v1786_v40  ;;  %v1791_v16 = vadd.f32 %v1759_v8, %v4100_v62  ;;  %v7617_v58 = vmax.f32 %v7538_v53, %v7523_v38  ;;  %3217 = vmatmul.mubr.msk.f32.gmra.mrb[2].mxu0 %vm36_vm0, %v21_v5  ;;  %v4875_v54 = vpop.eup %3248  ;;  %v7621_v8 = vld [vmem:[#allocation78_spill] sm:$0xff] }
 0x1c2   :  { %v4855_v46 = vsub.f32 %v997_v4, %v7615_v33  ;;  %v4857_v0 = vpop.permute.xlu1 %1326  ;;  %v1758_v23 = vmul.f32 %v1694_v57, %v1694_v57  ;;  %v4869_v41 = vpop.permute.xlu0 %1322  ;;  %v30_v4 = vld [vmem:[%s7091_s0 + $0x60] sm:$0xff]  ;;  %7619 = vst [vmem:[#allocation64_spill] sm:$0xff] %v4875_v54  ;;  %v1821_v33 = vadd.f32 1e-07, %v1789_v15  ;;  %v998_v62 = vmin.f32 %v7612_v50, %v3934_v11  ;;  %2152 = vbcast.lane.b32.xlu1 %v4672_v61, 328  ;;  %v23_v57 = vld [vmem:[%s7091_s0 + $0x28] sm:$0xff] }
 0x1c3   :  { %7616 = vst [vmem:[#allocation61_spill] sm:$0xff] %v4857_v0  ;;  %v4867_v51 = vsub.f32 %v996_v30, %v7617_v58  ;;  %7618 = vst [vmem:[#allocation62_spill] sm:$0xff] %v4869_v41  ;;  %v7620_v53 = vmin.f32 %v7541_v31, %v7523_v38  ;;  %v1634_v30 = vmax.f32 %v7621_v8, %v3934_v11  ;;  %3219 = vmatprep.mubr.msk.f32.mxu0 %vm36_vm0, %v22_v28  ;;  %v24_v28 = vld [vmem:[%s7091_s0 + $0x30] sm:$0xff]  ;;  %v4902_v48 = vpop.eup %3250 }
 0x1c4   :  { %v1820_v5 = vadd.f32 1e-07, %v1788_v2  ;;  %v7622_v15 = vmax.f32 %v7539_v42, %v7523_v38  ;;  %v1761_v58 = vmul.f32 %v1697_v56, %v1697_v56  ;;  %2148 = vbcast.lane.b32.xlu0 %v4672_v61, 320  ;;  %3229 = vmatmul.mubr.msk.f32.gmra.mrb[2].mxu1 %vm36_vm0, %v29_v37  ;;  %7624 = vst [vmem:[#allocation65_spill] sm:$0xff] %v4902_v48  ;;  %3256 = vrcp.f32 %v1819_v60  ;;  %v7625_v2 = vld [vmem:[#allocation80_spill] sm:$0xff]  ;;  %v4923_v48 = vpop.eup %3252 }
 0x1c5   :  { %v1696_v40 = vsub.f32 %v1632_v36, %v7620_v53  ;;  %v7623_v36 = vmin.f32 %v7542_v47, %v7523_v38  ;;  %v1637_v56 = vmax.f32 %v7625_v2, %v3934_v11  ;;  %3231 = vmatprep.mubr.msk.f32.mxu1 %vm36_vm0, %v30_v4  ;;  %3258 = vrcp.f32 %v1818_v7  ;;  %3220 = vmatmul.mubr.msk.f32.gmra.mrb[4].mxu0 %vm36_vm0, %v23_v57  ;;  %v25_v57 = vld [vmem:[%s7091_s0 + $0x38] sm:$0xff] }
 0x1c6   :  { %v4892_v50 = vsub.f32 %v999_v55, %v7622_v15  ;;  %v1001_v55 = vmin.f32 %v7614_v14, %v3934_v11  ;;  %v31_v15 = vld [vmem:[%s7091_s0 + $0x68] sm:$0xff]  ;;  %v1823_v37 = vadd.f32 1e-07, %v1791_v16  ;;  %v4917_v42 = vpop.permute.xlu0 %1851  ;;  %v32_v14 = vld [vmem:[%s7091_s0 + $0x70] sm:$0xff]  ;;  %7628 = vst [vmem:[#allocation66_spill] sm:$0xff] %v4923_v48  ;;  %3260 = vrcp.f32 %v1821_v33  ;;  %2160 = vbcast.lane.b32.xlu1 %v4672_v61, 344  ;;  %3222 = vmatprep.mubr.msk.f32.mxu0 %vm36_vm0, %v24_v28 }
 0x1c7   :  { %v1699_v53 = vsub.f32 %v1635_v34, %v7623_v36  ;;  %v4909_v34 = vpop.permute.xlu1 %1855  ;;  %v1790_v36 = vadd.f32 %v1758_v23, %v4109_v6  ;;  %7627 = vst [vmem:[#allocation88_spill] sm:$0xff] %v4917_v42  ;;  %v7629_v4 = vmax.f32 %v7541_v31, %v7523_v38  ;;  %v1760_v16 = vmul.f32 %v1696_v40, %v1696_v40 }
 0x1c8   :  { %7626 = vst [vmem:[#allocation8_spill] sm:$0xff] %v4909_v34  ;;  %v7630_v6 = vmin.f32 %v7544_v44, %v7523_v38  ;;  %3262 = vrcp.f32 %v1820_v5  ;;  %v1793_v31 = vadd.f32 %v1761_v58, %v4152_v21  ;;  %2156 = vbcast.lane.b32.xlu0 %v4672_v61, 336  ;;  %3232 = vmatmul.mubr.msk.f32.gmra.mrb[4].mxu1 %vm36_vm0, %v31_v15  ;;  %v7752_v34 = vld [vmem:[#allocation116_spill] sm:$0xff] }
 0x1c9   :  { %v4928_v7 = vsub.f32 %v998_v62, %v7629_v4  ;;  %v1763_v62 = vmul.f32 %v1699_v53, %v1699_v53  ;;  %v7631_v40 = vmax.f32 %v7542_v47, %v7523_v38  ;;  %v1000_v28 = vmin.f32 %v7621_v8, %v3934_v11  ;;  %3234 = vmatprep.mubr.msk.f32.mxu1 %vm36_vm0, %v32_v14  ;;  %v33_v47 = vld [vmem:[%s7091_s0 + $0x78] sm:$0xff]  ;;  %v4960_v53 = vpop.eup %3254  ;;  %v7662_v14 = vld [vmem:[#allocation90_spill] sm:$0xff] }
 0x1ca   :  { %v1698_v23 = vsub.f32 %v1634_v30, %v7630_v6  ;;  %v7632_v5 = vmin.f32 %v7545_v22, %v7523_v38  ;;  %v7633_v6 = vld [vmem:[#allocation81_spill] sm:$0xff]  ;;  %7635 = vst [vmem:[#allocation68_spill] sm:$0xff] %v4960_v53  ;;  %3264 = vrcp.f32 %v1823_v37  ;;  %v1003_v8 = vmin.f32 %v7625_v2, %v3934_v11  ;;  %3223 = vmatmul.mubr.msk.f32.gmra.mrb[6].mxu0 %vm36_vm0, %v25_v57  ;;  %v7638_v53 = vld [vmem:[#allocation83_spill] sm:$0xff] }
 0x1cb   :  { %v4945_v30 = vsub.f32 %v1001_v55, %v7631_v40  ;;  %v1636_v21 = vmax.f32 %v7633_v6, %v3934_v11  ;;  %v4954_v58 = vpop.permute.xlu1 %1863  ;;  %v1822_v55 = vadd.f32 1e-07, %v1790_v36  ;;  %v4966_v40 = vpop.permute.xlu0 %1859  ;;  %v1002_v60 = vmin.f32 %v7633_v6, %v3934_v11  ;;  %2168 = vbcast.lane.b32.xlu1 %v4672_v61, 360 }
 0x1cc   :  { %v1701_v4 = vsub.f32 %v1637_v56, %v7632_v5  ;;  %7634 = vst [vmem:[#allocation67_spill] sm:$0xff] %v4954_v58  ;;  %v7636_v56 = vld [vmem:[#allocation82_spill] sm:$0xff]  ;;  %7637 = vst [vmem:[#allocation69_spill] sm:$0xff] %v4966_v40  ;;  %v1792_v5 = vadd.f32 %v1760_v16, %v4174_v52  ;;  %v1762_v33 = vmul.f32 %v1698_v23, %v1698_v23  ;;  %v1825_v37 = vadd.f32 1e-07, %v1793_v31 }
 0x1cd   :  { %v1639_v15 = vmax.f32 %v7636_v56, %v4284_v59  ;;  %v1795_v2 = vadd.f32 %v1763_v62, %v4177_v35  ;;  %v1005_v36 = vmin.f32 %v7636_v56, %v4284_v59  ;;  %v1638_v48 = vmax.f32 %v7638_v53, %v4284_v59  ;;  %2164 = vbcast.lane.b32.xlu0 %v4672_v61, 352 }
 0x1ce   :  { %3235 = vmatmul.mubr.msk.f32.gmra.mrb[6].mxu1 %vm36_vm0, %v33_v47  ;;  %v7639_v11 = vmax.f32 %v7544_v44, %v7523_v38  ;;  %v1765_v23 = vmul.f32 %v1701_v4, %v1701_v4  ;;  %v7640_v35 = vmin.f32 %v7546_v25, %v7523_v38  ;;  %3266 = vrcp.f32 %v1822_v55  ;;  %v7644_v44 = vld [vmem:[#allocation85_spill] sm:$0xff] }
 0x1cf   :  { %v4990_v31 = vpop.permute.xlu1 %1871  ;;  %v7642_v62 = vmax.f32 %v7545_v22, %v7523_v38  ;;  %v7643_v47 = vmin.f32 %v7548_v27, %v7547_v39  ;;  %v5002_v4 = vpop.permute.xlu0 %1867  ;;  %v7647_v55 = vmax.f32 %v7546_v25, %v7523_v38  ;;  %2176 = vbcast.lane.b32.xlu1 %v4672_v61, 376  ;;  %3268 = vrcp.f32 %v1825_v37 }
 0x1d0   :  { %v4985_v16 = vsub.f32 %v1000_v28, %v7639_v11  ;;  %v1700_v57 = vsub.f32 %v1636_v21, %v7640_v35  ;;  %7641 = vst [vmem:[#allocation84_spill] sm:$0xff] %v4990_v31  ;;  %v1641_v28 = vmax.f32 %v7644_v44, %v4284_v59  ;;  %7645 = vst [vmem:[#allocation71_spill] sm:$0xff] %v5002_v4  ;;  %v5004_v11 = vpop.eup %3256  ;;  %v1824_v21 = vadd.f32 1e-07, %v1792_v5  ;;  %v7680_v4 = vld [vmem:[#allocation50_spill] sm:$0xff] }
 0x1d1   :  { %v4995_v6 = vsub.f32 %v1003_v8, %v7642_v62  ;;  %v1703_v56 = vsub.f32 %v1639_v15, %v7643_v47  ;;  %7646 = vst [vmem:[#allocation72_spill] sm:$0xff] %v5004_v11  ;;  %v1794_v35 = vadd.f32 %v1762_v33, %v4182_v1  ;;  %v5010_v22 = vsub.f32 %v1002_v60, %v7647_v55  ;;  %v7648_v8 = vld [vmem:[#allocation5_spill] sm:$0xff]  ;;  %v5018_v47 = vpop.eup %3258  ;;  %v7672_v11 = vld [vmem:[#allocation48_spill] sm:$0xff] }
 0x1d2   :  { %v7649_v62 = vsub.s32 4, %v7648_v8  ;;  %7650 = vst [vmem:[#allocation75_spill] sm:$0xff] %v5018_v47  ;;  %v1827_v52 = vadd.f32 1e-07, %v1795_v2  ;;  %v7651_v5 = vmax.f32 %v7548_v27, %v7547_v39  ;;  %v7652_v38 = vmin.f32 %v7549_v32, %v7547_v39  ;;  %2172 = vbcast.lane.b32.xlu0 %v4672_v61, 368  ;;  %v5029_v60 = vpop.eup %3260 }
 0x1d3   :  { %7653 = vst [vmem:[#allocation76_spill] sm:$0xff] %v5029_v60  ;;  %v1797_v33 = vadd.f32 %v1765_v23, %v4194_v9  ;;  %v1764_v55 = vmul.f32 %v1700_v57, %v1700_v57  ;;  %v1004_v37 = vmin.f32 %v7638_v53, %v4284_v59  ;;  %v5035_v2 = vpop.permute.xlu1 %1879  ;;  %v5037_v27 = vpop.eup %3262  ;;  %v7656_v61 = vmin.f32 %v7550_v20, %v7547_v39 }
 0x1d4   :  { %v5016_v15 = vrot.slane %v4341_v26, %v7649_v62  ;;  %v5023_v1 = vsub.f32 %v1005_v36, %v7651_v5  ;;  %v1702_v25 = vsub.f32 %v1638_v48, %v7652_v38  ;;  %7654 = vst [vmem:[#allocation77_spill] sm:$0xff] %v5035_v2  ;;  %7655 = vst [vmem:[#allocation78_spill] sm:$0xff] %v5037_v27  ;;  %v7657_v5 = vld [vmem:[#allocation86_spill] sm:$0xff]  ;;  %v5045_v26 = vpop.permute.xlu0 %1875  ;;  %3270 = vrcp.f32 %v1824_v21  ;;  %v5051_v57 = vpop.eup %3264  ;;  %v7664_v27 = vld [vmem:[#allocation47_spill] sm:$0xff] }
 0x1d5   :  { %v1767_v62 = vmul.f32 %v1703_v56, %v1703_v56  ;;  %v1705_v48 = vsub.f32 %v1641_v28, %v7656_v61  ;;  %v1640_v38 = vmax.f32 %v7657_v5, %v4284_v59  ;;  %7658 = vst [vmem:[#allocation80_spill] sm:$0xff] %v5045_v26  ;;  %v1826_v9 = vadd.f32 1e-07, %v1794_v35  ;;  %7659 = vst [vmem:[#allocation81_spill] sm:$0xff] %v5051_v57  ;;  %v7660_v61 = vld [vmem:[#allocation87_spill] sm:$0xff]  ;;  %v7679_v2 = vld [vmem:[#allocation113_spill] sm:$0xff] }
 0x1d6   :  { %v1007_v23 = vmin.f32 %v7644_v44, %v4284_v59  ;;  %2551 = vbcast.lane.b32.xlu1 %v5016_v15, 264  ;;  %3272 = vrcp.f32 %v1827_v52  ;;  %v1766_v28 = vmul.f32 %v1702_v25, %v1702_v25  ;;  %v1643_v36 = vmax.f32 %v7660_v61, %v4284_v59  ;;  %2547 = vbcast.lane.b32.xlu0 %v5016_v15, 256 }
 0x1d7   :  { %v1829_v21 = vadd.f32 1e-07, %v1797_v33  ;;  %v1796_v35 = vadd.f32 %v1764_v55, %v4208_v63  ;;  %v7661_v53 = vmax.f32 %v7549_v32, %v7547_v39  ;;  %v1642_v57 = vmax.f32 %v7662_v14, %v4284_v59  ;;  %v5065_v52 = vpop.permute.xlu1 %1887  ;;  %v7666_v33 = vld [vmem:[#allocation94_spill] sm:$0xff] }
 0x1d8   :  { %7663 = vst [vmem:[#allocation82_spill] sm:$0xff] %v5065_v52  ;;  %v1799_v25 = vadd.f32 %v1767_v62, %v4238_v18  ;;  %v1769_v56 = vmul.f32 %v1705_v48, %v1705_v48  ;;  %v7665_v60 = vmin.f32 %v7664_v27, %v7547_v39  ;;  %v1645_v63 = vmax.f32 %v7666_v33, %v4284_v59  ;;  %v5073_v55 = vpop.permute.xlu0 %1883  ;;  %v7669_v18 = vld [vmem:[#allocation96_spill] sm:$0xff]  ;;  %v7671_v48 = vld [vmem:[#allocation18_spill] sm:$0xff]  ;;  %v7675_v52 = vld [vmem:[#allocation49_spill] sm:$0xff] }
 0x1d9   :  { %v5061_v44 = vsub.f32 %v1004_v37, %v7661_v53  ;;  %7667 = vst [vmem:[#allocation83_spill] sm:$0xff] %v5073_v55  ;;  %3274 = vrcp.f32 %v1826_v9  ;;  %v7668_v32 = vmax.f32 %v7550_v20, %v7547_v39  ;;  %v1006_v53 = vmin.f32 %v7657_v5, %v4284_v59 }
 0x1da   :  { %v1704_v47 = vsub.f32 %v1640_v38, %v7665_v60  ;;  %v1644_v62 = vmax.f32 %v7669_v18, %v4284_v59  ;;  %2559 = vbcast.lane.b32.xlu1 %v5016_v15, 280  ;;  %v5085_v60 = vpop.eup %3266  ;;  %v1798_v38 = vadd.f32 %v1766_v28, %v7671_v48  ;;  %v1009_v9 = vmin.f32 %v7660_v61, %v4284_v59 }
 0x1db   :  { %v5078_v37 = vsub.f32 %v1007_v23, %v7668_v32  ;;  %7670 = vst [vmem:[#allocation85_spill] sm:$0xff] %v5085_v60  ;;  %v7673_v20 = vmin.f32 %v7672_v11, %v7547_v39  ;;  %v7674_v32 = vld [vmem:[#allocation98_spill] sm:$0xff]  ;;  %2555 = vbcast.lane.b32.xlu0 %v5016_v15, 272  ;;  %3276 = vrcp.f32 %v1829_v21  ;;  %v1828_v5 = vadd.f32 1e-07, %v1796_v35  ;;  %v5100_v48 = vpop.permute.xlu1 %1895  ;;  %v5102_v61 = vpop.eup %3268 }
 0x1dc   :  { %v1647_v54 = vmax.f32 %v7674_v32, %v4284_v59  ;;  %v7676_v60 = vmin.f32 %v7675_v52, %v7547_v39  ;;  %7677 = vst [vmem:[#allocation5_spill] sm:$0xff] %v5100_v48  ;;  %7678 = vst [vmem:[#allocation86_spill] sm:$0xff] %v5102_v61  ;;  %v1831_v26 = vadd.f32 1e-07, %v1799_v25  ;;  %v7681_v31 = vmin.f32 %v7680_v4, %v7547_v39  ;;  %v5108_v21 = vpop.permute.xlu0 %1891  ;;  %v7684_v25 = vld [vmem:[#allocation51_spill] sm:$0xff]  ;;  %v7687_v61 = vld [vmem:[#allocation52_spill] sm:$0xff] }
 0x1dd   :  { %v1707_v23 = vsub.f32 %v1643_v36, %v7673_v20  ;;  %v1801_v36 = vadd.f32 %v1769_v56, %v7679_v2  ;;  %v1768_v20 = vmul.f32 %v1704_v47, %v1704_v47  ;;  %7682 = vst [vmem:[#allocation87_spill] sm:$0xff] %v5108_v21  ;;  %v7683_v55 = vmax.f32 %v7664_v27, %v7547_v39 }
 0x1de   :  { %v1706_v28 = vsub.f32 %v1642_v57, %v7676_v60  ;;  %v1709_v40 = vsub.f32 %v1645_v63, %v7681_v31  ;;  %v1008_v60 = vmin.f32 %v7662_v14, %v4284_v59  ;;  %v7685_v2 = vmin.f32 %v7684_v25, %v7547_v39  ;;  %2567 = vbcast.lane.b32.xlu1 %v5016_v15, 296  ;;  %v5131_v14 = vpop.eup %3270 }
 0x1df   :  { %v5114_v57 = vsub.f32 %v1006_v53, %v7683_v55  ;;  %v1830_v56 = vadd.f32 1e-07, %v1798_v38  ;;  %v7686_v31 = vmax.f32 %v7672_v11, %v7547_v39  ;;  %v1771_v35 = vmul.f32 %v1707_v23, %v1707_v23  ;;  %2563 = vbcast.lane.b32.xlu0 %v5016_v15, 288  ;;  %7689 = vst [vmem:[#allocation90_spill] sm:$0xff] %v5131_v14  ;;  %v7690_v38 = vld [vmem:[#allocation100_spill] sm:$0xff]  ;;  %v5137_v11 = vpop.permute.xlu1 %1903 }
 0x1e0   :  { %v1708_v47 = vsub.f32 %v1644_v62, %v7685_v2  ;;  %v7688_v27 = vmin.f32 %v7687_v61, %v7547_v39  ;;  %3278 = vrcp.f32 %v1828_v5  ;;  %v1770_v53 = vmul.f32 %v1706_v28, %v1706_v28  ;;  %7691 = vst [vmem:[#allocation47_spill] sm:$0xff] %v5137_v11  ;;  %v5142_v21 = vpop.permute.xlu0 %1899  ;;  %v7698_v5 = vld [vmem:[#allocation117_spill] sm:$0xff] }
 0x1e1   :  { %v5125_v63 = vsub.f32 %v1009_v9, %v7686_v31  ;;  %v1011_v62 = vmin.f32 %v7666_v33, %v4284_v59  ;;  %v1646_v2 = vmax.f32 %v7690_v38, %v4284_v59  ;;  %v5139_v9 = vpop.eup %3272  ;;  %3280 = vrcp.f32 %v1831_v26  ;;  %v7693_v31 = vld [vmem:[#allocation57_spill] sm:$0xff]  ;;  %7694 = vst [vmem:[#allocation96_spill] sm:$0xff] %v5142_v21  ;;  %v7702_v26 = vld [vmem:[#allocation102_spill] sm:$0xff] }
 0x1e2   :  { %v1711_v55 = vsub.f32 %v1647_v54, %v7688_v27  ;;  %7692 = vst [vmem:[#allocation94_spill] sm:$0xff] %v5139_v9  ;;  %v1833_v23 = vadd.f32 1e-07, %v1801_v36  ;;  %v1800_v54 = vadd.f32 %v1768_v20, %v7693_v31  ;;  %v1773_v27 = vmul.f32 %v1709_v40, %v1709_v40  ;;  %2575 = vbcast.lane.b32.xlu1 %v5016_v15, 312  ;;  %v7696_v36 = vld [vmem:[#allocation115_spill] sm:$0xff] }
 0x1e3   :  { %v7695_v28 = vmax.f32 %v7675_v52, %v7547_v39  ;;  %v1010_v14 = vmin.f32 %v7669_v18, %v4284_v59  ;;  %v1772_v11 = vmul.f32 %v1708_v47, %v1708_v47  ;;  %3282 = vrcp.f32 %v1830_v56  ;;  %2571 = vbcast.lane.b32.xlu0 %v5016_v15, 304  ;;  %v5156_v31 = vpop.eup %3274  ;;  %v7700_v18 = vld [vmem:[#allocation53_spill] sm:$0xff] }
 0x1e4   :  { %v1803_v40 = vadd.f32 %v1771_v35, %v7696_v36  ;;  %v1775_v20 = vmul.f32 %v1711_v55, %v1711_v55  ;;  %7697 = vst [vmem:[#allocation18_spill] sm:$0xff] %v5156_v31  ;;  %v1802_v52 = vadd.f32 %v1770_v53, %v7698_v5  ;;  %v7701_v47 = vmin.f32 %v7700_v18, %v7547_v39  ;;  %v5169_v35 = vpop.permute.xlu1 %1911  ;;  %v7704_v36 = vld [vmem:[#allocation7_spill] sm:$0xff]  ;;  %v5174_v5 = vpop.permute.xlu0 %1907 }
 0x1e5   :  { %v5148_v33 = vsub.f32 %v1008_v60, %v7695_v28  ;;  %v7699_v60 = vmax.f32 %v7680_v4, %v7547_v39  ;;  %v1649_v9 = vmax.f32 %v7702_v26, %v4284_v59  ;;  %7703 = vst [vmem:[#allocation48_spill] sm:$0xff] %v5169_v35  ;;  %3284 = vrcp.f32 %v1833_v23  ;;  %7705 = vst [vmem:[#allocation98_spill] sm:$0xff] %v5174_v5  ;;  %v5176_v4 = vpop.eup %3276 }
 0x1e6   :  { %v1710_v56 = vsub.f32 %v1646_v2, %v7701_v47  ;;  %v1832_v55 = vadd.f32 1e-07, %v1800_v54  ;;  %v1805_v31 = vadd.f32 %v1773_v27, %v7704_v36  ;;  %v1013_v53 = vmin.f32 %v7674_v32, %v4284_v59  ;;  %7706 = vst [vmem:[#allocation49_spill] sm:$0xff] %v5176_v4  ;;  %v7708_v47 = vld [vmem:[#allocation119_spill] sm:$0xff]  ;;  %2583 = vbcast.lane.b32.xlu1 %v5016_v15, 328  ;;  %v7709_v32 = vld [vmem:[#allocation122_spill] sm:$0xff] }
 0x1e7   :  { %v5162_v28 = vsub.f32 %v1011_v62, %v7699_v60  ;;  %v7707_v2 = vmax.f32 %v7684_v25, %v7547_v39  ;;  %v1804_v35 = vadd.f32 %v1772_v11, %v7708_v47  ;;  %v1012_v23 = vmin.f32 %v7690_v38, %v4284_v59  ;;  %v7710_v62 = vld [vmem:[#allocation10_spill] sm:$0xff]  ;;  %2579 = vbcast.lane.b32.xlu0 %v5016_v15, 320 }
 0x1e8   :  { %v1835_v54 = vadd.f32 1e-07, %v1803_v40  ;;  %v1807_v27 = vadd.f32 %v1775_v20, %v7709_v32  ;;  %v1015_v36 = vmin.f32 %v7702_v26, %v4284_v59  ;;  %v1014_v4 = vmin.f32 %v7710_v62, %v4284_v59  ;;  %v5198_v5 = vpop.permute.xlu1 %1922 }
 0x1e9   :  { %v5182_v60 = vsub.f32 %v1010_v14, %v7707_v2  ;;  %v1834_v25 = vadd.f32 1e-07, %v1802_v52  ;;  %v1774_v11 = vmul.f32 %v1710_v56, %v1710_v56  ;;  %v7711_v2 = vld [vmem:[#allocation54_spill] sm:$0xff]  ;;  %7713 = vst [vmem:[#allocation113_spill] sm:$0xff] %v5198_v5  ;;  %3286 = vrcp.f32 %v1832_v55  ;;  %v5207_v52 = vpop.permute.xlu0 %1918 }
 0x1ea   :  { %v7712_v38 = vmin.f32 %v7711_v2, %v7547_v39  ;;  %v1837_v40 = vadd.f32 1e-07, %v1805_v31  ;;  %v7714_v26 = vmax.f32 %v7687_v61, %v7547_v39  ;;  %v1648_v32 = vmax.f32 %v7710_v62, %v4284_v59  ;;  %7715 = vst [vmem:[#allocation50_spill] sm:$0xff] %v5207_v52  ;;  %v5209_v14 = vpop.eup %3278  ;;  %v7718_v31 = vld [vmem:[#allocation106_spill] sm:$0xff]  ;;  %2591 = vbcast.lane.b32.xlu1 %v5016_v15, 344 }
 0x1eb   :  { %7716 = vst [vmem:[#allocation51_spill] sm:$0xff] %v5209_v14  ;;  %v1836_v21 = vadd.f32 1e-07, %v1804_v35  ;;  %v1017_v61 = vmin.f32 %v7718_v31, %v4284_v59  ;;  %3288 = vrcp.f32 %v1835_v54  ;;  %v1839_v62 = vadd.f32 1e-07, %v1807_v27  ;;  %v7722_v35 = vld [vmem:[#allocation55_spill] sm:$0xff] }
 0x1ec   :  { %v1713_v47 = vsub.f32 %v1649_v9, %v7712_v38  ;;  %v5203_v20 = vsub.f32 %v1013_v53, %v7714_v26  ;;  %v7717_v9 = vmax.f32 %v7700_v18, %v7547_v39  ;;  %v5220_v53 = vpop.eup %3280  ;;  %v7720_v38 = vmax.f32 %v7711_v2, %v7547_v39  ;;  %2587 = vbcast.lane.b32.xlu0 %v5016_v15, 336  ;;  %v5236_v27 = vpop.permute.xlu1 %1930  ;;  %v7742_v5 = vld [vmem:[#allocation110_spill] sm:$0xff] }
 0x1ed   :  { %7719 = vst [vmem:[#allocation52_spill] sm:$0xff] %v5220_v53  ;;  %v7723_v56 = vmax.f32 %v7722_v35, %v7547_v39  ;;  %3290 = vrcp.f32 %v1834_v25  ;;  %v1651_v54 = vmax.f32 %v7718_v31, %v4284_v59  ;;  %7726 = vst [vmem:[#allocation115_spill] sm:$0xff] %v5236_v27  ;;  %v5238_v53 = vpop.eup %3282  ;;  %v5246_v52 = vpop.permute.xlu0 %1926  ;;  %v7751_v58 = vmax.f32 %v4693_v13, 0.0 }
 0x1ee   :  { %v5215_v55 = vsub.f32 %v1012_v23, %v7717_v9  ;;  %v5225_v26 = vsub.f32 %v1015_v36, %v7720_v38  ;;  %v7725_v23 = vld [vmem:[#allocation123_spill] sm:$0xff]  ;;  %v1777_v14 = vmul.f32 %v1713_v47, %v1713_v47  ;;  %7727 = vst [vmem:[#allocation117_spill] sm:$0xff] %v5238_v53  ;;  %3292 = vrcp.f32 %v1837_v40  ;;  %7731 = vst [vmem:[#allocation53_spill] sm:$0xff] %v5246_v52  ;;  %v7732_v47 = vld [vmem:[#allocation56_spill] sm:$0xff] }
 0x1ef   :  { %v5230_v18 = vsub.f32 %v1014_v4, %v7723_v56  ;;  %v1806_v9 = vadd.f32 %v1774_v11, %v7725_v23  ;;  %v7728_v4 = vmin.f32 %v7722_v35, %v7547_v39  ;;  %v7729_v56 = vld [vmem:[#allocation15_spill] sm:$0xff]  ;;  %3294 = vrcp.f32 %v1836_v21  ;;  %v7735_v40 = vld [vmem:[#allocation70_spill] sm:$0xff]  ;;  %2599 = vbcast.lane.b32.xlu1 %v5016_v15, 360  ;;  %v5257_v35 = vpop.eup %3284  ;;  %v7737_v21 = vld [vmem:[#allocation73_spill] sm:$0xff] }
 0x1f0   :  { %7721 = vst [vmem:[#allocation100_spill] sm:$0xff] %v5225_v26  ;;  %v7730_v38 = vld [vmem:[#allocation31_spill] sm:$0xff]  ;;  %v7733_v31 = vmax.f32 %v7732_v47, %v7547_v39  ;;  %7736 = vst [vmem:[#allocation7_spill] sm:$0xff] %v5257_v35  ;;  %3296 = vrcp.f32 %v1839_v62  ;;  %2595 = vbcast.lane.b32.xlu0 %v5016_v15, 352  ;;  %v7740_v52 = vld [vmem:[#allocation13_spill] sm:$0xff]  ;;  %v5270_v62 = vpop.permute.xlu1 %1938 }
 0x1f1   :  { %7724 = vst [vmem:[#allocation57_spill] sm:$0xff] %v5230_v18  ;;  %v1712_v2 = vsub.f32 %v1648_v32, %v7728_v4  ;;  %v1367_v25 = vadd.f32 %v7730_v38, %v7729_v56  ;;  %v1366_v36 = vadd.f32 %v7730_v38, %v7735_v40  ;;  %v1650_v56 = vmax.f32 %v7737_v21, %v4284_v59  ;;  %v5277_v48 = vpop.permute.xlu0 %1934  ;;  %v7764_v18 = vld [vmem:[#allocation21_spill] sm:$0xff] }
 0x1f2   :  { %v5252_v23 = vsub.f32 %v1017_v61, %v7733_v31  ;;  %v1838_v11 = vadd.f32 1e-07, %v1806_v9  ;;  %v7738_v61 = vld [vmem:[#allocation126_spill] sm:$0xff]  ;;  %v7739_v40 = vmin.f32 %v7732_v47, %v7547_v39  ;;  %v1653_v35 = vmax.f32 %v7740_v52, %v4284_v59  ;;  %7741 = vst [vmem:[#allocation119_spill] sm:$0xff] %v5270_v62  ;;  %7743 = vst [vmem:[#allocation122_spill] sm:$0xff] %v5277_v48  ;;  %v7744_v47 = vld [vmem:[#allocation112_spill] sm:$0xff] }
 0x1f3   :  { %v1809_v31 = vadd.f32 %v1777_v14, %v7738_v61  ;;  %v1776_v32 = vmul.f32 %v1712_v2, %v1712_v2  ;;  %v1016_v4 = vmin.f32 %v7737_v21, %v4284_v59  ;;  %v1399_v27 = vsub.f32 %v1367_v25, %v4717_v17  ;;  %2607 = vbcast.lane.b32.xlu1 %v5016_v15, 376  ;;  %v5287_v2 = vld [vmem:[%s7093_s2] sm:$0xff]  ;;  %v5294_v21 = vpop.eup %3286 }
 0x1f4   :  { %7734 = vst [vmem:[#allocation102_spill] sm:$0xff] %v5252_v23  ;;  %v1715_v53 = vsub.f32 %v1651_v54, %v7739_v40  ;;  %v1369_v9 = vadd.f32 %v7730_v38, %v7742_v5  ;;  %v1398_v54 = vsub.f32 %v1366_v36, %v4726_v43  ;;  %v1368_v61 = vadd.f32 %v7730_v38, %v7744_v47  ;;  %v7747_v40 = vld [vmem:[#allocation58_spill] sm:$0xff]  ;;  %v7749_v48 = vld [vmem:[#allocation89_spill] sm:$0xff]  ;;  %v7756_v47 = vld [vmem:[#allocation91_spill] sm:$0xff] }
 0x1f5   :  { %v7745_v25 = vsub.s32 5, %v7648_v8  ;;  %7746 = vst [vmem:[#allocation10_spill] sm:$0xff] %v5294_v21  ;;  %v7748_v36 = vmin.f32 %v7747_v40, %v7547_v39  ;;  %v7750_v62 = vmax.f32 %v7749_v48, 0.0  ;;  %v1371_v41 = vadd.f32 %v7730_v38, %v7752_v34  ;;  %2603 = vbcast.lane.b32.xlu0 %v5016_v15, 368  ;;  %v7753_v21 = vld [vmem:[#allocation59_spill] sm:$0xff]  ;;  %v5334_v26 = vpop.permute.xlu0 %1942 }
 0x1f6   :  { %v7754_v0 = vmin.f32 %v7753_v21, %v7547_v39  ;;  %v7757_v49 = vmax.f32 %v7756_v47, 0.0  ;;  %v7758_v48 = vmax.f32 %v4704_v24, 0.0  ;;  %v1431_v34 = vadd.f32 1e-07, %v1399_v27  ;;  %7765 = vst [vmem:[#allocation55_spill] sm:$0xff] %v5334_v26 }
 0x1f7   :  { %v5292_v5 = vrot.slane %v5287_v2, %v7745_v25  ;;  %v1714_v14 = vsub.f32 %v1650_v56, %v7748_v36  ;;  %v5305_v42 = vmul.f32 %v7751_v58, %v7750_v62  ;;  %v1779_v25 = vmul.f32 %v1715_v53, %v1715_v53  ;;  %v7755_v56 = vld [vmem:[#allocation14_spill] sm:$0xff]  ;;  %v5321_v58 = vpop.permute.xlu1 %1946  ;;  %v5323_v62 = vpop.eup %3288  ;;  %v7761_v53 = vld [vmem:[#allocation92_spill] sm:$0xff] }
 0x1f8   :  { %v1717_v23 = vsub.f32 %v1653_v35, %v7754_v0  ;;  %v1652_v36 = vmax.f32 %v7755_v56, %v4284_v59  ;;  %v5319_v13 = vmul.f32 %v7758_v48, %v7757_v49  ;;  %7759 = vst [vmem:[#allocation54_spill] sm:$0xff] %v5321_v58  ;;  %7760 = vst [vmem:[#allocation106_spill] sm:$0xff] %v5323_v62  ;;  %v7762_v29 = vmax.f32 %v7761_v53, 0.0  ;;  %v5336_v24 = vpop.eup %3290  ;;  %v7768_v53 = vld [vmem:[#allocation127_spill] sm:$0xff]  ;;  %v7769_v62 = vld [vmem:[#allocation93_spill] sm:$0xff] }
 0x1f9   :  { %v1401_v15 = vsub.f32 %v1369_v9, %v5305_v42  ;;  %v7763_v0 = vmax.f32 %v4748_v45, 0.0  ;;  %v1370_v47 = vadd.f32 %v7730_v38, %v7764_v18  ;;  %7766 = vst [vmem:[#allocation123_spill] sm:$0xff] %v5336_v24  ;;  %3298 = vrcp.f32 %v1838_v11  ;;  %2618 = vbcast.lane.b32.xlu1 %v5292_v5, 264  ;;  %v5340_v9 = vpop.eup %3292  ;;  %2614 = vbcast.lane.b32.xlu0 %v5292_v5, 256 }
 0x1fa   :  { %v1841_v49 = vadd.f32 1e-07, %v1809_v31  ;;  %v1430_v48 = vadd.f32 1e-07, %v1398_v54  ;;  %v1400_v27 = vsub.f32 %v1368_v61, %v5319_v13  ;;  %7767 = vst [vmem:[#allocation15_spill] sm:$0xff] %v5340_v9  ;;  %v1808_v45 = vadd.f32 %v1776_v32, %v7768_v53  ;;  %v5351_v11 = vpop.eup %3294  ;;  %v7773_v31 = vld [vmem:[#allocation129_spill] sm:$0xff] }
 0x1fb   :  { %v5330_v35 = vmul.f32 %v7763_v0, %v7762_v29  ;;  %v1778_v29 = vmul.f32 %v1714_v14, %v1714_v14  ;;  %v7770_v18 = vmax.f32 %v7769_v62, 0.0  ;;  %v7771_v26 = vmax.f32 %v4784_v10, 0.0  ;;  %7772 = vst [vmem:[#allocation31_spill] sm:$0xff] %v5351_v11  ;;  %v7775_v32 = vld [vmem:[#allocation60_spill] sm:$0xff]  ;;  %v7777_v62 = vld [vmem:[#allocation22_spill] sm:$0xff]  ;;  %v5366_v53 = vpop.eup %3296 }
 0x1fc   :  { %v1811_v54 = vadd.f32 %v1779_v25, %v7773_v31  ;;  %v7774_v61 = vmax.f32 %v7747_v40, %v7547_v39  ;;  %v1373_v10 = vadd.f32 %v7730_v38, %v7777_v62  ;;  %7779 = vst [vmem:[#allocation70_spill] sm:$0xff] %v5366_v53  ;;  %3300 = vrcp.f32 %v1431_v34  ;;  %v5369_v31 = vpop.permute.xlu0 %1950  ;;  %v7781_v40 = vld [vmem:[#allocation95_spill] sm:$0xff]  ;;  %v7785_v34 = vld [vmem:[#allocation130_spill] sm:$0xff] }
 0x1fd   :  { %v1403_v0 = vsub.f32 %v1371_v41, %v5330_v35  ;;  %v5348_v58 = vmul.f32 %v7771_v26, %v7770_v18  ;;  %v7776_v41 = vmin.f32 %v7775_v32, %v7547_v39  ;;  %v5364_v26 = vpop.permute.xlu1 %1954  ;;  %v1781_v18 = vmul.f32 %v1717_v23, %v1717_v23  ;;  %7780 = vst [vmem:[#allocation73_spill] sm:$0xff] %v5369_v31  ;;  %v7784_v62 = vld [vmem:[#allocation23_spill] sm:$0xff] }
 0x1fe   :  { %v5357_v9 = vsub.f32 %v1016_v4, %v7774_v61  ;;  %7778 = vst [vmem:[#allocation56_spill] sm:$0xff] %v5364_v26  ;;  %v1433_v11 = vadd.f32 1e-07, %v1401_v15  ;;  %3302 = vrcp.f32 %v1430_v48  ;;  %v1432_v4 = vadd.f32 1e-07, %v1400_v27  ;;  %2626 = vbcast.lane.b32.xlu1 %v5292_v5, 280 }
 0x1ff   :  { %v1716_v14 = vsub.f32 %v1652_v36, %v7776_v41  ;;  %v1402_v25 = vsub.f32 %v1370_v47, %v5348_v58  ;;  %v7782_v61 = vmax.f32 %v7781_v40, 0.0  ;;  %v7783_v36 = vmax.f32 %v4793_v19, 0.0  ;;  %2622 = vbcast.lane.b32.xlu0 %v5292_v5, 272  ;;  %v7786_v40 = vld [vmem:[#allocation97_spill] sm:$0xff] }
 0x200   :  { %v1372_v24 = vadd.f32 %v7730_v38, %v7784_v62  ;;  %3304 = vrcp.f32 %v1841_v49  ;;  %v1840_v23 = vadd.f32 1e-07, %v1808_v45  ;;  %v1810_v15 = vadd.f32 %v1778_v29, %v7785_v34  ;;  %v7790_v49 = vld [vmem:[#allocation74_spill] sm:$0xff]  ;;  %v5396_v31 = vpop.permute.xlu0 %1958 }
 0x201   :  { %v5375_v41 = vmul.f32 %v7783_v36, %v7782_v61  ;;  %v1435_v47 = vadd.f32 1e-07, %v1403_v0  ;;  %v1018_v48 = vmin.f32 %v7755_v56, %v4284_v59  ;;  %v1780_v27 = vmul.f32 %v1716_v14, %v1716_v14  ;;  %v5391_v53 = vpop.permute.xlu1 %1962  ;;  %v7791_v0 = vld [vmem:[#allocation27_spill] sm:$0xff]  ;;  %7792 = vst [vmem:[#allocation13_spill] sm:$0xff] %v5396_v31 }
 0x202   :  { %v7787_v61 = vmax.f32 %v7786_v40, 0.0  ;;  %v7788_v36 = vmax.f32 %v4806_v12, 0.0  ;;  %7789 = vst [vmem:[#allocation126_spill] sm:$0xff] %v5391_v53  ;;  %v1813_v45 = vadd.f32 %v1781_v18, %v7790_v49  ;;  %3306 = vrcp.f32 %v1433_v11  ;;  %2634 = vbcast.lane.b32.xlu1 %v5292_v5, 296 }
 0x203   :  { %v1405_v19 = vsub.f32 %v1373_v10, %v5375_v41  ;;  %v1434_v29 = vadd.f32 1e-07, %v1402_v25  ;;  %v1375_v34 = vadd.f32 %v7730_v38, %v7791_v0  ;;  %v1843_v56 = vadd.f32 1e-07, %v1811_v54  ;;  %v7793_v10 = vld [vmem:[#allocation121_spill] sm:$0xff]  ;;  %2630 = vbcast.lane.b32.xlu0 %v5292_v5, 288  ;;  %v5411_v54 = vpop.eup %3298 }
 0x204   :  { %v5389_v62 = vmul.f32 %v7788_v36, %v7787_v61  ;;  %3308 = vrcp.f32 %v1432_v4  ;;  %v1374_v12 = vadd.f32 %v7730_v38, %v7793_v10  ;;  %v1842_v40 = vadd.f32 1e-07, %v1810_v15  ;;  %v7794_v61 = vld [vmem:[#allocation99_spill] sm:$0xff]  ;;  %v7797_v36 = vld [vmem:[#allocation128_spill] sm:$0xff]  ;;  %7798 = vst [vmem:[#allocation110_spill] sm:$0xff] %v5411_v54  ;;  %v7800_v10 = vld [vmem:[#allocation101_spill] sm:$0xff] }
 0x205   :  { %3310 = vrcp.f32 %v1435_v47  ;;  %v7795_v18 = vmax.f32 %v7794_v61, 0.0  ;;  %v7796_v11 = vmax.f32 %v4855_v46, 0.0  ;;  %v1377_v49 = vadd.f32 %v7730_v38, %v7797_v36  ;;  %v5420_v46 = vpop.permute.xlu1 %1970  ;;  %v7804_v36 = vld [vmem:[#allocation103_spill] sm:$0xff] }
 0x206   :  { %v1404_v14 = vsub.f32 %v1372_v24, %v5389_v62  ;;  %3312 = vrcp.f32 %v1840_v23  ;;  %v7799_v24 = vld [vmem:[#allocation28_spill] sm:$0xff]  ;;  %v1437_v0 = vadd.f32 1e-07, %v1405_v19  ;;  %v7801_v15 = vmax.f32 %v7800_v10, 0.0  ;;  %7803 = vst [vmem:[#allocation112_spill] sm:$0xff] %v5420_v46  ;;  %2642 = vbcast.lane.b32.xlu1 %v5292_v5, 312 }
 0x207   :  { %v5406_v25 = vmul.f32 %v7796_v11, %v7795_v18  ;;  %v1812_v4 = vadd.f32 %v1780_v27, %v7799_v24  ;;  %v7802_v47 = vmax.f32 %v4867_v51, 0.0  ;;  %v1845_v18 = vadd.f32 1e-07, %v1813_v45  ;;  %v5429_v27 = vpop.permute.xlu0 %1966  ;;  %v7808_v24 = vld [vmem:[#allocation131_spill] sm:$0xff]  ;;  %v3301_v45 = vpop.eup %3300  ;;  %2638 = vbcast.lane.b32.xlu0 %v5292_v5, 304 }
 0x208   :  { %3314 = vrcp.f32 %v1434_v29  ;;  %v7805_v31 = vmax.f32 %v7804_v36, 0.0  ;;  %v7806_v54 = vmax.f32 %v4892_v50, 0.0  ;;  %7807 = vst [vmem:[#allocation58_spill] sm:$0xff] %v5429_v27  ;;  %v1436_v19 = vadd.f32 1e-07, %v1404_v14 }
 0x209   :  { %v5418_v61 = vmul.f32 %v7802_v47, %v7801_v15  ;;  %v1407_v11 = vsub.f32 %v1375_v34, %v5406_v25  ;;  %3316 = vrcp.f32 %v1843_v56  ;;  %v1376_v10 = vadd.f32 %v7730_v38, %v7808_v24  ;;  %v7811_v56 = vld [vmem:[#allocation29_spill] sm:$0xff] }
 0x20a   :  { %v5427_v23 = vmul.f32 %v7806_v54, %v7805_v31  ;;  %3318 = vrcp.f32 %v1842_v40  ;;  %v7809_v29 = vmax.f32 %v7753_v21, %v7547_v39  ;;  %v7810_v50 = vmin.f32 %v7740_v52, %v4284_v59  ;;  %v7813_v21 = vld [vmem:[#allocation104_spill] sm:$0xff]  ;;  %2650 = vbcast.lane.b32.xlu1 %v5292_v5, 328 }
 0x20b   :  { %v1406_v51 = vsub.f32 %v1374_v12, %v5418_v61  ;;  %v1379_v14 = vadd.f32 %v7730_v38, %v7811_v56  ;;  %v3303_v12 = vpop.eup %3302  ;;  %v7812_v54 = vmax.f32 %v7775_v32, %v7547_v39  ;;  %v1844_v15 = vadd.f32 1e-07, %v1812_v4  ;;  %2646 = vbcast.lane.b32.xlu0 %v5292_v5, 320 }
 0x20c   :  { %v5441_v31 = vsub.f32 %v7810_v50, %v7809_v29  ;;  %v1409_v34 = vsub.f32 %v1377_v49, %v5427_v23  ;;  %3320 = vrcp.f32 %v1437_v0  ;;  %v7814_v47 = vmax.f32 %v7813_v21, 0.0  ;;  %v5458_v49 = vpop.permute.xlu1 %1978  ;;  %v5460_v36 = vpop.eup %3304  ;;  %v7817_v29 = vld [vmem:[#allocation11_spill] sm:$0xff] }
 0x20d   :  { %v5450_v40 = vsub.f32 %v1018_v48, %v7812_v54  ;;  %v7815_v59 = vmax.f32 %v4928_v7, 0.0  ;;  %7816 = vst [vmem:[#allocation89_spill] sm:$0xff] %v5460_v36  ;;  %3322 = vrcp.f32 %v1845_v18  ;;  %v1439_v24 = vadd.f32 1e-07, %v1407_v11  ;;  %v7820_v48 = vld [vmem:[#allocation30_spill] sm:$0xff]  ;;  %v5470_v0 = vpop.permute.xlu0 %1974  ;;  %v3307_v18 = vpop.eup %3306 }
 0x20e   :  { %v7818_v50 = vmax.f32 %v7817_v29, 0.0  ;;  %v7819_v39 = vmax.f32 %v4945_v30, 0.0  ;;  %v1378_v4 = vadd.f32 %v7730_v38, %v7820_v48  ;;  %v5473_v7 = vmul.f32 %v3301_v45, %v4717_v17  ;;  %v3309_v17 = vpop.eup %3308  ;;  %v7829_v48 = vld [vmem:[#allocation32_spill] sm:$0xff]  ;;  %2658 = vbcast.lane.b32.xlu1 %v5292_v5, 344 }
 0x20f   :  { %v5456_v52 = vmul.f32 %v7815_v59, %v7814_v47  ;;  %3324 = vrcp.f32 %v1436_v19  ;;  %v1438_v56 = vadd.f32 1e-07, %v1406_v51  ;;  %v5478_v11 = vmul.f32 %v3303_v12, %v4726_v43  ;;  %v7823_v47 = vld [vmem:[#allocation105_spill] sm:$0xff]  ;;  %v3311_v45 = vpop.eup %3310  ;;  %2654 = vbcast.lane.b32.xlu0 %v5292_v5, 336  ;;  %v7842_v19 = vld [vmem:[#allocation108_spill] sm:$0xff] }
 0x210   :  { %v5466_v32 = vmul.f32 %v7819_v39, %v7818_v50  ;;  %7821 = vst [vmem:[#allocation116_spill] sm:$0xff] %v5473_v7  ;;  %v1441_v30 = vadd.f32 1e-07, %v1409_v34  ;;  %v7824_v59 = vmax.f32 %v7823_v47, 0.0  ;;  %v7825_v29 = vmax.f32 %v4985_v16, 0.0  ;;  %v5491_v43 = vpop.permute.xlu1 %2053  ;;  %v7875_v7 = vld [vmem:[#allocation114_spill] sm:$0xff] }
 0x211   :  { %v1408_v54 = vsub.f32 %v1376_v10, %v5456_v52  ;;  %7822 = vst [vmem:[#allocation59_spill] sm:$0xff] %v5478_v11  ;;  %3326 = vrcp.f32 %v1844_v15  ;;  %v7828_v12 = vmax.f32 %v4995_v6, 0.0  ;;  %v1381_v47 = vadd.f32 %v7730_v38, %v7829_v48 }
 0x212   :  { %v1411_v21 = vsub.f32 %v1379_v14, %v5466_v32  ;;  %v5485_v50 = vmul.f32 %v7825_v29, %v7824_v59  ;;  %3328 = vrcp.f32 %v1439_v24  ;;  %v7826_v14 = vld [vmem:[#allocation107_spill] sm:$0xff]  ;;  %v5502_v59 = vpop.permute.xlu0 %2049  ;;  %v5504_v29 = vpop.eup %3312  ;;  %v7831_v24 = vld [vmem:[#allocation12_spill] sm:$0xff]  ;;  %2666 = vbcast.lane.b32.xlu1 %v5292_v5, 360  ;;  %v7876_v27 = vmax.f32 %v7875_v7, 0.0 }
 0x213   :  { %v7827_v16 = vmax.f32 %v7826_v14, 0.0  ;;  %7830 = vst [vmem:[#allocation14_spill] sm:$0xff] %v5504_v29  ;;  %3330 = vrcp.f32 %v1438_v56  ;;  %v1440_v10 = vadd.f32 1e-07, %v1408_v54  ;;  %v7832_v51 = vmax.f32 %v7831_v24, 0.0  ;;  %v3315_v6 = vpop.eup %3314  ;;  %2662 = vbcast.lane.b32.xlu0 %v5292_v5, 352 }
 0x214   :  { %v1410_v34 = vsub.f32 %v1378_v4, %v5485_v50  ;;  %v7833_v4 = vmax.f32 %v5010_v22, 0.0  ;;  %3332 = vrcp.f32 %v1441_v30  ;;  %v1443_v48 = vadd.f32 1e-07, %v1411_v21  ;;  %v5519_v56 = vpop.eup %3316 }
 0x215   :  { %v5498_v39 = vmul.f32 %v7828_v12, %v7827_v16  ;;  %v5516_v12 = vmul.f32 %v3307_v18, %v5305_v42  ;;  %7835 = vst [vmem:[#allocation92_spill] sm:$0xff] %v5519_v56  ;;  %v5522_v54 = vmul.f32 %v3309_v17, %v5319_v13  ;;  %v5525_v22 = vmul.f32 %v3311_v45, %v5330_v35  ;;  %v7840_v16 = vld [vmem:[#allocation39_spill] sm:$0xff]  ;;  %v5531_v42 = vpop.permute.xlu1 %2061  ;;  %v5533_v18 = vpop.eup %3318  ;;  %v7845_v35 = vld [vmem:[#allocation109_spill] sm:$0xff] }
 0x216   :  { %v5511_v14 = vmul.f32 %v7833_v4, %v7832_v51  ;;  %v7838_v51 = vld [vmem:[#allocation33_spill] sm:$0xff]  ;;  %v7839_v4 = vld [vmem:[#allocation34_spill] sm:$0xff]  ;;  %7841 = vst [vmem:[#allocation93_spill] sm:$0xff] %v5533_v18  ;;  %v1442_v30 = vadd.f32 1e-07, %v1410_v34  ;;  %v7843_v56 = vmax.f32 %v7842_v19, 0.0  ;;  %v3321_v29 = vpop.eup %3320  ;;  %v5551_v18 = vmul.f32 %v3315_v6, %v5348_v58 }
 0x217   :  { %7834 = vst [vmem:[#allocation91_spill] sm:$0xff] %v5516_v12  ;;  %7836 = vst [vmem:[#allocation21_spill] sm:$0xff] %v5522_v54  ;;  %v1380_v24 = vadd.f32 %v7730_v38, %v7838_v51  ;;  %v1383_v15 = vadd.f32 %v7840_v16, %v7839_v4  ;;  %v1413_v21 = vsub.f32 %v1381_v47, %v5498_v39  ;;  %v7844_v13 = vmax.f32 %v5023_v1, 0.0  ;;  %v5548_v4 = vpop.permute.xlu0 %2057  ;;  %v7849_v34 = vld [vmem:[#allocation35_spill] sm:$0xff]  ;;  %v5557_v47 = vpop.eup %3322  ;;  %v7854_v58 = vld [vmem:[#allocation36_spill] sm:$0xff] }
 0x218   :  { %7837 = vst [vmem:[#allocation127_spill] sm:$0xff] %v5525_v22  ;;  %v7846_v45 = vmax.f32 %v7845_v35, 0.0  ;;  %v7847_v38 = vmax.f32 %v5061_v44, 0.0  ;;  %7848 = vst [vmem:[#allocation129_spill] sm:$0xff] %v5551_v18  ;;  %3334 = vrcp.f32 %v1440_v10  ;;  %v1382_v19 = vadd.f32 %v7840_v16, %v7849_v34  ;;  %2674 = vbcast.lane.b32.xlu1 %v5292_v5, 376  ;;  %2670 = vbcast.lane.b32.xlu0 %v5292_v5, 368 }
 0x219   :  { %v5540_v17 = vmul.f32 %v7844_v13, %v7843_v56  ;;  %v2807_v1 = vsub.s32 6, %v7648_v8  ;;  %7850 = vst [vmem:[#allocation60_spill] sm:$0xff] %v5557_v47  ;;  %3336 = vrcp.f32 %v1443_v48  ;;  %v7851_v56 = vld [vmem:[#allocation16_spill] sm:$0xff]  ;;  %v7853_v35 = vmax.f32 %v5078_v37, 0.0  ;;  %v3325_v6 = vpop.eup %3324  ;;  %v5573_v44 = vpop.permute.xlu1 %2069  ;;  %v7865_v12 = vld [vmem:[#allocation19_spill] sm:$0xff] }
 0x21a   :  { %v5546_v51 = vmul.f32 %v7847_v38, %v7846_v45  ;;  %v7852_v13 = vmax.f32 %v7851_v56, 0.0  ;;  %v1385_v10 = vadd.f32 %v7840_v16, %v7854_v58  ;;  %v1412_v47 = vsub.f32 %v1380_v24, %v5511_v14  ;;  %v7859_v38 = vld [vmem:[#allocation38_spill] sm:$0xff] }
 0x21b   :  { %v1415_v48 = vsub.f32 %v1383_v15, %v5540_v17  ;;  %v5576_v37 = vmul.f32 %v3321_v29, %v5375_v41  ;;  %3338 = vrcp.f32 %v1442_v30  ;;  %v1445_v56 = vadd.f32 1e-07, %v1413_v21  ;;  %v5580_v58 = vpop.permute.xlu0 %2065  ;;  %v5582_v36 = vpop.eup %3326 }
 0x21c   :  { %v5564_v45 = vmul.f32 %v7853_v35, %v7852_v13  ;;  %v7856_v13 = vld [vmem:[#allocation37_spill] sm:$0xff]  ;;  %7857 = vst [vmem:[#allocation95_spill] sm:$0xff] %v5580_v58  ;;  %7858 = vst [vmem:[#allocation23_spill] sm:$0xff] %v5582_v36  ;;  %v1414_v24 = vsub.f32 %v1382_v19, %v5546_v51  ;;  %v1387_v15 = vadd.f32 %v7840_v16, %v7859_v38  ;;  %v3329_v29 = vpop.eup %3328  ;;  %v7863_v34 = vmax.f32 %v5114_v57, 0.0  ;;  %v7864_v19 = vld [vmem:[#allocation40_spill] sm:$0xff] }
 0x21d   :  { %7855 = vst [vmem:[#allocation22_spill] sm:$0xff] %v5576_v37  ;;  %v1384_v35 = vadd.f32 %v7840_v16, %v7856_v13  ;;  %v5590_v41 = vrot.slane %v5287_v2, %v2807_v1  ;;  %v5593_v30 = vmul.f32 %v3325_v6, %v5389_v62  ;;  %v7861_v13 = vld [vmem:[#allocation17_spill] sm:$0xff]  ;;  %v1386_v38 = vadd.f32 %v7840_v16, %v7864_v19  ;;  %v5605_v22 = vpop.eup %3330  ;;  %v7870_v19 = vld [vmem:[#allocation111_spill] sm:$0xff] }
 0x21e   :  { %v1417_v21 = vsub.f32 %v1385_v10, %v5564_v45  ;;  %v7862_v36 = vmax.f32 %v7861_v13, 0.0  ;;  %v1444_v1 = vadd.f32 1e-07, %v1412_v47  ;;  %v1447_v54 = vadd.f32 1e-07, %v1415_v48  ;;  %v7868_v13 = vld [vmem:[#allocation41_spill] sm:$0xff] }
 0x21f   :  { %7860 = vst [vmem:[#allocation130_spill] sm:$0xff] %v5593_v30  ;;  %v7866_v62 = vmax.f32 %v7865_v12, 0.0  ;;  %v7867_v6 = vmax.f32 %v5125_v63, 0.0  ;;  %v1389_v57 = vadd.f32 %v7840_v16, %v7868_v13  ;;  %3340 = vrcp.f32 %v1445_v56  ;;  %v7873_v12 = vld [vmem:[#allocation42_spill] sm:$0xff]  ;;  %2814 = vbcast.lane.b32.xlu1 %v5590_v41, 264  ;;  %2810 = vbcast.lane.b32.xlu0 %v5590_v41, 256 }
 0x220   :  { %v5600_v18 = vmul.f32 %v7863_v34, %v7862_v36  ;;  %v5615_v36 = vpop.permute.xlu1 %2077  ;;  %v5617_v34 = vpop.eup %3332  ;;  %v7871_v11 = vmax.f32 %v7870_v19, 0.0  ;;  %v7872_v47 = vmax.f32 %v5148_v33, 0.0  ;;  %v1388_v63 = vadd.f32 %v7840_v16, %v7873_v12 }
 0x221   :  { %v5611_v10 = vmul.f32 %v7867_v6, %v7866_v62  ;;  %7869 = vst [vmem:[#allocation97_spill] sm:$0xff] %v5615_v36  ;;  %v5628_v62 = vpop.permute.xlu0 %2073  ;;  %v1446_v6 = vadd.f32 1e-07, %v1414_v24  ;;  %v7877_v56 = vmax.f32 %v5162_v28, 0.0  ;;  %v1449_v33 = vadd.f32 1e-07, %v1417_v21 }
 0x222   :  { %v1416_v5 = vsub.f32 %v1384_v35, %v5600_v18  ;;  %v5624_v48 = vmul.f32 %v7872_v47, %v7871_v11  ;;  %7874 = vst [vmem:[#allocation74_spill] sm:$0xff] %v5628_v62  ;;  %v7878_v35 = vld [vmem:[#allocation43_spill] sm:$0xff]  ;;  %v7879_v47 = vld [vmem:[#allocation20_spill] sm:$0xff]  ;;  %v7881_v24 = vmax.f32 %v5182_v60, 0.0  ;;  %v1390_v7 = vadd.f32 %v7840_v16, %v4742_v3  ;;  %v3335_v28 = vpop.eup %3334  ;;  %v7883_v21 = vld [vmem:[#allocation118_spill] sm:$0xff] }
 0x223   :  { %v1419_v13 = vsub.f32 %v1387_v15, %v5611_v10  ;;  %v5635_v46 = vmul.f32 %v7877_v56, %v7876_v27  ;;  %v1391_v19 = vadd.f32 %v7840_v16, %v7878_v35  ;;  %v7880_v12 = vmax.f32 %v7879_v47, 0.0  ;;  %v3337_v47 = vpop.eup %3336  ;;  %2822 = vbcast.lane.b32.xlu1 %v5590_v41, 280  ;;  %2818 = vbcast.lane.b32.xlu0 %v5590_v41, 272 }
 0x224   :  { %v1418_v11 = vsub.f32 %v1386_v38, %v5624_v48  ;;  %v5651_v27 = vmul.f32 %v3329_v29, %v5406_v25  ;;  %3342 = vrcp.f32 %v1447_v54  ;;  %v7884_v38 = vmax.f32 %v7883_v21, 0.0  ;;  %v5660_v60 = vpop.permute.xlu1 %2085  ;;  %v7890_v54 = vld [vmem:[#allocation79_spill] sm:$0xff] }
 0x225   :  { %v5645_v53 = vmul.f32 %v7881_v24, %v7880_v12  ;;  %v1421_v15 = vsub.f32 %v1389_v57, %v5635_v46  ;;  %v7885_v56 = vmax.f32 %v5203_v20, 0.0  ;;  %7886 = vst [vmem:[#allocation121_spill] sm:$0xff] %v5660_v60  ;;  %v1448_v12 = vadd.f32 1e-07, %v1416_v5  ;;  %v7887_v24 = vld [vmem:[#allocation24_spill] sm:$0xff]  ;;  %v5671_v21 = vpop.permute.xlu0 %2081 }
 0x226   :  { %7882 = vst [vmem:[#allocation27_spill] sm:$0xff] %v5651_v27  ;;  %v7888_v26 = vmax.f32 %v7887_v24, 0.0  ;;  %v7889_v25 = vmax.f32 %v5215_v55, 0.0  ;;  %v1393_v57 = vadd.f32 %v7840_v16, %v7890_v54  ;;  %7891 = vst [vmem:[#allocation99_spill] sm:$0xff] %v5671_v21  ;;  %3344 = vrcp.f32 %v1446_v6  ;;  %v7895_v60 = vld [vmem:[#allocation100_spill] sm:$0xff] }
 0x227   :  { %v5658_v35 = vmul.f32 %v7885_v56, %v7884_v38  ;;  %v1420_v3 = vsub.f32 %v1388_v63, %v5645_v53  ;;  %v1451_v20 = vadd.f32 1e-07, %v1419_v13  ;;  %v7892_v56 = vld [vmem:[#allocation44_spill] sm:$0xff]  ;;  %v3339_v63 = vpop.eup %3338  ;;  %3346 = vrcp.f32 %v1449_v33  ;;  %v7897_v13 = vld [vmem:[#allocation26_spill] sm:$0xff]  ;;  %v7901_v33 = vld [vmem:[#allocation45_spill] sm:$0xff]  ;;  %2830 = vbcast.lane.b32.xlu1 %v5590_v41, 296 }
 0x228   :  { %v5667_v29 = vmul.f32 %v7889_v25, %v7888_v26  ;;  %v1392_v5 = vadd.f32 %v7840_v16, %v7892_v56  ;;  %v1450_v24 = vadd.f32 1e-07, %v1418_v11  ;;  %v7893_v26 = vld [vmem:[#allocation25_spill] sm:$0xff]  ;;  %v7896_v54 = vmax.f32 %v7895_v60, 0.0  ;;  %2826 = vbcast.lane.b32.xlu0 %v5590_v41, 288 }
 0x229   :  { %v1423_v38 = vsub.f32 %v1391_v19, %v5658_v35  ;;  %v7894_v25 = vmax.f32 %v7893_v26, 0.0  ;;  %3348 = vrcp.f32 %v1444_v1  ;;  %v1453_v6 = vadd.f32 1e-07, %v1421_v15  ;;  %v7899_v56 = vld [vmem:[#allocation57_spill] sm:$0xff]  ;;  %v5698_v1 = vpop.permute.xlu0 %2089 }
 0x22a   :  { %v1422_v55 = vsub.f32 %v1390_v7, %v5667_v29  ;;  %v7898_v19 = vmax.f32 %v7897_v13, 0.0  ;;  %v7900_v21 = vmax.f32 %v7899_v56, 0.0  ;;  %v1395_v11 = vadd.f32 %v7840_v16, %v7901_v33  ;;  %v5693_v7 = vpop.permute.xlu1 %2093  ;;  %v7906_v56 = vld [vmem:[#allocation102_spill] sm:$0xff] }
 0x22b   :  { %v5682_v62 = vmul.f32 %v7896_v54, %v7894_v25  ;;  %7902 = vst [vmem:[#allocation128_spill] sm:$0xff] %v5693_v7  ;;  %3350 = vrcp.f32 %v1448_v12  ;;  %v1452_v26 = vadd.f32 1e-07, %v1420_v3  ;;  %v7903_v25 = vld [vmem:[#allocation46_spill] sm:$0xff]  ;;  %v1455_v15 = vadd.f32 1e-07, %v1423_v38  ;;  %v3341_v12 = vpop.eup %3340 }
 0x22c   :  { %v5689_v36 = vmul.f32 %v7900_v21, %v7898_v19  ;;  %v1394_v54 = vadd.f32 %v7840_v16, %v7903_v25  ;;  %3352 = vrcp.f32 %v1451_v20  ;;  %v7904_v21 = vld [vmem:[#allocation9_spill] sm:$0xff]  ;;  %v7907_v58 = vmax.f32 %v7906_v56, 0.0  ;;  %v7908_v25 = vld [vmem:[#allocation120_spill] sm:$0xff]  ;;  %2838 = vbcast.lane.b32.xlu1 %v5590_v41, 312  ;;  %2834 = vbcast.lane.b32.xlu0 %v5590_v41, 304 }
 0x22d   :  { %v1425_v60 = vsub.f32 %v1393_v57, %v5682_v62  ;;  %v7905_v19 = vmax.f32 %v7904_v21, 0.0  ;;  %3354 = vrcp.f32 %v1450_v24  ;;  %v1454_v57 = vadd.f32 1e-07, %v1422_v55  ;;  %v5724_v24 = vld [vmem:[%s7094_s3] sm:$0xff]  ;;  %v7912_v55 = vld [vmem:[#allocation63_spill] sm:$0xff]  ;;  %s3404_s3 = smov [#allocation2]  }
 0x22e   :  { %v1424_v13 = vsub.f32 %v1392_v5, %v5689_v36  ;;  %v7909_v7 = vmax.f32 %v7908_v25, 0.0  ;;  %v7910_v20 = vmax.f32 %v5357_v9, 0.0  ;;  %v5718_v5 = vmul.f32 %v5605_v22, %v5418_v61  ;;  %v5728_v9 = vpop.permute.xlu1 %2101  ;;  %v7913_v56 = vld [vmem:[#allocation61_spill] sm:$0xff]  ;;  %v5733_v22 = vpop.permute.xlu0 %2097  ;;  %s3164_s5 = sshll.u32 %s3404_s3, 4  ;;  %s3165_s5 = int_to_ptr.vmem [resolvable:$true] %s3164_s5 }
 0x22f   :  { %v5705_v33 = vmul.f32 %v7907_v58, %v7905_v19  ;;  %3356 = vrcp.f32 %v1453_v6  ;;  %v1986_v21 = vrot.slane %v5724_v24, %v7912_v55  ;;  %v1397_v61 = vadd.f32 %v7840_v16, %v7913_v56  ;;  %v3343_v6 = vpop.eup %3342  ;;  %s3379_s6 = scalar_lea.vmem %s3165_s5, 4096  ;;  %p3384_p1 = scmp.lt.s32.totalorder %s3165_s5, %s3165_s5 }
 0x230   :  { %v5713_v38 = vmul.f32 %v7910_v20, %v7909_v7  ;;  %7911 = vst [vmem:[#allocation28_spill] sm:$0xff] %v5718_v5  ;;  %3358 = vrcp.f32 %v1452_v26  ;;  %v1457_v7 = vadd.f32 1e-07, %v1425_v60  ;;  %v1456_v25 = vadd.f32 1e-07, %v1424_v13  ;;  %v7914_v20 = vld [vmem:[#allocation62_spill] sm:$0xff]  ;;  %p3380_p0 = scmp.ne.s32.totalorder %s3165_s5, %s3379_s6  ;;  %p3385_p2 = scmp.lt.s32.totalorder %s3379_s6, %s3379_s6 }
 0x231   :  { %v1427_v58 = vsub.f32 %v1395_v11, %v5705_v33  ;;  %3360 = vrcp.f32 %v1455_v15  ;;  %v1396_v3 = vadd.f32 %v7840_v16, %v7914_v20  ;;  %v5741_v26 = vmul.f32 %v5617_v34, %v5427_v23  ;;  %v3345_v15 = vpop.eup %3344  ;;  %v7922_v34 = vld [vmem:[#allocation125_spill] sm:$0xff]  ;;  %2846 = vbcast.lane.b32.xlu1 %v5590_v41, 328  ;;  %2842 = vbcast.lane.b32.xlu0 %v5590_v41, 320 }
 0x232   :  { %v1426_v19 = vsub.f32 %v1394_v54, %v5713_v38  ;;  %v5744_v60 = vmul.f32 %v3335_v28, %v5456_v52  ;;  %3362 = vrcp.f32 %v1454_v57  ;;  %v7917_v54 = vld [vmem:[#allocation124_spill] sm:$0xff]  ;;  %v7919_v37 = vmax.f32 %v5441_v31, 0.0  ;;  %v5765_v20 = vpop.permute.xlu1 %2109  ;;  %v3347_v31 = vpop.eup %3346  ;;  %p3386_p3 = por %p3385_p2, %p3384_p1 }
 0x233   :  { %7915 = vst [vmem:[#allocation101_spill] sm:$0xff] %v5741_v26  ;;  %v7918_v56 = vmax.f32 %v7917_v54, 0.0  ;;  %v5754_v16 = vmul.f32 %v3337_v47, %v5466_v32  ;;  %v5757_v13 = vmul.f32 %v3339_v63, %v5485_v50  ;;  %v1459_v23 = vadd.f32 1e-07, %v1427_v58  ;;  %v5769_v47 = vpop.permute.xlu0 %2105  ;;  %v3349_v50 = vpop.eup %3348 }
 0x234   :  { %7916 = vst [vmem:[#allocation103_spill] sm:$0xff] %v5744_v60  ;;  %v7923_v52 = vmax.f32 %v7922_v34, 0.0  ;;  %v7924_v28 = vmax.f32 %v5450_v40, 0.0  ;;  %3364 = vrcp.f32 %v1457_v7  ;;  %v1994_v32 = vrot.slane %v1986_v21, %v7912_v55  ;;  %v7975_v60 = vld [vmem:[#allocation113_spill] sm:$0xff]  ;;  %p3387_p4 = pnand %p3386_p3, %p3380_p0 }
 0x235   :  { %v5750_v11 = vmul.f32 %v7919_v37, %v7918_v56  ;;  %7920 = vst [vmem:[#allocation131_spill] sm:$0xff] %v5754_v16  ;;  %7921 = vst [vmem:[#allocation29_spill] sm:$0xff] %v5757_v13  ;;  %v1458_v37 = vadd.f32 1e-07, %v1426_v19  ;;  %3366 = vrcp.f32 %v1456_v25  ;;  %v1987_v40 = vcombine.high %v1986_v21, %v1986_v21  ;;  %v3351_v56 = vpop.eup %3350  ;;  %2854 = vbcast.lane.b32.xlu1 %v5590_v41, 344  ;;  %v7972_v13 = vld [vmem:[#allocation48_spill] sm:$0xff] }
 0x236   :  { %v5763_v57 = vmul.f32 %v7924_v28, %v7923_v52  ;;  %v5777_v19 = vmul.f32 %v3341_v12, %v5498_v39  ;;  %v3353_v52 = vpop.eup %3352  ;;  %v5788_v21 = vmul.f32 %v3347_v31, %v5564_v45  ;;  %3368 = vrcp.f32 %v1459_v23  ;;  %v5790_v28 = vpop.permute.xlu1 %2120  ;;  %v7930_v12 = vld [vmem:[#allocation6_spill] sm:$0xff]  ;;  %2850 = vbcast.lane.b32.xlu0 %v5590_v41, 336 }
 0x237   :  { %v1429_v54 = vsub.f32 %v1397_v61, %v5750_v11  ;;  %v5780_v61 = vmul.f32 %v3343_v6, %v5540_v17  ;;  %7929 = vst [vmem:[#allocation107_spill] sm:$0xff] %v5790_v28  ;;  %v3355_v7 = vpop.eup %3354  ;;  %3370 = vrcp.f32 %v1458_v37  ;;  %v5794_v6 = vrot.slane %v1994_v32, %v7930_v12  ;;  %v5796_v34 = vpop.permute.xlu0 %2116  ;;  %v7979_v28 = vld [vmem:[#allocation50_spill] sm:$0xff] }
 0x238   :  { %v1428_v58 = vsub.f32 %v1396_v3, %v5763_v57  ;;  %7925 = vst [vmem:[#allocation104_spill] sm:$0xff] %v5777_v19  ;;  %v5785_v3 = vmul.f32 %v3345_v15, %v5546_v51  ;;  %7928 = vst [vmem:[#allocation105_spill] sm:$0xff] %v5788_v21  ;;  %v5799_v51 = vmul.f32 %v3349_v50, %v5511_v14  ;;  %v7959_v21 = vld [vmem:[#allocation82_spill] sm:$0xff] }
 0x239   :  { %7926 = vst [vmem:[#allocation11_spill] sm:$0xff] %v5780_v61  ;;  %v1461_v17 = vadd.f32 1e-07, %v1429_v54  ;;  %7931 = vst [vmem:[#allocation32_spill] sm:$0xff] %v5796_v34  ;;  %v3357_v25 = vpop.eup %3356  ;;  %v5802_v45 = vmul.f32 %v3351_v56, %v5600_v18  ;;  %v2001_v23 = vrot.slane %v1987_v40, %v7912_v55  ;;  %v5809_v39 = vmul.f32 %v3353_v52, %v5611_v10 }
 0x23a   :  { %7927 = vst [vmem:[#allocation30_spill] sm:$0xff] %v5785_v3  ;;  %7932 = vst [vmem:[#allocation12_spill] sm:$0xff] %v5799_v51  ;;  %v1460_v15 = vadd.f32 1e-07, %v1428_v58  ;;  %v3359_v31 = vpop.eup %3358  ;;  %v2178_v63 = vcombine.high %v1994_v32, %v1994_v32  ;;  %v5815_v58 = vmul.f32 %v3355_v7, %v5624_v48  ;;  %v5817_v40 = vpop.permute.xlu1 %2128  ;;  %v2676_v56 = vcombine.high %v5724_v24, %v5724_v24  ;;  %v7938_v32 = vld [vmem:[#allocation8_spill] sm:$0xff]  ;;  %v7960_v51 = vld [vmem:[#allocation83_spill] sm:$0xff] }
 0x23b   :  { %7933 = vst [vmem:[#allocation33_spill] sm:$0xff] %v5802_v45  ;;  %7934 = vst [vmem:[#allocation34_spill] sm:$0xff] %v5809_v39  ;;  %v3361_v14 = vpop.eup %3360  ;;  %v5822_v10 = vmul.f32 %v3357_v25, %v5635_v46  ;;  %3372 = vrcp.f32 %v1461_v17  ;;  %v5826_v52 = vsub.f32 %v7938_v32, %v5794_v6  ;;  %v2179_v18 = vcombine.high %v2001_v23, %v2001_v23  ;;  %v5828_v54 = vpop.permute.xlu0 %2124  ;;  %v7941_v32 = vld [vmem:[#allocation88_spill] sm:$0xff] }
 0x23c   :  { %7935 = vst [vmem:[#allocation39_spill] sm:$0xff] %v5815_v58  ;;  %7936 = vst [vmem:[#allocation108_spill] sm:$0xff] %v5817_v40  ;;  %v3363_v37 = vpop.eup %3362  ;;  %3374 = vrcp.f32 %v1460_v15  ;;  %v5832_v7 = vrot.slane %v2001_v23, %v7930_v12  ;;  %2862 = vbcast.lane.b32.xlu1 %v5590_v41, 360  ;;  %v2874_v24 = vsub.s32 7, %v7648_v8  ;;  %v5838_v17 = vmul.f32 %v3361_v14, %v5658_v35 }
 0x23d   :  { %7937 = vst [vmem:[#allocation109_spill] sm:$0xff] %v5822_v10  ;;  %7939 = vst [vmem:[#allocation35_spill] sm:$0xff] %v5828_v54  ;;  %v5842_v50 = vsub.f32 %v7941_v32, %v5794_v6  ;;  %v5845_v48 = vrot.slane %v2178_v63, %v7930_v12  ;;  %2858 = vbcast.lane.b32.xlu0 %v5590_v41, 352  ;;  %v5850_v8 = vmul.f32 %v3359_v31, %v5645_v53 }
 0x23e   :  { %v3365_v46 = vpop.eup %3364  ;;  %7940 = vst [vmem:[#allocation16_spill] sm:$0xff] %v5838_v17  ;;  %v5853_v25 = vmul.f32 %v3363_v37, %v5667_v29  ;;  %v5855_v35 = vpop.permute.xlu1 %2136  ;;  %v5858_v14 = vrot.slane %v2676_v56, %v7912_v55  ;;  %v5863_v63 = vmul.f32 %v5826_v52, %v5826_v52  ;;  %v5866_v19 = vrot.slane %v2179_v18, %v7930_v12  ;;  %v7947_v56 = vld [vmem:[#allocation67_spill] sm:$0xff] }
 0x23f   :  { %v3367_v15 = vpop.eup %3366  ;;  %7942 = vst [vmem:[#allocation36_spill] sm:$0xff] %v5850_v8  ;;  %7944 = vst [vmem:[#allocation38_spill] sm:$0xff] %v5855_v35  ;;  %v5868_v23 = vpop.permute.xlu0 %2132  ;;  %v5872_v31 = vmul.f32 %v3365_v46, %v5682_v62  ;;  %v5877_v32 = vsub.f32 %v7947_v56, %v5794_v6  ;;  %v5881_v10 = vrot.slane %v5287_v2, %v2874_v24  ;;  %v7949_v46 = vld [vmem:[#allocation69_spill] sm:$0xff]  ;;  %v7950_v24 = vld [vmem:[#allocation84_spill] sm:$0xff] }
 0x240   :  { %7943 = vst [vmem:[#allocation37_spill] sm:$0xff] %v5853_v25  ;;  %7945 = vst [vmem:[#allocation17_spill] sm:$0xff] %v5868_v23  ;;  %v3369_v29 = vpop.eup %3368  ;;  %2870 = vbcast.lane.b32.xlu1 %v5590_v41, 376  ;;  %v5885_v53 = vmul.f32 %v3367_v15, %v5689_v36  ;;  %v5889_v62 = vmul.f32 %v5842_v50, %v5842_v50  ;;  %v5893_v37 = vsub.f32 %v7949_v46, %v5794_v6  ;;  %v7953_v46 = vld [vmem:[#allocation71_spill] sm:$0xff] }
 0x241   :  { %7946 = vst [vmem:[#allocation40_spill] sm:$0xff] %v5872_v31  ;;  %v3371_v18 = vpop.eup %3370  ;;  %2866 = vbcast.lane.b32.xlu0 %v5590_v41, 368  ;;  %v5900_v58 = vsub.f32 %v7950_v24, %v5794_v6  ;;  %v5906_v15 = vrot.slane %v5858_v14, %v7912_v55  ;;  %v5909_v17 = vmul.f32 %v3369_v29, %v5705_v33 }
 0x242   :  { %7948 = vst [vmem:[#allocation19_spill] sm:$0xff] %v5885_v53  ;;  %v5902_v36 = vpop.permute.xlu1 %2144  ;;  %v5913_v41 = vsub.f32 %v7953_v46, %v5794_v6  ;;  %v5921_v39 = vmul.f32 %v3371_v18, %v5713_v38  ;;  %v5925_v45 = vmul.f32 %v5877_v32, %v5877_v32  ;;  %v5932_v2 = vmul.f32 %v5893_v37, %v5893_v37  ;;  %v7956_v38 = vld [vmem:[#allocation77_spill] sm:$0xff]  ;;  %v7957_v46 = vld [vmem:[#allocation80_spill] sm:$0xff] }
 0x243   :  { %7951 = vst [vmem:[#allocation41_spill] sm:$0xff] %v5902_v36  ;;  %7952 = vst [vmem:[#allocation111_spill] sm:$0xff] %v5909_v17  ;;  %v5915_v56 = vpop.permute.xlu0 %2140  ;;  %v5937_v18 = vsub.f32 %v7956_v38, %v5794_v6  ;;  %v5942_v33 = vmul.f32 %v5900_v58, %v5900_v58  ;;  %v5947_v53 = vsub.f32 %v7957_v46, %v5794_v6  ;;  %v7963_v17 = vld [vmem:[#allocation5_spill] sm:$0xff] }
 0x244   :  { %7954 = vst [vmem:[#allocation42_spill] sm:$0xff] %v5915_v56  ;;  %7955 = vst [vmem:[#allocation114_spill] sm:$0xff] %v5921_v39  ;;  %2881 = vbcast.lane.b32.xlu1 %v5881_v10, 264  ;;  %v5953_v24 = vrot.slane %v5906_v15, %v7930_v12  ;;  %v5958_v8 = vmul.f32 %v5913_v41, %v5913_v41  ;;  %v5962_v3 = vsub.f32 %v7959_v21, %v5794_v6  ;;  %v7973_v39 = vld [vmem:[#allocation98_spill] sm:$0xff] }
 0x245   :  { %v3373_v29 = vpop.eup %3372  ;;  %2877 = vbcast.lane.b32.xlu0 %v5881_v10, 256  ;;  %v5966_v46 = vsub.f32 %v7960_v51, %v5794_v6  ;;  %v5977_v35 = vsub.f32 %v7963_v17, %v5794_v6  ;;  %v5985_v51 = vmul.f32 %v5937_v18, %v5937_v18  ;;  %v5995_v17 = vmul.f32 %v5947_v53, %v5947_v53 }
 0x246   :  { %v3375_v25 = vpop.eup %3374  ;;  %v5949_v31 = vpop.permute.xlu1 %2152  ;;  %v5972_v23 = vmul.f32 %v3373_v29, %v5750_v11  ;;  %v7965_v11 = vld [vmem:[#allocation87_spill] sm:$0xff]  ;;  %v6028_v34 = vsub.f32 %v7972_v13, %v5794_v6  ;;  %v6032_v16 = vsub.f32 %v7973_v39, %v5794_v6  ;;  %v6043_v26 = vsub.f32 %v7975_v60, %v5832_v7 }
 0x247   :  { %7958 = vst [vmem:[#allocation43_spill] sm:$0xff] %v5949_v31  ;;  %v5968_v61 = vpop.permute.xlu0 %2148  ;;  %v5981_v21 = vmul.f32 %v3375_v25, %v5763_v57  ;;  %v5990_v29 = vsub.f32 %v7965_v11, %v5794_v6  ;;  %v7966_v57 = vld [vmem:[#allocation47_spill] sm:$0xff]  ;;  %v6010_v11 = vmul.f32 %v5962_v3, %v5962_v3  ;;  %v6015_v54 = vmul.f32 %v5966_v46, %v5966_v46 }
 0x248   :  { %7961 = vst [vmem:[#allocation20_spill] sm:$0xff] %v5968_v61  ;;  %7962 = vst [vmem:[#allocation118_spill] sm:$0xff] %v5972_v23  ;;  %2889 = vbcast.lane.b32.xlu1 %v5881_v10, 280  ;;  %v6000_v25 = vsub.f32 %v7966_v57, %v5794_v6  ;;  %v2684_v57 = vcombine.high %v5858_v14, %v5858_v14  ;;  %v6024_v40 = vmul.f32 %v5977_v35, %v5977_v35 }
 0x249   :  { %7964 = vst [vmem:[#allocation24_spill] sm:$0xff] %v5981_v21  ;;  %2885 = vbcast.lane.b32.xlu0 %v5881_v10, 272  ;;  %v7967_v21 = vld [vmem:[#allocation96_spill] sm:$0xff]  ;;  %7969 = vst [vmem:[#allocation44_spill] sm:$0xff] %v6015_v54  ;;  %v6038_v14 = vmul.f32 %v5990_v29, %v5990_v29  ;;  %v6057_v5 = vsub.f32 %v7979_v28, %v5832_v7  ;;  %v2043_v27 = vsub.f32 %v5458_v49, %v5832_v7  ;;  %v7989_v49 = vld [vmem:[#allocation53_spill] sm:$0xff] }
 0x24a   :  { %v6004_v23 = vsub.f32 %v7967_v21, %v5794_v6  ;;  %v6006_v56 = vpop.permute.xlu1 %2160  ;;  %7971 = vst [vmem:[#allocation100_spill] sm:$0xff] %v6024_v40  ;;  %7976 = vst [vmem:[#allocation57_spill] sm:$0xff] %v6043_v26  ;;  %v6048_v13 = vmul.f32 %v6000_v25, %v6000_v25  ;;  %v6071_v30 = vrot.slane %v2684_v57, %v7912_v55  ;;  %v7994_v54 = vld [vmem:[#allocation119_spill] sm:$0xff] }
 0x24b   :  { %7968 = vst [vmem:[#allocation79_spill] sm:$0xff] %v6006_v56  ;;  %v6017_v38 = vpop.permute.xlu0 %2156  ;;  %7974 = vst [vmem:[#allocation26_spill] sm:$0xff] %v6038_v14  ;;  %v6075_v28 = vmul.f32 %v6028_v34, %v6028_v34  ;;  %v6080_v60 = vmul.f32 %v6032_v16, %v6032_v16  ;;  %v6088_v55 = vmul.f32 %v6043_v26, %v6043_v26 }
 0x24c   :  { %7970 = vst [vmem:[#allocation25_spill] sm:$0xff] %v6017_v38  ;;  %2897 = vbcast.lane.b32.xlu1 %v5881_v10, 296  ;;  %7977 = vst [vmem:[#allocation45_spill] sm:$0xff] %v6048_v13  ;;  %v6053_v6 = vmul.f32 %v6004_v23, %v6004_v23  ;;  %v7982_v38 = vld [vmem:[#allocation115_spill] sm:$0xff]  ;;  %v2285_v26 = vmul.f32 %v2043_v27, %v2043_v27 }
 0x24d   :  { %2893 = vbcast.lane.b32.xlu0 %v5881_v10, 288  ;;  %7980 = vst [vmem:[#allocation9_spill] sm:$0xff] %v6057_v5  ;;  %v6064_v56 = vsub.f32 %v7982_v38, %v5832_v7  ;;  %7984 = vst [vmem:[#allocation63_spill] sm:$0xff] %v6071_v30  ;;  %v2042_v38 = vsub.f32 %v5470_v0, %v5832_v7  ;;  %v6116_v0 = vrot.slane %v6071_v30, %v7930_v12 }
 0x24e   :  { %7978 = vst [vmem:[#allocation46_spill] sm:$0xff] %v6053_v6  ;;  %v6059_v21 = vpop.permute.xlu1 %2168  ;;  %7985 = vst [vmem:[#allocation61_spill] sm:$0xff] %v6075_v28  ;;  %v6139_v12 = vsub.f32 %v7994_v54, %v5832_v7  ;;  %v7998_v54 = vand.u32 2147483647, %v5842_v50 }
 0x24f   :  { %7981 = vst [vmem:[#allocation102_spill] sm:$0xff] %v6059_v21  ;;  %v6068_v39 = vpop.permute.xlu0 %2164  ;;  %7986 = vst [vmem:[#allocation62_spill] sm:$0xff] %v6080_v60  ;;  %v6093_v21 = vsub.f32 %v5491_v43, %v5845_v48  ;;  %v6098_v60 = vmul.f32 %v6057_v5, %v6057_v5  ;;  %v6111_v43 = vmul.f32 %v6064_v56, %v6064_v56  ;;  %v2477_v5 = vand.u32 2147483647, %v2043_v27 }
 0x250   :  { %7983 = vst [vmem:[#allocation120_spill] sm:$0xff] %v6068_v39  ;;  %2905 = vbcast.lane.b32.xlu1 %v5881_v10, 312  ;;  %7987 = vst [vmem:[#allocation124_spill] sm:$0xff] %v6088_v55  ;;  %v6103_v39 = vsub.f32 %v7989_v49, %v5832_v7  ;;  %v6107_v55 = vsub.f32 %v5502_v59, %v5845_v48  ;;  %v2284_v49 = vmul.f32 %v2042_v38, %v2042_v38 }
 0x251   :  { %2901 = vbcast.lane.b32.xlu0 %v5881_v10, 304  ;;  %7988 = vst [vmem:[#allocation125_spill] sm:$0xff] %v6098_v60  ;;  %7991 = vst [vmem:[#allocation88_spill] sm:$0xff] %v6111_v43  ;;  %v2476_v60 = vand.u32 2147483647, %v2042_v38  ;;  %v6123_v43 = vsub.f32 %v5531_v42, %v5845_v48  ;;  %v6129_v27 = vsub.f32 %v5548_v4, %v5845_v48 }
 0x252   :  { %7990 = vst [vmem:[#allocation8_spill] sm:$0xff] %v6103_v39  ;;  %v2177_v57 = vpop.permute.xlu1 %2176  ;;  %7992 = vst [vmem:[#allocation67_spill] sm:$0xff] %v6116_v0  ;;  %v2479_v59 = vand.u32 2147483647, %v6093_v21  ;;  %v2478_v30 = vand.u32 2147483647, %v6107_v55 }
 0x253   :  { %v2221_v28 = vsub.f32 %v2177_v57, %v5866_v19  ;;  %v2173_v6 = vpop.permute.xlu0 %2172  ;;  %7995 = vst [vmem:[#allocation84_spill] sm:$0xff] %v6139_v12 }
 0x254   :  { %v2220_v13 = vsub.f32 %v2173_v6, %v5866_v19  ;;  %2913 = vbcast.lane.b32.xlu1 %v5881_v10, 328 }
 0x255   :  { %v2317_v61 = vmul.f32 %v2221_v28, %v2221_v28  ;;  %v2509_v57 = vand.u32 2147483647, %v2221_v28  ;;  %2909 = vbcast.lane.b32.xlu0 %v5881_v10, 320 }
 0x256   :  { %v2316_v38 = vmul.f32 %v2220_v13, %v2220_v13  ;;  %v2508_v6 = vand.u32 2147483647, %v2220_v13  ;;  %v2552_v0 = vpop.permute.xlu1 %2551 }
 0x257   :  { %v6132_v14 = vadd.f32 %v2317_v61, %v2285_v26  ;;  %v6134_v40 = vadd.f32 %v2509_v57, %v2477_v5  ;;  %v2710_v42 = vsub.f32 %v2552_v0, %v5953_v24  ;;  %v2548_v28 = vpop.permute.xlu0 %2547  ;;  %v7997_v26 = vand.u32 2147483647, %v5826_v52 }
 0x258   :  { %v6141_v36 = vadd.f32 %v2316_v38, %v2284_v49  ;;  %v6143_v4 = vadd.f32 %v2508_v6, %v2476_v60  ;;  %v2709_v13 = vsub.f32 %v2548_v28, %v5953_v24  ;;  %2921 = vbcast.lane.b32.xlu1 %v5881_v10, 344  ;;  %v2481_v5 = vand.u32 2147483647, %v6123_v43  ;;  %v7999_v38 = vld [vmem:[#allocation95_spill] sm:$0xff] }
 0x259   :  { %7993 = vst [vmem:[#allocation69_spill] sm:$0xff] %v6132_v14  ;;  %v2511_v61 = vadd.f32 %v2479_v59, %v7997_v26  ;;  %v6152_v0 = vsub.f32 %v5573_v44, %v5845_v48  ;;  %v2742_v57 = vand.u32 2147483647, %v2710_v42  ;;  %2917 = vbcast.lane.b32.xlu0 %v5881_v10, 336  ;;  %v2510_v60 = vadd.f32 %v2478_v30, %v7998_v54  ;;  %v8001_v54 = vld [vmem:[#allocation122_spill] sm:$0xff]  ;;  %v8005_v44 = vld [vmem:[#allocation97_spill] sm:$0xff] }
 0x25a   :  { %7996 = vst [vmem:[#allocation71_spill] sm:$0xff] %v6141_v36  ;;  %v2480_v49 = vand.u32 2147483647, %v6129_v27  ;;  %v6160_v6 = vsub.f32 %v7999_v38, %v5845_v48  ;;  %v2741_v52 = vand.u32 2147483647, %v2709_v13  ;;  %v2560_v59 = vpop.permute.xlu1 %2559  ;;  %v6164_v28 = vmul.f32 %v6103_v39, %v6103_v39  ;;  %v8008_v14 = vld [vmem:[#allocation54_spill] sm:$0xff] }
 0x25b   :  { %v6167_v42 = vadd.f32 %v2742_v57, %v2511_v61  ;;  %v2712_v26 = vsub.f32 %v2560_v59, %v5953_v24  ;;  %v2556_v50 = vpop.permute.xlu0 %2555  ;;  %v6172_v30 = vmul.f32 %v6139_v12, %v6139_v12  ;;  %v6176_v38 = vsub.f32 %v8001_v54, %v5832_v7 }
 0x25c   :  { %v6178_v13 = vadd.f32 %v2741_v52, %v2510_v60  ;;  %v2711_v31 = vsub.f32 %v2556_v50, %v5953_v24  ;;  %2929 = vbcast.lane.b32.xlu1 %v5881_v10, 360  ;;  %v8004_v61 = vand.u32 2147483647, %v5877_v32  ;;  %v2483_v59 = vand.u32 2147483647, %v6152_v0  ;;  %v8007_v50 = vld [vmem:[#allocation74_spill] sm:$0xff] }
 0x25d   :  { %8000 = vst [vmem:[#allocation77_spill] sm:$0xff] %v6167_v42  ;;  %8002 = vst [vmem:[#allocation80_spill] sm:$0xff] %v6176_v38  ;;  %v6187_v36 = vsub.f32 %v8005_v44, %v5845_v48  ;;  %v2744_v42 = vand.u32 2147483647, %v2712_v26  ;;  %2925 = vbcast.lane.b32.xlu0 %v5881_v10, 352  ;;  %v6200_v44 = vsub.f32 %v8008_v14, %v5832_v7 }
 0x25e   :  { %8003 = vst [vmem:[#allocation82_spill] sm:$0xff] %v6178_v13  ;;  %v2513_v57 = vadd.f32 %v2481_v5, %v8004_v61  ;;  %v8006_v54 = vand.u32 2147483647, %v5893_v37  ;;  %v2482_v52 = vand.u32 2147483647, %v6160_v6  ;;  %v6195_v13 = vsub.f32 %v8007_v50, %v5845_v48  ;;  %v2568_v5 = vpop.permute.xlu1 %2567 }
 0x25f   :  { %v2743_v32 = vand.u32 2147483647, %v2711_v31  ;;  %v2714_v39 = vsub.f32 %v2568_v5, %v5953_v24  ;;  %v2564_v37 = vpop.permute.xlu0 %2563  ;;  %v8012_v14 = vand.u32 2147483647, %v5900_v58 }
 0x260   :  { %v2512_v60 = vadd.f32 %v2480_v49, %v8006_v54  ;;  %v6202_v26 = vadd.f32 %v2744_v42, %v2513_v57  ;;  %v6207_v49 = vmul.f32 %v6176_v38, %v6176_v38  ;;  %v2713_v31 = vsub.f32 %v2564_v37, %v5953_v24  ;;  %2937 = vbcast.lane.b32.xlu1 %v5881_v10, 376  ;;  %v8013_v57 = vld [vmem:[#allocation121_spill] sm:$0xff]  ;;  %v8015_v37 = vld [vmem:[#allocation99_spill] sm:$0xff] }
 0x261   :  { %v2515_v61 = vadd.f32 %v2483_v59, %v8012_v14  ;;  %v2485_v42 = vand.u32 2147483647, %v6187_v36  ;;  %v6219_v5 = vsub.f32 %v8013_v57, %v5845_v48  ;;  %2933 = vbcast.lane.b32.xlu0 %v5881_v10, 368  ;;  %v8014_v54 = vand.u32 2147483647, %v5913_v41  ;;  %v8017_v57 = vld [vmem:[#allocation55_spill] sm:$0xff] }
 0x262   :  { %8009 = vst [vmem:[#allocation83_spill] sm:$0xff] %v6202_v26  ;;  %8010 = vst [vmem:[#allocation5_spill] sm:$0xff] %v6207_v49  ;;  %v6210_v50 = vadd.f32 %v2743_v32, %v2512_v60  ;;  %v2746_v26 = vand.u32 2147483647, %v2714_v39  ;;  %v2484_v32 = vand.u32 2147483647, %v6195_v13  ;;  %v2576_v59 = vpop.permute.xlu1 %2575  ;;  %v6231_v14 = vmul.f32 %v6200_v44, %v6200_v44 }
 0x263   :  { %v2514_v60 = vadd.f32 %v2482_v52, %v8014_v54  ;;  %v2745_v58 = vand.u32 2147483647, %v2713_v31  ;;  %v6235_v39 = vsub.f32 %v8017_v57, %v5832_v7  ;;  %v2716_v41 = vsub.f32 %v2576_v59, %v5953_v24  ;;  %v2572_v52 = vpop.permute.xlu0 %2571 }
 0x264   :  { %8011 = vst [vmem:[#allocation87_spill] sm:$0xff] %v6210_v50  ;;  %v6227_v50 = vsub.f32 %v8015_v37, %v5845_v48  ;;  %8016 = vst [vmem:[#allocation47_spill] sm:$0xff] %v6231_v14  ;;  %v6237_v10 = vadd.f32 %v2746_v26, %v2515_v61  ;;  %v8020_v37 = vld [vmem:[#allocation56_spill] sm:$0xff]  ;;  %v2715_v12 = vsub.f32 %v2572_v52, %v5953_v24  ;;  %v8022_v14 = vand.u32 2147483647, %v5937_v18 }
 0x265   :  { %8018 = vst [vmem:[#allocation96_spill] sm:$0xff] %v6235_v39  ;;  %v6243_v38 = vsub.f32 %v8020_v37, %v5832_v7  ;;  %v6245_v31 = vadd.f32 %v2745_v58, %v2514_v60  ;;  %v2487_v57 = vand.u32 2147483647, %v6219_v5  ;;  %v8023_v61 = vld [vmem:[#allocation128_spill] sm:$0xff]  ;;  %v2748_v59 = vand.u32 2147483647, %v2716_v41 }
 0x266   :  { %8019 = vst [vmem:[#allocation48_spill] sm:$0xff] %v6237_v10  ;;  %v2517_v49 = vadd.f32 %v2485_v42, %v8022_v14  ;;  %v6253_v26 = vsub.f32 %v8023_v61, %v5845_v48  ;;  %v8024_v54 = vand.u32 2147483647, %v5947_v53  ;;  %v2486_v37 = vand.u32 2147483647, %v6227_v50  ;;  %v2584_v52 = vpop.permute.xlu1 %2583 }
 0x267   :  { %8021 = vst [vmem:[#allocation98_spill] sm:$0xff] %v6245_v31  ;;  %v6260_v60 = vsub.f32 %v5698_v1, %v5845_v48  ;;  %v2747_v58 = vand.u32 2147483647, %v2715_v12  ;;  %v6264_v18 = vmul.f32 %v6235_v39, %v6235_v39  ;;  %v2718_v41 = vsub.f32 %v2584_v52, %v5953_v24  ;;  %v2580_v53 = vpop.permute.xlu0 %2579  ;;  %v8026_v1 = vld [vmem:[#allocation73_spill] sm:$0xff] }
 0x268   :  { %v2516_v10 = vadd.f32 %v2484_v32, %v8024_v54  ;;  %v6267_v14 = vadd.f32 %v2748_v59, %v2517_v49  ;;  %v6272_v32 = vmul.f32 %v6243_v38, %v6243_v38  ;;  %v6276_v54 = vsub.f32 %v8026_v1, %v5832_v7 }
 0x269   :  { %v2717_v61 = vsub.f32 %v2580_v53, %v5953_v24  ;;  %v8028_v31 = vand.u32 2147483647, %v5962_v3  ;;  %v2489_v49 = vand.u32 2147483647, %v6253_v26  ;;  %v6286_v59 = vsub.f32 %v5728_v9, %v5845_v48 }
 0x26a   :  { %8025 = vst [vmem:[#allocation113_spill] sm:$0xff] %v6267_v14  ;;  %v6278_v12 = vadd.f32 %v2747_v58, %v2516_v10  ;;  %v2750_v52 = vand.u32 2147483647, %v2718_v41  ;;  %v8029_v14 = vand.u32 2147483647, %v5966_v46  ;;  %v6293_v10 = vsub.f32 %v5733_v22, %v5845_v48  ;;  %v2592_v53 = vpop.permute.xlu1 %2591  ;;  %v8033_v22 = vld [vmem:[#allocation13_spill] sm:$0xff] }
 0x26b   :  { %v2519_v42 = vadd.f32 %v2487_v57, %v8028_v31  ;;  %v2488_v1 = vand.u32 2147483647, %v6260_v60  ;;  %v2749_v58 = vand.u32 2147483647, %v2717_v61  ;;  %v8030_v31 = vld [vmem:[#allocation126_spill] sm:$0xff]  ;;  %v2720_v41 = vsub.f32 %v2592_v53, %v5953_v24  ;;  %v2588_v46 = vpop.permute.xlu0 %2587 }
 0x26c   :  { %8027 = vst [vmem:[#allocation50_spill] sm:$0xff] %v6278_v12  ;;  %v2518_v39 = vadd.f32 %v2486_v37, %v8029_v14  ;;  %v6298_v57 = vsub.f32 %v8030_v31, %v5832_v7  ;;  %v6305_v37 = vmul.f32 %v6276_v54, %v6276_v54  ;;  %v6309_v14 = vsub.f32 %v8033_v22, %v5832_v7 }
 0x26d   :  { %v6300_v9 = vadd.f32 %v2750_v52, %v2519_v42  ;;  %v2719_v3 = vsub.f32 %v2588_v46, %v5953_v24  ;;  %v8035_v31 = vand.u32 2147483647, %v5977_v35  ;;  %v2491_v42 = vand.u32 2147483647, %v6286_v59 }
 0x26e   :  { %8032 = vst [vmem:[#allocation53_spill] sm:$0xff] %v6305_v37  ;;  %v6311_v61 = vadd.f32 %v2749_v58, %v2518_v39  ;;  %v6319_v52 = vsub.f32 %v5765_v20, %v5845_v48  ;;  %v2752_v53 = vand.u32 2147483647, %v2720_v41  ;;  %v2490_v22 = vand.u32 2147483647, %v6293_v10  ;;  %v2600_v46 = vpop.permute.xlu1 %2599 }
 0x26f   :  { %8031 = vst [vmem:[#allocation115_spill] sm:$0xff] %v6300_v9  ;;  %v2521_v12 = vadd.f32 %v2489_v49, %v8035_v31  ;;  %v8036_v9 = vand.u32 2147483647, %v5990_v29  ;;  %v6326_v39 = vsub.f32 %v5769_v47, %v5845_v48  ;;  %v2751_v58 = vand.u32 2147483647, %v2719_v3  ;;  %v2596_v29 = vpop.permute.xlu0 %2595 }
 0x270   :  { %8034 = vst [vmem:[#allocation119_spill] sm:$0xff] %v6311_v61  ;;  %v6331_v49 = vmul.f32 %v6298_v57, %v6298_v57  ;;  %v2722_v41 = vsub.f32 %v2600_v46, %v5953_v24  ;;  %v2721_v48 = vsub.f32 %v2596_v29, %v5953_v24  ;;  %v8039_v31 = vand.u32 2147483647, %v6000_v25  ;;  %v8041_v29 = vld [vmem:[#allocation112_spill] sm:$0xff] }
 0x271   :  { %v2520_v37 = vadd.f32 %v2488_v1, %v8036_v9  ;;  %v6333_v20 = vadd.f32 %v2752_v53, %v2521_v12  ;;  %v6339_v9 = vmul.f32 %v6309_v14, %v6309_v14  ;;  %v2493_v12 = vand.u32 2147483647, %v6319_v52 }
 0x272   :  { %v2523_v35 = vadd.f32 %v2491_v42, %v8039_v31  ;;  %v2754_v53 = vand.u32 2147483647, %v2722_v41  ;;  %v2287_v46 = vmul.f32 %v6093_v21, %v6093_v21  ;;  %v8040_v1 = vand.u32 2147483647, %v6004_v23  ;;  %v8042_v21 = vld [vmem:[#allocation58_spill] sm:$0xff] }
 0x273   :  { %8037 = vst [vmem:[#allocation95_spill] sm:$0xff] %v6333_v20  ;;  %v6341_v47 = vadd.f32 %v2751_v58, %v2520_v37  ;;  %v2492_v61 = vand.u32 2147483647, %v6326_v39  ;;  %v2753_v37 = vand.u32 2147483647, %v2721_v48  ;;  %v2608_v58 = vpop.permute.xlu1 %2607  ;;  %v2286_v25 = vmul.f32 %v6107_v55, %v6107_v55  ;;  %v2604_v31 = vpop.permute.xlu0 %2603 }
 0x274   :  { %v2522_v20 = vadd.f32 %v2490_v22, %v8040_v1  ;;  %v6359_v42 = vadd.f32 %v2754_v53, %v2523_v35  ;;  %v2724_v41 = vsub.f32 %v2608_v58, %v5953_v24  ;;  %v6364_v23 = vsub.f32 %v8042_v21, %v5832_v7 }
 0x275   :  { %8038 = vst [vmem:[#allocation122_spill] sm:$0xff] %v6341_v47  ;;  %v6355_v47 = vsub.f32 %v8041_v29, %v5832_v7  ;;  %v2289_v22 = vmul.f32 %v6123_v43, %v6123_v43  ;;  %v2723_v48 = vsub.f32 %v2604_v31, %v5953_v24  ;;  %v2288_v29 = vmul.f32 %v6129_v27, %v6129_v27  ;;  %v8048_v31 = vld [vmem:[#allocation64_spill] sm:$0xff] }
 0x276   :  { %v6368_v1 = vadd.f32 %v2753_v37, %v2522_v20  ;;  %v2291_v55 = vmul.f32 %v6152_v0, %v6152_v0  ;;  %v8044_v35 = vand.u32 2147483647, %v6028_v34  ;;  %v2756_v58 = vand.u32 2147483647, %v2724_v41 }
 0x277   :  { %v2319_v7 = vadd.f32 %v2287_v46, %v5863_v63  ;;  %v2290_v21 = vmul.f32 %v6160_v6, %v6160_v6  ;;  %v8045_v43 = vand.u32 2147483647, %v6032_v16  ;;  %v2755_v37 = vand.u32 2147483647, %v2723_v48  ;;  %v6382_v24 = vpop.permute.xlu1 %2618  ;;  %v6393_v63 = vpop.permute.xlu0 %2614 }
 0x278   :  { %8043 = vst [vmem:[#allocation97_spill] sm:$0xff] %v6368_v1  ;;  %v2525_v53 = vadd.f32 %v2493_v12, %v8044_v35  ;;  %v6386_v27 = vmul.f32 %v6355_v47, %v6355_v47  ;;  %v2318_v0 = vadd.f32 %v2286_v25, %v5889_v62  ;;  %v2293_v34 = vmul.f32 %v6187_v36, %v6187_v36  ;;  %v8050_v35 = vld [vmem:[#allocation66_spill] sm:$0xff] }
 0x279   :  { %v2524_v20 = vadd.f32 %v2492_v61, %v8045_v43  ;;  %v2321_v6 = vadd.f32 %v2289_v22, %v5925_v45  ;;  %v2292_v16 = vmul.f32 %v6195_v13, %v6195_v13  ;;  %v2295_v61 = vmul.f32 %v6219_v5, %v6219_v5  ;;  %v8052_v43 = vld [vmem:[#allocation72_spill] sm:$0xff] }
 0x27a   :  { %v6391_v12 = vadd.f32 %v2756_v58, %v2525_v53  ;;  %v2320_v62 = vadd.f32 %v2288_v29, %v5932_v2  ;;  %v2323_v36 = vadd.f32 %v2291_v55, %v5942_v33  ;;  %v2939_v25 = vcombine.high %v5906_v15, %v5906_v15  ;;  %v8049_v33 = vld [vmem:[#allocation65_spill] sm:$0xff] }
 0x27b   :  { %v6400_v46 = vadd.f32 %v2755_v37, %v2524_v20  ;;  %v2383_v48 = vmul.f32 %v8048_v31, %v2319_v7  ;;  %v2322_v45 = vadd.f32 %v2290_v21, %v5958_v8  ;;  %v2294_v13 = vmul.f32 %v6227_v50, %v6227_v50  ;;  %v6413_v22 = vpop.permute.xlu1 %2626  ;;  %v6423_v8 = vpop.permute.xlu0 %2622  ;;  %v8051_v7 = vld [vmem:[#allocation68_spill] sm:$0xff]  ;;  %v8053_v37 = vld [vmem:[#allocation41_spill] sm:$0xff] }
 0x27c   :  { %8046 = vst [vmem:[#allocation74_spill] sm:$0xff] %v6391_v12  ;;  %v2297_v5 = vmul.f32 %v6253_v26, %v6253_v26  ;;  %v6417_v2 = vmul.f32 %v6364_v23, %v6364_v23  ;;  %v2382_v29 = vmul.f32 %v8049_v33, %v2318_v0  ;;  %v2325_v15 = vadd.f32 %v2293_v34, %v5985_v51  ;;  %v8054_v0 = vld [vmem:[#allocation6_spill] sm:$0xff]  ;;  %v8055_v34 = vld [vmem:[#allocation75_spill] sm:$0xff]  ;;  %v8056_v33 = vld [vmem:[#allocation44_spill] sm:$0xff] }
 0x27d   :  { %8047 = vst [vmem:[#allocation54_spill] sm:$0xff] %v6400_v46  ;;  %v2296_v55 = vmul.f32 %v6260_v60, %v6260_v60  ;;  %v2385_v53 = vmul.f32 %v8050_v35, %v2321_v6  ;;  %v2324_v26 = vadd.f32 %v2292_v16, %v5995_v17  ;;  %v2327_v58 = vadd.f32 %v2295_v61, %v6010_v11  ;;  %v8057_v6 = vld [vmem:[#allocation100_spill] sm:$0xff]  ;;  %v8079_v46 = vld [vmem:[#allocation129_spill] sm:$0xff] }
 0x27e   :  { %v2384_v21 = vmul.f32 %v8051_v7, %v2320_v62  ;;  %v2387_v20 = vmul.f32 %v8052_v43, %v2323_v36  ;;  %v6433_v51 = vsub.f32 %v8053_v37, %v5866_v19  ;;  %v6436_v60 = vrot.slane %v2939_v25, %v8054_v0  ;;  %v8058_v11 = vld [vmem:[#allocation116_spill] sm:$0xff]  ;;  %v8061_v7 = vld [vmem:[#allocation26_spill] sm:$0xff] }
 0x27f   :  { %v2386_v31 = vmul.f32 %v8055_v34, %v2322_v45  ;;  %v2326_v50 = vadd.f32 %v2294_v13, %v8056_v33  ;;  %v2329_v35 = vadd.f32 %v2297_v5, %v8057_v6  ;;  %v6441_v17 = vpop.permute.xlu1 %2634  ;;  %v8059_v16 = vsub.f32 1.0, %v8058_v11  ;;  %v8060_v62 = vld [vmem:[#allocation76_spill] sm:$0xff]  ;;  %v6451_v37 = vpop.permute.xlu0 %2630  ;;  %v8062_v45 = vld [vmem:[#allocation59_spill] sm:$0xff]  ;;  %v8064_v5 = vld [vmem:[#allocation78_spill] sm:$0xff] }
 0x280   :  { %v2389_v36 = vmul.f32 %v8060_v62, %v2325_v15  ;;  %v2328_v43 = vadd.f32 %v2296_v55, %v8061_v7  ;;  %v2299_v25 = vmul.f32 %v6286_v59, %v6286_v59  ;;  %v8063_v34 = vsub.f32 1.0, %v8062_v45  ;;  %v8065_v6 = vld [vmem:[#allocation81_spill] sm:$0xff]  ;;  %v8066_v11 = vld [vmem:[#allocation91_spill] sm:$0xff] }
 0x281   :  { %v6445_v61 = vadd.f32 %v2383_v48, %v8059_v16  ;;  %v2388_v33 = vmul.f32 %v8064_v5, %v2324_v26  ;;  %v2391_v41 = vmul.f32 %v8065_v6, %v2327_v58  ;;  %v2298_v48 = vmul.f32 %v6293_v10, %v6293_v10  ;;  %v8069_v59 = vld [vmem:[#allocation43_spill] sm:$0xff]  ;;  %v8070_v7 = vld [vmem:[#allocation21_spill] sm:$0xff]  ;;  %v8077_v6 = vld [vmem:[#allocation86_spill] sm:$0xff] }
 0x282   :  { %v6455_v13 = vadd.f32 %v2382_v29, %v8063_v34  ;;  %v8067_v15 = vsub.f32 1.0, %v8066_v11  ;;  %v2501_v55 = vand.u32 2147483647, %v6433_v51  ;;  %v6468_v62 = vsub.f32 %v8069_v59, %v5866_v19  ;;  %v8073_v26 = vld [vmem:[#allocation127_spill] sm:$0xff]  ;;  %v8076_v5 = vld [vmem:[#allocation85_spill] sm:$0xff] }
 0x283   :  { %v8071_v29 = vsub.f32 1.0, %v8070_v7  ;;  %v8074_v34 = vsub.f32 1.0, %v8073_v26  ;;  %v2390_v10 = vmul.f32 %v8076_v5, %v2326_v50  ;;  %v2393_v11 = vmul.f32 %v8077_v6, %v2329_v35  ;;  %v2643_v3 = vpop.permute.xlu1 %2642  ;;  %v8082_v7 = vld [vmem:[#allocation90_spill] sm:$0xff]  ;;  %v8084_v26 = vld [vmem:[#allocation67_spill] sm:$0xff] }
 0x284   :  { %v6463_v16 = vadd.f32 %v2385_v53, %v8067_v15  ;;  %v8078_v53 = vld [vmem:[#allocation20_spill] sm:$0xff]  ;;  %v8080_v59 = vsub.f32 1.0, %v8079_v46  ;;  %v8085_v50 = vld [vmem:[#allocation22_spill] sm:$0xff] }
 0x285   :  { %v6472_v45 = vadd.f32 %v2384_v21, %v8071_v29  ;;  %v6476_v58 = vadd.f32 %v2387_v20, %v8074_v34  ;;  %v6482_v15 = vsub.f32 %v8078_v53, %v5866_v19  ;;  %v2392_v21 = vmul.f32 %v8082_v7, %v2328_v43  ;;  %v8083_v29 = vld [vmem:[#allocation45_spill] sm:$0xff]  ;;  %v6491_v34 = vpop.permute.xlu0 %2638  ;;  %v8088_v6 = vld [vmem:[#allocation46_spill] sm:$0xff]  ;;  %v8092_v43 = vld [vmem:[#allocation27_spill] sm:$0xff] }
 0x286   :  { %8068 = vst [vmem:[#allocation121_spill] sm:$0xff] %v6463_v16  ;;  %v6486_v12 = vadd.f32 %v2386_v31, %v8080_v59  ;;  %v2331_v1 = vadd.f32 %v2299_v25, %v8083_v29  ;;  %v2732_v20 = vsub.f32 %v2643_v3, %v8084_v26  ;;  %v8086_v5 = vsub.f32 1.0, %v8085_v50  ;;  %v8089_v46 = vld [vmem:[#allocation130_spill] sm:$0xff] }
 0x287   :  { %8072 = vst [vmem:[#allocation99_spill] sm:$0xff] %v6472_v45  ;;  %8075 = vst [vmem:[#allocation55_spill] sm:$0xff] %v6476_v58  ;;  %v2330_v53 = vadd.f32 %v2298_v48, %v8088_v6  ;;  %v2301_v58 = vmul.f32 %v6319_v52, %v6319_v52  ;;  %v8090_v31 = vsub.f32 1.0, %v8089_v46  ;;  %v8093_v7 = vsub.f32 1.0, %v8092_v43  ;;  %v8097_v6 = vld [vmem:[#allocation25_spill] sm:$0xff]  ;;  %v2651_v46 = vpop.permute.xlu1 %2650  ;;  %v8108_v45 = vld [vmem:[#allocation18_spill] sm:$0xff] }
 0x288   :  { %8081 = vst [vmem:[#allocation56_spill] sm:$0xff] %v6486_v12  ;;  %v6495_v35 = vadd.f32 %v2389_v36, %v8086_v5  ;;  %v8095_v3 = vand.u32 2147483647, %v6200_v44  ;;  %v2503_v50 = vand.u32 2147483647, %v6468_v62  ;;  %v8096_v36 = vld [vmem:[#allocation79_spill] sm:$0xff] }
 0x289   :  { %v6502_v59 = vadd.f32 %v2388_v33, %v8090_v31  ;;  %v6506_v25 = vadd.f32 %v2391_v41, %v8093_v7  ;;  %v6513_v5 = vsub.f32 %v8096_v36, %v5866_v19  ;;  %v2764_v48 = vand.u32 2147483647, %v2732_v20  ;;  %v8098_v31 = vld [vmem:[#allocation28_spill] sm:$0xff]  ;;  %v8101_v44 = vld [vmem:[#allocation101_spill] sm:$0xff] }
 0x28a   :  { %8087 = vst [vmem:[#allocation128_spill] sm:$0xff] %v6495_v35  ;;  %v2533_v29 = vadd.f32 %v2501_v55, %v8095_v3  ;;  %v2502_v52 = vand.u32 2147483647, %v6482_v15  ;;  %v6518_v33 = vsub.f32 %v8097_v6, %v5866_v19  ;;  %v8099_v41 = vsub.f32 1.0, %v8098_v31  ;;  %v8104_v3 = vld [vmem:[#allocation94_spill] sm:$0xff]  ;;  %v8105_v35 = vld [vmem:[#allocation103_spill] sm:$0xff] }
 0x28b   :  { %8091 = vst [vmem:[#allocation73_spill] sm:$0xff] %v6502_v59  ;;  %8094 = vst [vmem:[#allocation126_spill] sm:$0xff] %v6506_v25  ;;  %v8102_v55 = vsub.f32 1.0, %v8101_v44  ;;  %v2395_v25 = vmul.f32 %v8104_v3, %v2331_v1  ;;  %v2734_v20 = vsub.f32 %v2651_v46, %v8084_v26  ;;  %v2647_v59 = vpop.permute.xlu0 %2646  ;;  %v8106_v12 = vsub.f32 1.0, %v8105_v35  ;;  %v8109_v31 = vld [vmem:[#allocation61_spill] sm:$0xff]  ;;  %v8111_v46 = vld [vmem:[#allocation102_spill] sm:$0xff] }
 0x28c   :  { %v6522_v43 = vadd.f32 %v2390_v10, %v8099_v41  ;;  %v6529_v36 = vadd.f32 %v2764_v48, %v2533_v29  ;;  %v2394_v16 = vmul.f32 %v8108_v45, %v2330_v53  ;;  %v2333_v10 = vadd.f32 %v2301_v58, %v8109_v31  ;;  %v8113_v35 = vld [vmem:[#allocation120_spill] sm:$0xff] }
 0x28d   :  { %v6526_v7 = vadd.f32 %v2393_v11, %v8102_v55  ;;  %v6534_v6 = vadd.f32 %v2392_v21, %v8106_v12  ;;  %v2300_v41 = vmul.f32 %v6326_v39, %v6326_v39  ;;  %v2733_v11 = vsub.f32 %v2647_v59, %v8084_v26  ;;  %v2659_v59 = vpop.permute.xlu1 %2658 }
 0x28e   :  { %8100 = vst [vmem:[#allocation13_spill] sm:$0xff] %v6522_v43  ;;  %v8110_v1 = vand.u32 2147483647, %v6243_v38  ;;  %v2505_v48 = vand.u32 2147483647, %v6513_v5  ;;  %v6546_v44 = vsub.f32 %v8111_v46, %v5866_v19  ;;  %v6553_v39 = vsub.f32 %v8113_v35, %v5866_v19  ;;  %v8114_v38 = vld [vmem:[#allocation107_spill] sm:$0xff] }
 0x28f   :  { %8103 = vst [vmem:[#allocation112_spill] sm:$0xff] %v6526_v7  ;;  %8107 = vst [vmem:[#allocation58_spill] sm:$0xff] %v6534_v6  ;;  %v2766_v12 = vand.u32 2147483647, %v2734_v20  ;;  %v8112_v21 = vand.u32 2147483647, %v6276_v54  ;;  %v2736_v3 = vsub.f32 %v2659_v59, %v8084_v26  ;;  %v2655_v31 = vpop.permute.xlu0 %2654 }
 0x290   :  { %v2535_v29 = vadd.f32 %v2503_v50, %v8110_v1  ;;  %v2504_v58 = vand.u32 2147483647, %v6518_v33  ;;  %v2765_v53 = vand.u32 2147483647, %v2733_v11  ;;  %v2207_v50 = vsub.f32 %v8114_v38, %v5866_v19  ;;  %v8115_v20 = vld [vmem:[#allocation131_spill] sm:$0xff] }
 0x291   :  { %v2534_v45 = vadd.f32 %v2502_v52, %v8112_v21  ;;  %v8116_v1 = vsub.f32 1.0, %v8115_v20  ;;  %v8118_v52 = vld [vmem:[#allocation62_spill] sm:$0xff]  ;;  %v8119_v21 = vld [vmem:[#allocation32_spill] sm:$0xff]  ;;  %v2735_v11 = vsub.f32 %v2655_v31, %v8084_v26  ;;  %v8121_v38 = vand.u32 2147483647, %v6298_v57  ;;  %v8122_v7 = vld [vmem:[#allocation63_spill] sm:$0xff] }
 0x292   :  { %v6557_v55 = vadd.f32 %v2766_v12, %v2535_v29  ;;  %v2332_v46 = vadd.f32 %v2300_v41, %v8118_v52  ;;  %v2206_v35 = vsub.f32 %v8119_v21, %v5866_v19  ;;  %v2507_v12 = vand.u32 2147483647, %v6546_v44  ;;  %v2667_v21 = vpop.permute.xlu1 %2666 }
 0x293   :  { %v6562_v54 = vadd.f32 %v2395_v25, %v8116_v1  ;;  %v6567_v6 = vadd.f32 %v2765_v53, %v2534_v45  ;;  %v2537_v29 = vadd.f32 %v2505_v48, %v8121_v38  ;;  %v2768_v59 = vand.u32 2147483647, %v2736_v3  ;;  %v8123_v25 = vld [vmem:[#allocation49_spill] sm:$0xff]  ;;  %v2663_v3 = vpop.permute.xlu0 %2662  ;;  %v8127_v38 = vld [vmem:[#allocation51_spill] sm:$0xff] }
 0x294   :  { %v2940_v20 = vcombine.high %v8122_v7, %v8122_v7  ;;  %v6576_v1 = vmul.f32 %v8123_v25, %v2333_v10  ;;  %v8125_v41 = vand.u32 2147483647, %v6309_v14  ;;  %v2506_v45 = vand.u32 2147483647, %v6553_v39  ;;  %v8130_v14 = vld [vmem:[#allocation29_spill] sm:$0xff] }
 0x295   :  { %8117 = vst [vmem:[#allocation64_spill] sm:$0xff] %v6562_v54  ;;  %8120 = vst [vmem:[#allocation65_spill] sm:$0xff] %v6567_v6  ;;  %v2767_v53 = vand.u32 2147483647, %v2735_v11  ;;  %v2303_v31 = vmul.f32 %v2207_v50, %v2207_v50  ;;  %v2495_v54 = vand.u32 2147483647, %v2207_v50  ;;  %v6581_v57 = vadd.f32 %v2768_v59, %v2537_v29 }
 0x296   :  { %8124 = vst [vmem:[#allocation66_spill] sm:$0xff] %v6576_v1  ;;  %v2536_v52 = vadd.f32 %v2504_v58, %v8125_v41  ;;  %v2738_v48 = vsub.f32 %v2667_v21, %v8084_v26  ;;  %v6585_v43 = vmul.f32 %v8127_v38, %v2332_v46  ;;  %v2737_v10 = vsub.f32 %v2663_v3, %v8084_v26  ;;  %v8133_v41 = vld [vmem:[#allocation108_spill] sm:$0xff]  ;;  %v8135_v1 = vld [vmem:[#allocation35_spill] sm:$0xff] }
 0x297   :  { %8126 = vst [vmem:[#allocation68_spill] sm:$0xff] %v6581_v57  ;;  %v8131_v58 = vsub.f32 1.0, %v8130_v14  ;;  %v2302_v11 = vmul.f32 %v2206_v35, %v2206_v35  ;;  %v2209_v50 = vsub.f32 %v8133_v41, %v5866_v19  ;;  %v8134_v29 = vand.u32 2147483647, %v6355_v47  ;;  %v2675_v14 = vpop.permute.xlu1 %2674  ;;  %v8139_v41 = vld [vmem:[#allocation17_spill] sm:$0xff] }
 0x298   :  { %8128 = vst [vmem:[#allocation72_spill] sm:$0xff] %v6585_v43  ;;  %v6587_v7 = vadd.f32 %v2767_v53, %v2536_v52  ;;  %v2770_v21 = vand.u32 2147483647, %v2738_v48  ;;  %v2208_v46 = vsub.f32 %v8135_v1, %v5866_v19  ;;  %v8136_v52 = vld [vmem:[#allocation38_spill] sm:$0xff]  ;;  %v8137_v3 = vand.u32 2147483647, %v6364_v23  ;;  %v2671_v1 = vpop.permute.xlu0 %2670 }
 0x299   :  { %v6592_v25 = vadd.f32 %v2394_v16, %v8131_v58  ;;  %v2539_v59 = vadd.f32 %v2507_v12, %v8134_v29  ;;  %v6602_v53 = vsub.f32 %v8136_v52, %v5866_v19  ;;  %v2769_v16 = vand.u32 2147483647, %v2737_v10  ;;  %v8138_v58 = vld [vmem:[#allocation124_spill] sm:$0xff] }
 0x29a   :  { %8129 = vst [vmem:[#allocation41_spill] sm:$0xff] %v6587_v7  ;;  %v2538_v38 = vadd.f32 %v2506_v45, %v8137_v3  ;;  %v2335_v43 = vadd.f32 %v2303_v31, %v8138_v58  ;;  %v2740_v12 = vsub.f32 %v2675_v14, %v8084_v26  ;;  %v2494_v48 = vand.u32 2147483647, %v2206_v35  ;;  %v8142_v45 = vld [vmem:[#allocation125_spill] sm:$0xff]  ;;  %v8143_v3 = vld [vmem:[#allocation42_spill] sm:$0xff]  ;;  %v8204_v7 = vld [vmem:[#allocation19_spill] sm:$0xff] }
 0x29b   :  { %8132 = vst [vmem:[#allocation6_spill] sm:$0xff] %v6592_v25  ;;  %v6609_v25 = vsub.f32 %v8139_v41, %v5866_v19  ;;  %v6611_v47 = vadd.f32 %v2770_v21, %v2539_v59  ;;  %v2739_v52 = vsub.f32 %v2671_v1, %v8084_v26  ;;  %v6618_v23 = vrot.slane %v2940_v20, %v8054_v0  ;;  %v8144_v21 = vld [vmem:[#allocation57_spill] sm:$0xff]  ;;  %v6631_v1 = vpop.permute.xlu1 %2814  ;;  %v8146_v0 = vld [vmem:[#allocation52_spill] sm:$0xff] }
 0x29c   :  { %v6614_v29 = vadd.f32 %v2769_v16, %v2538_v38  ;;  %v2334_v10 = vadd.f32 %v2302_v11, %v8142_v45  ;;  %v2305_v31 = vmul.f32 %v2209_v50, %v2209_v50  ;;  %v6623_v58 = vsub.f32 %v8143_v3, %v5866_v19 }
 0x29d   :  { %8140 = vst [vmem:[#allocation75_spill] sm:$0xff] %v6611_v47  ;;  %v2772_v59 = vand.u32 2147483647, %v2740_v12  ;;  %v8145_v41 = vand.u32 2147483647, %v8144_v21  ;;  %v2304_v35 = vmul.f32 %v2208_v46, %v2208_v46  ;;  %v2307_v38 = vmul.f32 %v6602_v53, %v6602_v53  ;;  %v6639_v12 = vpop.permute.xlu0 %2810 }
 0x29e   :  { %8141 = vst [vmem:[#allocation44_spill] sm:$0xff] %v6614_v29  ;;  %v2771_v16 = vand.u32 2147483647, %v2739_v52  ;;  %v2399_v20 = vmul.f32 %v8146_v0, %v2335_v43  ;;  %v2497_v11 = vand.u32 2147483647, %v2209_v50  ;;  %v2306_v45 = vmul.f32 %v6609_v25, %v6609_v25  ;;  %v8151_v43 = vld [vmem:[#allocation117_spill] sm:$0xff] }
 0x29f   :  { %v6627_v14 = vadd.f32 %v2495_v54, %v8145_v41  ;;  %v6637_v19 = vadd.f32 %v2772_v59, %v6134_v40  ;;  %v8148_v54 = vld [vmem:[#allocation9_spill] sm:$0xff]  ;;  %v2496_v41 = vand.u32 2147483647, %v2208_v46  ;;  %v2309_v52 = vmul.f32 %v6433_v51, %v6433_v51  ;;  %v8152_v0 = vld [vmem:[#allocation88_spill] sm:$0xff] }
 0x2a0   :  { %v8149_v3 = vand.u32 2147483647, %v8148_v54  ;;  %v6648_v29 = vadd.f32 %v2771_v16, %v6143_v4  ;;  %v2398_v50 = vmul.f32 %v8151_v43, %v2334_v10  ;;  %v2337_v47 = vadd.f32 %v2305_v31, %v8152_v0  ;;  %v6662_v16 = vpop.permute.xlu1 %2822  ;;  %v8154_v54 = vld [vmem:[#allocation5_spill] sm:$0xff] }
 0x2a1   :  { %8147 = vst [vmem:[#allocation100_spill] sm:$0xff] %v6637_v19  ;;  %v2308_v40 = vmul.f32 %v6623_v58, %v6623_v58  ;;  %v2311_v59 = vmul.f32 %v6468_v62, %v6468_v62  ;;  %v2339_v46 = vadd.f32 %v2307_v38, %v6172_v30  ;;  %v2310_v51 = vmul.f32 %v6482_v15, %v6482_v15  ;;  %v8155_v30 = vld [vmem:[#allocation11_spill] sm:$0xff]  ;;  %v8157_v15 = vld [vmem:[#allocation8_spill] sm:$0xff] }
 0x2a2   :  { %v6643_v21 = vadd.f32 %v2494_v48, %v8149_v3  ;;  %8150 = vst [vmem:[#allocation116_spill] sm:$0xff] %v6648_v29  ;;  %v2336_v48 = vadd.f32 %v2304_v35, %v6164_v28  ;;  %v2313_v4 = vmul.f32 %v6513_v5, %v6513_v5  ;;  %v8153_v10 = vand.u32 2147483647, %v6064_v56  ;;  %v6671_v28 = vpop.permute.xlu0 %2818  ;;  %v8159_v56 = vld [vmem:[#allocation47_spill] sm:$0xff] }
 0x2a3   :  { %v2338_v3 = vadd.f32 %v2306_v45, %v8154_v54  ;;  %v2312_v62 = vmul.f32 %v6518_v33, %v6518_v33  ;;  %v8156_v35 = vsub.f32 1.0, %v8155_v30  ;;  %v8158_v43 = vand.u32 2147483647, %v8157_v15  ;;  %v8161_v30 = vld [vmem:[#allocation10_spill] sm:$0xff] }
 0x2a4   :  { %v6666_v31 = vadd.f32 %v2497_v11, %v8153_v10  ;;  %v2499_v0 = vand.u32 2147483647, %v6602_v53  ;;  %v2341_v11 = vadd.f32 %v2309_v52, %v8159_v56  ;;  %v2315_v45 = vmul.f32 %v6546_v44, %v6546_v44  ;;  %v8160_v10 = vld [vmem:[#allocation7_spill] sm:$0xff]  ;;  %v8162_v15 = vld [vmem:[#allocation106_spill] sm:$0xff]  ;;  %v6693_v52 = vpop.permute.xlu1 %2830 }
 0x2a5   :  { %v6675_v38 = vadd.f32 %v2399_v20, %v8156_v35  ;;  %v6679_v5 = vadd.f32 %v2496_v41, %v8158_v43  ;;  %v2401_v54 = vmul.f32 %v8160_v10, %v2337_v47  ;;  %v2498_v33 = vand.u32 2147483647, %v6609_v25  ;;  %v8163_v43 = vld [vmem:[#allocation53_spill] sm:$0xff]  ;;  %v8164_v56 = vld [vmem:[#allocation123_spill] sm:$0xff] }
 0x2a6   :  { %v2340_v29 = vadd.f32 %v2308_v40, %v6264_v18  ;;  %v2343_v20 = vadd.f32 %v2311_v59, %v6272_v32  ;;  %v2400_v35 = vmul.f32 %v8161_v30, %v2336_v48  ;;  %v2403_v41 = vmul.f32 %v8162_v15, %v2339_v46  ;;  %v6700_v32 = vpop.permute.xlu0 %2826  ;;  %v8165_v40 = vld [vmem:[#allocation84_spill] sm:$0xff]  ;;  %v8167_v46 = vld [vmem:[#allocation15_spill] sm:$0xff]  ;;  %v8173_v15 = vld [vmem:[#allocation70_spill] sm:$0xff] }
 0x2a7   :  { %v2342_v19 = vadd.f32 %v2310_v51, %v8163_v43  ;;  %v2345_v53 = vadd.f32 %v2313_v4, %v6331_v49  ;;  %v2402_v44 = vmul.f32 %v8164_v56, %v2338_v3  ;;  %v2500_v47 = vand.u32 2147483647, %v6623_v58  ;;  %v8168_v4 = vld [vmem:[#allocation30_spill] sm:$0xff]  ;;  %v8170_v58 = vld [vmem:[#allocation80_spill] sm:$0xff]  ;;  %v8174_v56 = vld [vmem:[#allocation105_spill] sm:$0xff] }
 0x2a8   :  { %v2344_v25 = vadd.f32 %v2312_v62, %v6339_v9  ;;  %v2314_v18 = vmul.f32 %v6553_v39, %v6553_v39  ;;  %v8166_v59 = vand.u32 2147483647, %v8165_v40  ;;  %v2405_v51 = vmul.f32 %v8167_v46, %v2341_v11  ;;  %v8172_v62 = vld [vmem:[#allocation31_spill] sm:$0xff]  ;;  %v8177_v46 = vld [vmem:[#allocation89_spill] sm:$0xff] }
 0x2a9   :  { %v2347_v49 = vadd.f32 %v2315_v45, %v6386_v27  ;;  %v8169_v10 = vsub.f32 1.0, %v8168_v4  ;;  %v8171_v30 = vand.u32 2147483647, %v8170_v58  ;;  %v2404_v39 = vmul.f32 %v8172_v62, %v2340_v29  ;;  %v6724_v45 = vpop.permute.xlu1 %2838  ;;  %v8178_v4 = vld [vmem:[#allocation33_spill] sm:$0xff]  ;;  %v8180_v58 = vld [vmem:[#allocation34_spill] sm:$0xff] }
 0x2aa   :  { %v6704_v48 = vadd.f32 %v2499_v0, %v8166_v59  ;;  %v2407_v43 = vmul.f32 %v8173_v15, %v2343_v20  ;;  %v8175_v40 = vsub.f32 1.0, %v8174_v56  ;;  %v8176_v59 = vld [vmem:[#allocation110_spill] sm:$0xff]  ;;  %v2409_v27 = vmul.f32 %v8177_v46, %v2345_v53  ;;  %v8182_v20 = vld [vmem:[#allocation96_spill] sm:$0xff]  ;;  %v6742_v56 = vpop.permute.xlu0 %2834 }
 0x2ab   :  { %v6710_v3 = vadd.f32 %v2398_v50, %v8169_v10  ;;  %v6714_v9 = vadd.f32 %v2498_v33, %v8171_v30  ;;  %v2406_v11 = vmul.f32 %v8176_v59, %v2342_v19  ;;  %v6726_v50 = vpop.f32.mrb[0].mxu0  ;;  %v8179_v10 = vsub.f32 1.0, %v8178_v4  ;;  %v8184_v15 = vld [vmem:[#allocation14_spill] sm:$0xff]  ;;  %v8185_v59 = vld [vmem:[#allocation39_spill] sm:$0xff]  ;;  %v8187_v4 = vld [vmem:[#allocation92_spill] sm:$0xff] }
 0x2ac   :  { %v6720_v0 = vadd.f32 %v2401_v54, %v8175_v40  ;;  %v8181_v29 = vsub.f32 1.0, %v8180_v58  ;;  %v8183_v62 = vand.u32 2147483647, %v8182_v20  ;;  %v2408_v19 = vmul.f32 %v8184_v15, %v2344_v25  ;;  %v6744_v40 = vpop.f32.mrb[1].mxu0  ;;  %v8188_v58 = vld [vmem:[#allocation109_spill] sm:$0xff]  ;;  %v8191_v20 = vld [vmem:[#allocation36_spill] sm:$0xff] }
 0x2ad   :  { %v6730_v33 = vadd.f32 %v2400_v35, %v8179_v10  ;;  %v2346_v53 = vadd.f32 %v2314_v18, %v6417_v2  ;;  %v8186_v46 = vsub.f32 1.0, %v8185_v59  ;;  %v2411_v10 = vmul.f32 %v8187_v4, %v2347_v49  ;;  %v6759_v2 = vpop.f32.mrb[0].mxu1  ;;  %v6781_v4 = vpop.f32.mrb[2].mxu0 }
 0x2ae   :  { %v6734_v30 = vadd.f32 %v2403_v41, %v8181_v29  ;;  %v6738_v54 = vadd.f32 %v2500_v47, %v8183_v62  ;;  %v2726_v41 = vsub.f32 %v6382_v24, %v8084_v26  ;;  %v2725_v47 = vsub.f32 %v6393_v63, %v8084_v26  ;;  %v8194_v24 = vld [vmem:[#allocation16_spill] sm:$0xff]  ;;  %v6773_v63 = vpop.f32.mrb[1].mxu1 }
 0x2af   :  { %v6748_v35 = vadd.f32 %v2402_v44, %v8186_v46  ;;  %v8189_v25 = vsub.f32 1.0, %v8188_v58  ;;  %v2728_v18 = vsub.f32 %v6413_v22, %v8084_v26  ;;  %v2727_v44 = vsub.f32 %v6423_v8, %v8084_v26  ;;  %v6779_v22 = vpop.permute.xlu1 %2846  ;;  %v8197_v8 = vld [vmem:[#allocation37_spill] sm:$0xff] }
 0x2b0   :  { %v8192_v49 = vsub.f32 1.0, %v8191_v20  ;;  %v8195_v15 = vsub.f32 1.0, %v8194_v24  ;;  %v2729_v46 = vsub.f32 %v6451_v37, %v8084_v26  ;;  %v8198_v58 = vsub.f32 1.0, %v8197_v8 }
 0x2b1   :  { %v6757_v29 = vadd.f32 %v2405_v51, %v8189_v25  ;;  %v2730_v51 = vsub.f32 %v6441_v17, %v8084_v26  ;;  %v8200_v25 = vld [vmem:[#allocation40_spill] sm:$0xff]  ;;  %v2731_v17 = vsub.f32 %v6491_v34, %v8084_v26  ;;  %v2952_v37 = vsub.f32 %v6631_v1, %v6436_v60 }
 0x2b2   :  { %v6767_v62 = vadd.f32 %v2404_v39, %v8192_v49  ;;  %v6771_v59 = vadd.f32 %v2407_v43, %v8195_v15  ;;  %v6785_v39 = vadd.f32 %v2406_v11, %v8198_v58  ;;  %v8201_v20 = vsub.f32 1.0, %v8200_v25  ;;  %v8203_v49 = vld [vmem:[#allocation93_spill] sm:$0xff]  ;;  %v6796_v15 = vpop.permute.xlu0 %2842 }
 0x2b3   :  { %8190 = vst [vmem:[#allocation76_spill] sm:$0xff] %v6757_v29  ;;  %v2410_v24 = vmul.f32 %v8203_v49, %v2346_v53  ;;  %v8205_v8 = vsub.f32 1.0, %v8204_v7  ;;  %v2758_v58 = vand.u32 2147483647, %v2726_v41  ;;  %v2757_v25 = vand.u32 2147483647, %v2725_v47 }
 0x2b4   :  { %8193 = vst [vmem:[#allocation26_spill] sm:$0xff] %v6767_v62  ;;  %8196 = vst [vmem:[#allocation59_spill] sm:$0xff] %v6771_v59  ;;  %v6789_v43 = vadd.f32 %v2409_v27, %v8201_v20  ;;  %v6798_v59 = vpop.f32.mrb[3].mxu0  ;;  %v2951_v27 = vsub.f32 %v6639_v12, %v6436_v60  ;;  %v6806_v53 = vpop.f32.mrb[2].mxu1  ;;  %v8207_v20 = vld [vmem:[#allocation111_spill] sm:$0xff]  ;;  %v2953_v7 = vsub.f32 %v6671_v28, %v6436_v60 }
 0x2b5   :  { %8199 = vst [vmem:[#allocation78_spill] sm:$0xff] %v6785_v39  ;;  %v6802_v11 = vadd.f32 %v2408_v19, %v8205_v8  ;;  %v8208_v26 = vsub.f32 1.0, %v8207_v20  ;;  %v2760_v1 = vand.u32 2147483647, %v2728_v18  ;;  %v2759_v49 = vand.u32 2147483647, %v2727_v44 }
 0x2b6   :  { %8202 = vst [vmem:[#allocation81_spill] sm:$0xff] %v6789_v43  ;;  %v2954_v43 = vsub.f32 %v6662_v16, %v6436_v60  ;;  %v6816_v19 = vpop.f32.mrb[3].mxu1  ;;  %v2762_v41 = vand.u32 2147483647, %v2730_v51  ;;  %v2761_v47 = vand.u32 2147483647, %v2729_v46  ;;  %v2956_v12 = vsub.f32 %v6693_v52, %v6436_v60 }
 0x2b7   :  { %8206 = vst [vmem:[#allocation91_spill] sm:$0xff] %v6802_v11  ;;  %v6810_v34 = vadd.f32 %v2411_v10, %v8208_v26  ;;  %v2955_v8 = vsub.f32 %v6700_v32, %v6436_v60  ;;  %v6822_v10 = vpop.permute.xlu1 %2854  ;;  %v6824_v18 = vpop.f32.mrb[4].mxu0  ;;  %v8210_v44 = vld [vmem:[#allocation69_spill] sm:$0xff]  ;;  %v8211_v20 = vld [vmem:[#allocation60_spill] sm:$0xff]  ;;  %v2763_v26 = vand.u32 2147483647, %v2731_v17  ;;  %v6839_v32 = vadd.f32 %v2758_v58, %v6627_v14 }
 0x2b8   :  { %v6828_v16 = vmul.f32 %v8211_v20, %v8210_v44  ;;  %v2984_v28 = vand.u32 2147483647, %v2952_v37  ;;  %v6832_v51 = vpop.f32.mrb[5].mxu0  ;;  %v8213_v46 = vld [vmem:[#allocation114_spill] sm:$0xff]  ;;  %v6842_v39 = vadd.f32 %v2757_v25, %v6643_v21  ;;  %v2983_v57 = vand.u32 2147483647, %v2951_v27 }
 0x2b9   :  { %8209 = vst [vmem:[#allocation43_spill] sm:$0xff] %v6810_v34  ;;  %v6830_v34 = vpop.permute.xlu0 %2850  ;;  %v8214_v11 = vsub.f32 1.0, %v8213_v46  ;;  %v2958_v44 = vsub.f32 %v6724_v45, %v6436_v60  ;;  %v6846_v17 = vpop.f32.mrb[4].mxu1  ;;  %v6849_v37 = vadd.f32 %v2760_v1, %v6666_v31  ;;  %v6852_v20 = vadd.f32 %v2759_v49, %v6679_v5 }
 0x2ba   :  { %8212 = vst [vmem:[#allocation21_spill] sm:$0xff] %v6828_v16  ;;  %v6854_v46 = vpop.f32.mrb[5].mxu1  ;;  %v6857_v14 = vadd.f32 %v2762_v41, %v6704_v48  ;;  %v2988_v21 = vand.u32 2147483647, %v2956_v12  ;;  %v2987_v58 = vand.u32 2147483647, %v2955_v8  ;;  %v2957_v45 = vsub.f32 %v6742_v56, %v6436_v60 }
 0x2bb   :  { %v6836_v52 = vadd.f32 %v2410_v24, %v8214_v11  ;;  %v2986_v24 = vand.u32 2147483647, %v2954_v43  ;;  %v2985_v11 = vand.u32 2147483647, %v2953_v7  ;;  %v6861_v25 = vpop.permute.xlu1 %2862  ;;  %v6863_v27 = vpop.f32.mrb[6].mxu0  ;;  %v6866_v31 = vadd.f32 %v2761_v47, %v6714_v9  ;;  %v8216_v43 = vld [vmem:[#allocation77_spill] sm:$0xff] }
 0x2bc   :  { %v6869_v5 = vadd.f32 %v2763_v26, %v6738_v54  ;;  %v6872_v1 = vadd.f32 %v2984_v28, %v8216_v43  ;;  %v231_v49 = vsub.f32 0.0, %v6726_v50  ;;  %v6877_v7 = vpop.f32.mrb[7].mxu0  ;;  %v8217_v56 = vld [vmem:[#allocation82_spill] sm:$0xff]  ;;  %v2990_v12 = vand.u32 2147483647, %v2958_v44  ;;  %v6885_v54 = vpop.f32.mrb[6].mxu1 }
 0x2bd   :  { %8215 = vst [vmem:[#allocation127_spill] sm:$0xff] %v6836_v52  ;;  %v6874_v48 = vpop.permute.xlu0 %2858  ;;  %v6880_v41 = vadd.f32 %v2983_v57, %v8217_v56  ;;  %v2960_v9 = vsub.f32 %v6779_v22, %v6436_v60  ;;  %v230_v47 = vsub.f32 0.0, %v6744_v40  ;;  %v8218_v8 = vld [vmem:[#allocation83_spill] sm:$0xff]  ;;  %v2959_v50 = vsub.f32 %v6796_v15, %v6436_v60  ;;  %v6896_v56 = vpop.f32.mrb[7].mxu1  ;;  %v8221_v44 = vld [vmem:[#allocation48_spill] sm:$0xff]  ;;  %v8222_v22 = vld [vmem:[#allocation98_spill] sm:$0xff] }
 0x2be   :  { %v6888_v26 = vadd.f32 %v2986_v24, %v8218_v8  ;;  %v8219_v28 = vld [vmem:[#allocation87_spill] sm:$0xff]  ;;  %v239_v57 = vsub.f32 0.0, %v6759_v2  ;;  %8220 = vst [vmem:[#allocation85_spill] sm:$0xff] %v6896_v56  ;;  %v6899_v16 = vadd.f32 %v2988_v21, %v8221_v44  ;;  %v6902_v40 = vadd.f32 %v2987_v58, %v8222_v22  ;;  %v8224_v21 = vld [vmem:[#allocation113_spill] sm:$0xff] }
 0x2bf   :  { %v6891_v43 = vadd.f32 %v2985_v11, %v8219_v28  ;;  %v2989_v52 = vand.u32 2147483647, %v2957_v45  ;;  %v6904_v62 = vpop.permute.xlu1 %2870  ;;  %v238_v24 = vsub.f32 0.0, %v6773_v63  ;;  %v2962_v11 = vsub.f32 %v6822_v10, %v6436_v60 }
 0x2c0   :  { %v247_v15 = vmul.f32 0.5, %v231_v49  ;;  %v233_v2 = vsub.f32 0.0, %v6781_v4  ;;  %v232_v28 = vsub.f32 0.0, %v6798_v59  ;;  %v6914_v44 = vadd.f32 %v2990_v12, %v8224_v21  ;;  %v8226_v49 = vld [vmem:[#allocation50_spill] sm:$0xff] }
 0x2c1   :  { %v6909_v8 = vpop.permute.xlu0 %2866  ;;  %v2992_v58 = vand.u32 2147483647, %v2960_v9  ;;  %v246_v22 = vmul.f32 0.5, %v230_v47  ;;  %v241_v45 = vsub.f32 0.0, %v6806_v53  ;;  %v2991_v56 = vand.u32 2147483647, %v2959_v50 }
 0x2c2   :  { %8223 = vst [vmem:[#allocation86_spill] sm:$0xff] %v6909_v8  ;;  %v2961_v63 = vsub.f32 %v6830_v34, %v6436_v60  ;;  %v6919_v29 = vmul.f32 0.5, %v239_v57  ;;  %v240_v10 = vsub.f32 0.0, %v6816_v19  ;;  %v6923_v8 = vadd.f32 %v2989_v52, %v8226_v49  ;;  %v8228_v57 = vld [vmem:[#allocation115_spill] sm:$0xff] }
 0x2c3   :  { %v2882_v4 = vpop.permute.xlu1 %2881  ;;  %v235_v59 = vsub.f32 0.0, %v6824_v18  ;;  %v234_v12 = vsub.f32 0.0, %v6832_v51  ;;  %v6927_v9 = vmul.f32 0.5, %v238_v24  ;;  %v2994_v47 = vand.u32 2147483647, %v2962_v11  ;;  %v8229_v51 = vld [vmem:[#allocation119_spill] sm:$0xff] }
 0x2c4   :  { %8225 = vst [vmem:[#allocation20_spill] sm:$0xff] %v6919_v29  ;;  %v2968_v53 = vsub.f32 %v2882_v4, %v6618_v23  ;;  %v6930_v21 = vmul.f32 0.5, %v233_v2  ;;  %v6932_v34 = vmul.f32 0.5, %v232_v28  ;;  %v6935_v19 = vadd.f32 %v2992_v58, %v8228_v57 }
 0x2c5   :  { %8227 = vst [vmem:[#allocation129_spill] sm:$0xff] %v6927_v9  ;;  %v2878_v50 = vpop.permute.xlu0 %2877  ;;  %v6938_v49 = vmul.f32 0.5, %v241_v45  ;;  %v243_v18 = vsub.f32 0.0, %v6846_v17  ;;  %v6942_v24 = vadd.f32 %v2991_v56, %v8229_v51  ;;  %v2993_v11 = vand.u32 2147483647, %v2961_v63 }
 0x2c6   :  { %v2967_v52 = vsub.f32 %v2878_v50, %v6618_v23  ;;  %v3000_v9 = vand.u32 2147483647, %v2968_v53  ;;  %v6944_v4 = vmul.f32 0.5, %v240_v10  ;;  %v6946_v28 = vmul.f32 0.5, %v235_v59  ;;  %v8230_v50 = vld [vmem:[#allocation95_spill] sm:$0xff] }
 0x2c7   :  { %v2890_v29 = vpop.permute.xlu1 %2889  ;;  %v6948_v6 = vmul.f32 0.5, %v234_v12  ;;  %v242_v58 = vsub.f32 0.0, %v6854_v46  ;;  %v6952_v45 = vadd.f32 %v2994_v47, %v8230_v50  ;;  %v2964_v17 = vsub.f32 %v6861_v25, %v6436_v60  ;;  %v8231_v46 = vld [vmem:[#allocation122_spill] sm:$0xff] }
 0x2c8   :  { %v2999_v2 = vand.u32 2147483647, %v2967_v52  ;;  %v3032_v56 = vadd.f32 %v3000_v9, %v6839_v32  ;;  %v2970_v63 = vsub.f32 %v2890_v29, %v6618_v23  ;;  %v237_v12 = vsub.f32 0.0, %v6863_v27 }
 0x2c9   :  { %v2886_v10 = vpop.permute.xlu0 %2885  ;;  %v6961_v57 = vmul.f32 0.5, %v243_v18  ;;  %v6964_v52 = vadd.f32 %v2993_v11, %v8231_v46  ;;  %v2963_v47 = vsub.f32 %v6874_v48, %v6436_v60  ;;  %v2996_v27 = vand.u32 2147483647, %v2964_v17 }
 0x2ca   :  { %v3031_v53 = vadd.f32 %v2999_v2, %v6842_v39  ;;  %v2969_v59 = vsub.f32 %v2886_v10, %v6618_v23  ;;  %v3048_v25 = vadd.f32 %v3032_v56, %v6872_v1  ;;  %v3002_v32 = vand.u32 2147483647, %v2970_v63 }
 0x2cb   :  { %v2898_v51 = vpop.permute.xlu1 %2897  ;;  %v236_v39 = vsub.f32 0.0, %v6877_v7  ;;  %v6971_v2 = vmul.f32 0.5, %v242_v58  ;;  %v6977_v56 = vmul.f32 0.5, %v237_v12  ;;  %v245_v58 = vsub.f32 0.0, %v6885_v54 }
 0x2cc   :  { %v3047_v29 = vadd.f32 %v3031_v53, %v6880_v41  ;;  %v3001_v9 = vand.u32 2147483647, %v2969_v59  ;;  %v3034_v18 = vadd.f32 %v3002_v32, %v6849_v37  ;;  %v3064_v50 = vmul.f32 0.125, %v3048_v25 }
 0x2cd   :  { %v2972_v11 = vsub.f32 %v2898_v51, %v6618_v23  ;;  %v2894_v10 = vpop.permute.xlu0 %2893  ;;  %v2995_v17 = vand.u32 2147483647, %v2963_v47 }
 0x2ce   :  { %v3033_v48 = vadd.f32 %v3001_v9, %v6852_v20  ;;  %v3063_v46 = vmul.f32 0.125, %v3047_v29  ;;  %v2971_v1 = vsub.f32 %v2894_v10, %v6618_v23  ;;  %v3050_v41 = vadd.f32 %v3034_v18, %v6888_v26 }
 0x2cf   :  { %v3080_v63 = vadd.f32 %v3064_v50, %v247_v15  ;;  %v3004_v7 = vand.u32 2147483647, %v2972_v11  ;;  %v2906_v25 = vpop.permute.xlu1 %2905  ;;  %v252_v18 = vmul.f32 0.5, %v236_v39  ;;  %v8232_v50 = vld [vmem:[#allocation121_spill] sm:$0xff] }
 0x2d0   :  { %v3049_v37 = vadd.f32 %v3033_v48, %v6891_v43  ;;  %v3079_v53 = vadd.f32 %v3063_v46, %v246_v22  ;;  %v3003_v59 = vand.u32 2147483647, %v2971_v1  ;;  %v3066_v12 = vmul.f32 0.125, %v3050_v41  ;;  %v8233_v46 = vld [vmem:[#allocation99_spill] sm:$0xff] }
 0x2d1   :  { %v3096_v32 = vadd.f32 %v3080_v63, %v6445_v61  ;;  %v3112_v20 = vadd.f32 %v3080_v63, %v6675_v38  ;;  %v3036_v29 = vadd.f32 %v3004_v7, %v6857_v14  ;;  %v2902_v9 = vpop.permute.xlu0 %2901  ;;  %v2974_v61 = vsub.f32 %v2906_v25, %v6618_v23 }
 0x2d2   :  { %v3095_v26 = vadd.f32 %v3079_v53, %v6455_v13  ;;  %v3111_v15 = vadd.f32 %v3079_v53, %v6710_v3  ;;  %v3035_v51 = vadd.f32 %v3003_v59, %v6866_v31  ;;  %v3065_v47 = vmul.f32 0.125, %v3049_v37 }
 0x2d3   :  { %3128 = vst [vmem:[#allocation2 + $0x8] sm:$0xff] %v3096_v32  ;;  %3144 = vst [vmem:[#allocation2 + $0x88] sm:$0xff] %v3112_v20  ;;  %v3052_v43 = vadd.f32 %v3036_v29, %v6899_v16  ;;  %v3082_v22 = vadd.f32 %v3066_v12, %v6930_v21  ;;  %v2973_v38 = vsub.f32 %v2902_v9, %v6618_v23  ;;  %v2914_v31 = vpop.permute.xlu1 %2913  ;;  %v3006_v21 = vand.u32 2147483647, %v2974_v61  ;;  %v8235_v29 = vld [vmem:[#allocation55_spill] sm:$0xff]  ;;  %v8236_v9 = vld [vmem:[#allocation56_spill] sm:$0xff] }
 0x2d4   :  { %v6993_v14 = vadd.f32 %v2996_v27, %v6359_v42  ;;  %3127 = vst [vmem:[#allocation2] sm:$0xff] %v3095_v26  ;;  %3143 = vst [vmem:[#allocation2 + $0x80] sm:$0xff] %v3111_v15  ;;  %v3051_v13 = vadd.f32 %v3035_v51, %v6902_v40  ;;  %v3081_v3 = vadd.f32 %v3065_v47, %v6932_v34  ;;  %v8237_v15 = vld [vmem:[#allocation65_spill] sm:$0xff] }
 0x2d5   :  { %v3098_v11 = vadd.f32 %v3082_v22, %v8232_v50  ;;  %v3114_v16 = vadd.f32 %v3082_v22, %v6720_v0  ;;  %v3005_v10 = vand.u32 2147483647, %v2973_v38  ;;  %v2910_v48 = vpop.permute.xlu0 %2909  ;;  %v3068_v27 = vmul.f32 0.125, %v3052_v43  ;;  %v8234_v0 = vld [vmem:[#allocation97_spill] sm:$0xff]  ;;  %v8238_v43 = vld [vmem:[#allocation86_spill] sm:$0xff] }
 0x2d6   :  { %v3097_v1 = vadd.f32 %v3081_v3, %v8233_v46  ;;  %v3113_v42 = vadd.f32 %v3081_v3, %v6730_v33  ;;  %v3067_v41 = vmul.f32 0.125, %v3051_v13  ;;  %v3038_v40 = vadd.f32 %v3006_v21, %v6529_v36  ;;  %v8241_v46 = vld [vmem:[#allocation73_spill] sm:$0xff] }
 0x2d7   :  { %3130 = vst [vmem:[#allocation2 + $0x18] sm:$0xff] %v3098_v11  ;;  %3146 = vst [vmem:[#allocation2 + $0x98] sm:$0xff] %v3114_v16  ;;  %v3037_v34 = vadd.f32 %v3005_v10, %v6869_v5  ;;  %v2976_v39 = vsub.f32 %v2914_v31, %v6618_v23  ;;  %v2975_v63 = vsub.f32 %v2910_v48, %v6618_v23  ;;  %v2922_v59 = vpop.permute.xlu1 %2921  ;;  %v8239_v16 = vld [vmem:[#allocation128_spill] sm:$0xff] }
 0x2d8   :  { %v7006_v7 = vadd.f32 %v2995_v17, %v8234_v0  ;;  %v2966_v37 = vsub.f32 %v6904_v62, %v6436_v60  ;;  %3129 = vst [vmem:[#allocation2 + $0x10] sm:$0xff] %v3097_v1  ;;  %3145 = vst [vmem:[#allocation2 + $0x90] sm:$0xff] %v3113_v42  ;;  %v3084_v33 = vadd.f32 %v3068_v27, %v6946_v28  ;;  %v8240_v10 = vld [vmem:[#allocation76_spill] sm:$0xff]  ;;  %v8242_v42 = vld [vmem:[#allocation26_spill] sm:$0xff] }
 0x2d9   :  { %v3083_v53 = vadd.f32 %v3067_v41, %v6948_v6  ;;  %v3054_v36 = vadd.f32 %v3038_v40, %v6914_v44  ;;  %v3008_v5 = vand.u32 2147483647, %v2976_v39  ;;  %v3007_v25 = vand.u32 2147483647, %v2975_v63  ;;  %v2918_v20 = vpop.permute.xlu0 %2917  ;;  %v8243_v27 = vld [vmem:[#allocation68_spill] sm:$0xff]  ;;  %v8244_v41 = vld [vmem:[#allocation41_spill] sm:$0xff] }
 0x2da   :  { %v3053_v32 = vadd.f32 %v3037_v34, %v6923_v8  ;;  %v3100_v17 = vadd.f32 %v3084_v33, %v8235_v29  ;;  %v3116_v12 = vadd.f32 %v3084_v33, %v6734_v30  ;;  %v2998_v44 = vand.u32 2147483647, %v2966_v37 }
 0x2db   :  { %v3099_v62 = vadd.f32 %v3083_v53, %v8236_v9  ;;  %v3115_v26 = vadd.f32 %v3083_v53, %v6748_v35  ;;  %v3040_v28 = vadd.f32 %v3008_v5, %v6557_v55  ;;  %v3039_v6 = vadd.f32 %v3007_v25, %v8237_v15  ;;  %v2930_v61 = vpop.permute.xlu1 %2929  ;;  %v8246_v25 = vld [vmem:[#allocation129_spill] sm:$0xff]  ;;  %v8250_v15 = vld [vmem:[#allocation59_spill] sm:$0xff] }
 0x2dc   :  { %v3070_v51 = vmul.f32 0.125, %v3054_v36  ;;  %v3069_v47 = vmul.f32 0.125, %v3053_v32  ;;  %v2965_v22 = vsub.f32 %v8238_v43, %v6436_v60  ;;  %3132 = vst [vmem:[#allocation2 + $0x28] sm:$0xff] %v3100_v17  ;;  %3148 = vst [vmem:[#allocation2 + $0xa8] sm:$0xff] %v3116_v12  ;;  %v2978_v30 = vsub.f32 %v2922_v59, %v6618_v23  ;;  %v8245_v36 = vld [vmem:[#allocation20_spill] sm:$0xff] }
 0x2dd   :  { %3131 = vst [vmem:[#allocation2 + $0x20] sm:$0xff] %v3099_v62  ;;  %3147 = vst [vmem:[#allocation2 + $0xa0] sm:$0xff] %v3115_v26  ;;  %v2977_v8 = vsub.f32 %v2918_v20, %v6618_v23  ;;  %v3056_v35 = vadd.f32 %v3040_v28, %v6935_v19  ;;  %v3055_v55 = vadd.f32 %v3039_v6, %v6942_v24  ;;  %v2926_v3 = vpop.permute.xlu0 %2925  ;;  %v8247_v20 = vld [vmem:[#allocation75_spill] sm:$0xff]  ;;  %v8248_v17 = vld [vmem:[#allocation44_spill] sm:$0xff] }
 0x2de   :  { %v3086_v38 = vadd.f32 %v3070_v51, %v6977_v56  ;;  %v3085_v13 = vadd.f32 %v3069_v47, %v252_v18  ;;  %v3010_v31 = vand.u32 2147483647, %v2978_v30  ;;  %v2980_v60 = vsub.f32 %v2930_v61, %v6618_v23  ;;  %v8249_v26 = vld [vmem:[#allocation126_spill] sm:$0xff]  ;;  %v8251_v51 = vld [vmem:[#allocation13_spill] sm:$0xff] }
 0x2df   :  { %v3009_v50 = vand.u32 2147483647, %v2977_v8  ;;  %v2979_v11 = vsub.f32 %v2926_v3, %v6618_v23  ;;  %v3072_v18 = vmul.f32 0.125, %v3056_v35  ;;  %v3071_v40 = vmul.f32 0.125, %v3055_v55  ;;  %v2938_v34 = vpop.permute.xlu1 %2937  ;;  %v8253_v61 = vld [vmem:[#allocation74_spill] sm:$0xff] }
 0x2e0   :  { %v3102_v21 = vadd.f32 %v3086_v38, %v8239_v16  ;;  %v3118_v48 = vadd.f32 %v3086_v38, %v8240_v10  ;;  %v3101_v1 = vadd.f32 %v3085_v13, %v8241_v46  ;;  %v3117_v19 = vadd.f32 %v3085_v13, %v8242_v42  ;;  %v8255_v13 = vld [vmem:[#allocation85_spill] sm:$0xff] }
 0x2e1   :  { %v3042_v24 = vadd.f32 %v3010_v31, %v8243_v27  ;;  %v3041_v56 = vadd.f32 %v3009_v50, %v8244_v41  ;;  %v2997_v39 = vand.u32 2147483647, %v2965_v22  ;;  %v3012_v63 = vand.u32 2147483647, %v2980_v60  ;;  %v2934_v33 = vpop.permute.xlu0 %2933 }
 0x2e2   :  { %3134 = vst [vmem:[#allocation2 + $0x38] sm:$0xff] %v3102_v21  ;;  %3150 = vst [vmem:[#allocation2 + $0xb8] sm:$0xff] %v3118_v48  ;;  %v3011_v0 = vand.u32 2147483647, %v2979_v11  ;;  %v2982_v37 = vsub.f32 %v2938_v34, %v6618_v23  ;;  %v3088_v5 = vadd.f32 %v3072_v18, %v8245_v36  ;;  %v3087_v32 = vadd.f32 %v3071_v40, %v8246_v25  ;;  %v8257_v21 = vld [vmem:[#allocation116_spill] sm:$0xff]  ;;  %v8262_v40 = vld [vmem:[#allocation118_spill] sm:$0xff] }
 0x2e3   :  { %3133 = vst [vmem:[#allocation2 + $0x30] sm:$0xff] %v3101_v1  ;;  %3149 = vst [vmem:[#allocation2 + $0xb0] sm:$0xff] %v3117_v19  ;;  %v3058_v53 = vadd.f32 %v3042_v24, %v6952_v45  ;;  %v3057_v59 = vadd.f32 %v3041_v56, %v6964_v52  ;;  %v3044_v29 = vadd.f32 %v3012_v63, %v8247_v20  ;;  %v8252_v45 = vld [vmem:[#allocation78_spill] sm:$0xff]  ;;  %v244_v3 = vsub.f32 0.0, %v8255_v13  ;;  %v8258_v48 = vld [vmem:[#allocation112_spill] sm:$0xff] }
 0x2e4   :  { %v3043_v12 = vadd.f32 %v3011_v0, %v8248_v17  ;;  %v3014_v9 = vand.u32 2147483647, %v2982_v37  ;;  %v2981_v62 = vsub.f32 %v2934_v33, %v6618_v23  ;;  %v3104_v28 = vadd.f32 %v3088_v5, %v8249_v26  ;;  %v8254_v23 = vld [vmem:[#allocation100_spill] sm:$0xff]  ;;  %v8259_v1 = vld [vmem:[#allocation81_spill] sm:$0xff]  ;;  %v8260_v19 = vld [vmem:[#allocation58_spill] sm:$0xff] }
 0x2e5   :  { %v3120_v6 = vadd.f32 %v3088_v5, %v8250_v15  ;;  %v3103_v47 = vadd.f32 %v3087_v32, %v8251_v51  ;;  %v3119_v43 = vadd.f32 %v3087_v32, %v8252_v45  ;;  %v3060_v52 = vadd.f32 %v3044_v29, %v6993_v14  ;;  %v8261_v24 = vld [vmem:[#allocation91_spill] sm:$0xff]  ;;  %v8265_v0 = vld [vmem:[#allocation24_spill] sm:$0xff]  ;;  %v8268_v36 = vld [vmem:[#allocation6_spill] sm:$0xff] }
 0x2e6   :  { %v3059_v22 = vadd.f32 %v3043_v12, %v7006_v7  ;;  %v3074_v30 = vmul.f32 0.125, %v3058_v53  ;;  %v3073_v8 = vmul.f32 0.125, %v3057_v59  ;;  %v3030_v35 = vadd.f32 %v2998_v44, %v8253_v61  ;;  %3136 = vst [vmem:[#allocation2 + $0x48] sm:$0xff] %v3104_v28  ;;  %v8256_v7 = vld [vmem:[#allocation54_spill] sm:$0xff]  ;;  %v8264_v63 = vld [vmem:[#allocation23_spill] sm:$0xff]  ;;  %v8266_v33 = vld [vmem:[#allocation64_spill] sm:$0xff] }
 0x2e7   :  { %3152 = vst [vmem:[#allocation2 + $0xc8] sm:$0xff] %v3120_v6  ;;  %3135 = vst [vmem:[#allocation2 + $0x40] sm:$0xff] %v3103_v47  ;;  %v3046_v55 = vadd.f32 %v3014_v9, %v8254_v23  ;;  %v3013_v38 = vand.u32 2147483647, %v2981_v62  ;;  %v3076_v14 = vmul.f32 0.125, %v3060_v52  ;;  %v3029_v11 = vadd.f32 %v2997_v39, %v8256_v7  ;;  %v8263_v39 = vld [vmem:[#allocation71_spill] sm:$0xff] }
 0x2e8   :  { %3151 = vst [vmem:[#allocation2 + $0xc0] sm:$0xff] %v3119_v43  ;;  %v3090_v31 = vadd.f32 %v3074_v30, %v6938_v49  ;;  %v3089_v50 = vadd.f32 %v3073_v8, %v6944_v4  ;;  %v3075_v60 = vmul.f32 0.125, %v3059_v22  ;;  %v261_v10 = vmul.f32 0.5, %v245_v58  ;;  %v8267_v59 = vld [vmem:[#allocation43_spill] sm:$0xff]  ;;  %v8270_v32 = vld [vmem:[#allocation104_spill] sm:$0xff]  ;;  %v8272_v29 = vld [vmem:[#allocation66_spill] sm:$0xff] }
 0x2e9   :  { %v3062_v16 = vadd.f32 %v3046_v55, %v3030_v35  ;;  %v3045_v44 = vadd.f32 %v3013_v38, %v8257_v21  ;;  %v3092_v4 = vadd.f32 %v3076_v14, %v6961_v57  ;;  %v2253_v34 = vsub.f32 1.0, %v8262_v40  ;;  %v8269_v5 = vld [vmem:[#allocation127_spill] sm:$0xff]  ;;  %v8273_v12 = vld [vmem:[#allocation21_spill] sm:$0xff]  ;;  %v8274_v28 = vld [vmem:[#allocation12_spill] sm:$0xff] }
 0x2ea   :  { %v3106_v46 = vadd.f32 %v3090_v31, %v8258_v48  ;;  %v3122_v42 = vadd.f32 %v3090_v31, %v8259_v1  ;;  %v3105_v27 = vadd.f32 %v3089_v50, %v8260_v19  ;;  %v3121_v49 = vadd.f32 %v3089_v50, %v8261_v24  ;;  %v8276_v6 = vld [vmem:[#allocation72_spill] sm:$0xff] }
 0x2eb   :  { %v3091_v41 = vadd.f32 %v3075_v60, %v6971_v2  ;;  %v3078_v56 = vmul.f32 0.125, %v3062_v16  ;;  %v3061_v18 = vadd.f32 %v3045_v44, %v3029_v11  ;;  %v2412_v54 = vmul.f32 %v8264_v63, %v8263_v39 }
 0x2ec   :  { %3138 = vst [vmem:[#allocation2 + $0x58] sm:$0xff] %v3106_v46  ;;  %3154 = vst [vmem:[#allocation2 + $0xd8] sm:$0xff] %v3122_v42  ;;  %v260_v58 = vmul.f32 0.5, %v244_v3  ;;  %v2252_v37 = vsub.f32 1.0, %v8265_v0  ;;  %v3108_v53 = vadd.f32 %v3092_v4, %v8266_v33  ;;  %v3124_v57 = vadd.f32 %v3092_v4, %v8267_v59 }
 0x2ed   :  { %3137 = vst [vmem:[#allocation2 + $0x50] sm:$0xff] %v3105_v27  ;;  %3153 = vst [vmem:[#allocation2 + $0xd0] sm:$0xff] %v3121_v49  ;;  %v3107_v2 = vadd.f32 %v3091_v41, %v8268_v36  ;;  %v3123_v25 = vadd.f32 %v3091_v41, %v8269_v5  ;;  %v8271_v20 = vsub.f32 1.0, %v8270_v32  ;;  %v2445_v9 = vadd.f32 %v8273_v12, %v2253_v34 }
 0x2ee   :  { %v3094_v62 = vadd.f32 %v3078_v56, %v261_v10  ;;  %v3077_v26 = vmul.f32 0.125, %v3061_v18  ;;  %3140 = vst [vmem:[#allocation2 + $0x68] sm:$0xff] %v3108_v53  ;;  %3156 = vst [vmem:[#allocation2 + $0xe8] sm:$0xff] %v3124_v57  ;;  %v8275_v15 = vsub.f32 1.0, %v8274_v28  ;;  %v2444_v43 = vadd.f32 %v2412_v54, %v2252_v37 }
 0x2ef   :  { %v2429_v17 = vadd.f32 %v8272_v29, %v8271_v20  ;;  %3139 = vst [vmem:[#allocation2 + $0x60] sm:$0xff] %v3107_v2  ;;  %3155 = vst [vmem:[#allocation2 + $0xe0] sm:$0xff] %v3123_v25 }
 0x2f0   :  { %v2428_v51 = vadd.f32 %v8276_v6, %v8275_v15  ;;  %v3126_v45 = vadd.f32 %v3094_v62, %v2445_v9  ;;  %v3093_v52 = vadd.f32 %v3077_v26, %v260_v58 }
 0x2f1   :  { %v3110_v47 = vadd.f32 %v3094_v62, %v2429_v17 }
 0x2f2   :  { %3158 = vst [vmem:[#allocation2 + $0xf8] sm:$0xff] %v3126_v45  ;;  %v3109_v22 = vadd.f32 %v3093_v52, %v2428_v51  ;;  %v3125_v30 = vadd.f32 %v3093_v52, %v2444_v43 }
 0x2f3   :  { %3142 = vst [vmem:[#allocation2 + $0x78] sm:$0xff] %v3110_v47 }
 0x2f4   :  { %3141 = vst [vmem:[#allocation2 + $0x70] sm:$0xff] %v3109_v22  ;;  %3157 = vst [vmem:[#allocation2 + $0xf0] sm:$0xff] %v3125_v30 }
 0x2f5   :  { %3390 = shalt.err (!%p3387_p4)
}
 0x2f6   :  { %s3391_s9 = scalar_lea.hbm %s7095_s4, 4096 }
 0x2f7   :  { %p3392_p5 = scmp.ne.s32.totalorder %s7095_s4, %s3391_s9  ;;  %p3395_p6 = scmp.lt.u32.totalorder %s3391_s9, %s7095_s4 }
 0x2f9   :  { %p3397_p7 = pnand %p3395_p6, %p3392_p5 }
 0x2fb   :  { %3400 = shalt.err (!%p3397_p7)
}
 0x2fc   :  { %s3405_s14 = smov 128   ;;  %s3406_s15 = smov 8  }
 0x2fd   :  { %3170 = dma.vmem_to_hbm [thread:$0]  %s3165_s5, 4096, %s7095_s4, [#allocation3], %s3405_s14, %s3405_s14, %s3406_s15  }
 0x2fe   :  { %3401 = dma.done.wait [#allocation3], 4096  }
 0x2ff   :  { %3402 = vsyncadd [#allocation3], 4294963200 }
 0x300   :  { %3174 = vsyncpa [#allocation3], 1 }

</bundles_post_ra>
